<compile_context>
chip_gen: v7x
topology: tpu7x:2x2x1
jax: 0.10.0
libtpu: 0.0.40
codegen_flags: <defaults>
</compile_context>

<pallas_src>
import math

import jax
import jax.numpy as jnp
from jax.experimental import pallas as pl
from jax.experimental.pallas import tpu as pltpu

FEATURES = 50
HIDDEN_SIZE = FEATURES
INPUT_SIZE = FEATURES
NUM_LAYERS = 2

LANE = 128      # per-gate lane padding (also padded hidden / padded input dim)
SUBLANE = 8     # batch sublane padding


def _round_up(x, m):
    return ((x + m - 1) // m) * m


# ---------------------------------------------------------------------------
# Fused kernel: 2 LSTM layers + mean over time, single launch, no grid.
# ---------------------------------------------------------------------------
def _fused_lstm_mean_kernel(x2d_ref, wih1_ref, whh1_ref, b1_ref,
                            w2_ref, b2_ref,
                            out_ref, hn_ref, cn_ref, xg_sc):
    BP, HP = out_ref.shape              # padded batch (8), padded hidden (128)
    SB = x2d_ref.shape[0]               # seq * padded batch
    S = SB // BP                        # static sequence length
    f32 = jnp.float32

    # ---- hoisted layer-1 input projection for ALL timesteps (one matmul) ----
    xg_sc[...] = (
        jnp.dot(x2d_ref[...], wih1_ref[...], preferred_element_type=f32)
        + b1_ref[...])

    # hoist the layer-2 bias broadcast out of the time loop
    b2 = jnp.broadcast_to(b2_ref[...], (BP, 4 * HP))

    def sigmoid(z):
        # exact identity: keeps the nonlinearity as a single EUP tanh instead
        # of exp + VPU divide on the serial recurrent chain.
        return 0.5 * (jnp.tanh(0.5 * z) + 1.0)

    def split_gates(z):  # z: (BP, 4*HP); each gate is a lane-aligned 128 slab
        i = sigmoid(z[:, 0 * HP:1 * HP])
        f = sigmoid(z[:, 1 * HP:2 * HP])
        g = jnp.tanh(z[:, 2 * HP:3 * HP])
        o = sigmoid(z[:, 3 * HP:4 * HP])
        return i, f, g, o

    zeros = jnp.zeros((BP, HP), f32)
    h1, c1, h2, c2, acc = zeros, zeros, zeros, zeros, zeros

    # Fully-unrolled static time loop (S=8 here); state lives in vregs.
    for t in range(S):
        # ---- layer 1 (input proj precomputed; only h@W_hh is serial) ----
        z1 = xg_sc[t * BP:(t + 1) * BP, :] + jnp.dot(
            h1, whh1_ref[...], preferred_element_type=f32)
        i1, f1, g1, o1 = split_gates(z1)
        c1 = f1 * c1 + i1 * g1
        h1 = o1 * jnp.tanh(c1)

        # ---- layer 2: single fused K=2*HP matmul (W = [W_ih2; W_hh2]) ----
        hcat = jnp.concatenate([h1, h2], axis=-1)          # (BP, 2*HP)
        z2 = jnp.dot(hcat, w2_ref[...], preferred_element_type=f32) + b2
        i2, f2, g2, o2 = split_gates(z2)
        c2 = f2 * c2 + i2 * g2
        h2 = o2 * jnp.tanh(c2)

        # mean accumulator (torch.mean(rnn_out, axis=1))
        acc = acc + h2

    # ---- single, dense writeback ----
    out_ref[...] = acc * (1.0 / S)
    hn_ref[0] = h1
    hn_ref[1] = h2
    cn_ref[0] = c1
    cn_ref[1] = c2


def rnn_forward(packed, x, hidden_size=HIDDEN_SIZE):
    """x: (batch, seq, features) — batch_first, like the torch module.
    Returns (out, (h_n, c_n)) matching torch semantics."""
    B, S, I = x.shape
    H = hidden_size
    HP = packed["whh1"].shape[0]                  # padded hidden (128)
    IP = packed["wih1"].shape[0]                  # padded input   (128)
    BP = _round_up(max(B, SUBLANE), SUBLANE)      # padded batch   (>= 8)

    # time-major, batch padded to a full sublane tile, features padded to a
    # full lane tile, flattened to (S*BP, IP) for the hoisted projection.
    x_tm = jnp.transpose(x, (1, 0, 2)).astype(jnp.float32)
    x_p = jnp.pad(x_tm, ((0, 0), (0, BP - B), (0, IP - I)))
    x2d = x_p.reshape(S * BP, IP)

    out_p, hn_p, cn_p = pl.pallas_call(
        _fused_lstm_mean_kernel,
        out_shape=(
            jax.ShapeDtypeStruct((BP, HP), jnp.float32),               # mean
            jax.ShapeDtypeStruct((NUM_LAYERS, BP, HP), jnp.float32),   # h_n
            jax.ShapeDtypeStruct((NUM_LAYERS, BP, HP), jnp.float32),   # c_n
        ),
        # no grid: all operands are whole-array VMEM-resident (tiny sizes)
        scratch_shapes=[pltpu.VMEM((S * BP, 4 * HP), jnp.float32)],
    )(x2d, packed["wih1"], packed["whh1"], packed["b1"],
      packed["w2"], packed["b2"])

    # slice padded results back to logical shapes
    out = out_p[:B, :H]
    h_n = hn_p[:, :B, :H]
    c_n = cn_p[:, :B, :H]
    return out, (h_n, c_n)


# ---------------------------------------------------------------------------
# Parameter init (PyTorch-style U(-1/sqrt(H), 1/sqrt(H))) and packing into the
# lane-aligned / padded layout the kernel expects.
# ---------------------------------------------------------------------------
def init_lstm_params(key, input_size, hidden_size, num_layers):
    k = 1.0 / math.sqrt(hidden_size)
    H = hidden_size
    layers = []
    for layer in range(num_layers):
        in_dim = input_size if layer == 0 else hidden_size
        key, k1, k2, k3, k4 = jax.random.split(key, 5)
        layers.append({
            "w_ih": jax.random.uniform(k1, (4 * H, in_dim), jnp.float32, -k, k),
            "w_hh": jax.random.uniform(k2, (4 * H, H), jnp.float32, -k, k),
            "b": (jax.random.uniform(k3, (4 * H,), jnp.float32, -k, k)
                  + jax.random.uniform(k4, (4 * H,), jnp.float32, -k, k)),
        })
    return layers


def pack_params(layers, hidden_size, hp=LANE, ip=LANE):
    """Transpose, zero-pad each gate block to `hp` lanes, pad the contraction
    (K) dims to full tiles, and pre-stack layer 2's [W_ih; W_hh] so the kernel
    does one K=2*hp matmul per step.  Zero padding is exact: padded state
    columns stay identically zero."""
    H = hidden_size

    def pad_gate_cols(w_t):                      # (K, 4H) -> (K, 4*hp)
        K = w_t.shape[0]
        w4 = w_t.reshape(K, 4, H)
        return jnp.pad(w4, ((0, 0), (0, 0), (0, hp - H))).reshape(K, 4 * hp)

    def pad_rows(w, rows):                       # (K, N) -> (rows, N)
        return jnp.pad(w, ((0, rows - w.shape[0]), (0, 0)))

    def pad_bias(b):                             # (4H,) -> (1, 4*hp)
        b4 = b.reshape(4, H)
        return jnp.pad(b4, ((0, 0), (0, hp - H))).reshape(1, 4 * hp)

    l0, l1 = layers
    wih2 = pad_rows(pad_gate_cols(l1["w_ih"].T), hp)        # (hp, 4*hp)
    whh2 = pad_rows(pad_gate_cols(l1["w_hh"].T), hp)        # (hp, 4*hp)
    return {
        "wih1": pad_rows(pad_gate_cols(l0["w_ih"].T), ip),  # (ip, 4*hp)
        "whh1": pad_rows(pad_gate_cols(l0["w_hh"].T), hp),  # (hp, 4*hp)
        "b1": pad_bias(l0["b"]),                            # (1, 4*hp)
        "w2": jnp.concatenate([wih2, whh2], axis=0),        # (2*hp, 4*hp)
        "b2": pad_bias(l1["b"]),                            # (1, 4*hp)
    }


# ---------------------------------------------------------------------------
# Pure-JAX reference (matches torch.nn.LSTM batch_first + mean over time).
# ---------------------------------------------------------------------------
def lstm_reference(layers, x):
    B, S, _ = x.shape
    inp = x.astype(jnp.float32)
    hns, cns = [], []
    for p in layers:
        H = p["w_hh"].shape[1]
        h = jnp.zeros((B, H), jnp.float32)
        c = jnp.zeros((B, H), jnp.float32)
        outs = []
        for t in range(S):
            z = inp[:, t] @ p["w_ih"].T + h @ p["w_hh"].T + p["b"]
            i, f, g, o = jnp.split(z, 4, axis=-1)
            c = jax.nn.sigmoid(f) * c + jax.nn.sigmoid(i) * jnp.tanh(g)
            h = jax.nn.sigmoid(o) * jnp.tanh(c)
            outs.append(h)
        inp = jnp.stack(outs, axis=1)
        hns.append(h)
        cns.append(c)
    return jnp.mean(inp, axis=1), (jnp.stack(hns), jnp.stack(cns))


if __name__ == "__main__":
    key = jax.random.PRNGKey(0)
    pkey, xkey = jax.random.split(key)

    batch, seq = 2, 8
    layers = init_lstm_params(pkey, INPUT_SIZE, HIDDEN_SIZE, NUM_LAYERS)
    packed = pack_params(layers, HIDDEN_SIZE)
    x = jax.random.normal(xkey, (batch, seq, INPUT_SIZE), jnp.float32)

    fwd = jax.jit(rnn_forward)
    out, (h_n, c_n) = fwd(packed, x)
    jax.block_until_ready((out, h_n, c_n))

    assert out.shape == (batch, HIDDEN_SIZE)
    assert h_n.shape == (NUM_LAYERS, batch, HIDDEN_SIZE)
    assert c_n.shape == (NUM_LAYERS, batch, HIDDEN_SIZE)

    # numerical check against a pure-JAX LSTM (all-f32 kernel -> tight tol)
    ref_out, (ref_hn, ref_cn) = lstm_reference(layers, x)
    assert jnp.allclose(out, ref_out, atol=1e-4, rtol=1e-3), \
        float(jnp.max(jnp.abs(out - ref_out)))
    assert jnp.allclose(h_n, ref_hn, atol=1e-4, rtol=1e-3), \
        float(jnp.max(jnp.abs(h_n - ref_hn)))
    assert jnp.allclose(c_n, ref_cn, atol=1e-4, rtol=1e-3), \
        float(jnp.max(jnp.abs(c_n - ref_cn)))

    print("KERNEL_OK")
</pallas_src>

<mosaic_0001>
module attributes {stable_mosaic.version = 11 : i64} {
  func.func @_fused_lstm_mean_kernel(%arg0: memref<64x128xf32, #tpu.memory_space<vmem>>, %arg1: memref<128x512xf32, #tpu.memory_space<vmem>>, %arg2: memref<128x512xf32, #tpu.memory_space<vmem>>, %arg3: memref<1x512xf32, #tpu.memory_space<vmem>>, %arg4: memref<256x512xf32, #tpu.memory_space<vmem>>, %arg5: memref<1x512xf32, #tpu.memory_space<vmem>>, %arg6: memref<8x128xf32, #tpu.memory_space<vmem>>, %arg7: memref<2x8x128xf32, #tpu.memory_space<vmem>>, %arg8: memref<2x8x128xf32, #tpu.memory_space<vmem>>, %arg9: memref<64x512xf32, #tpu.memory_space<vmem>>) attributes {dimension_semantics = [], scalar_prefetch = 0 : i64, scratch_operands = 1 : i64, tpu.core_type = #tpu.core_type<tc>} {
    %c0 = arith.constant 0 : index
    %c0_0 = arith.constant 0 : index
    %0 = vector.load %arg0[%c0, %c0_0] : memref<64x128xf32, #tpu.memory_space<vmem>>, vector<64x128xf32>
    %c0_1 = arith.constant 0 : index
    %c0_2 = arith.constant 0 : index
    %1 = vector.load %arg1[%c0_1, %c0_2] : memref<128x512xf32, #tpu.memory_space<vmem>>, vector<128x512xf32>
    %cst = arith.constant dense<0.000000e+00> : vector<64x512xf32>
    %2 = tpu.matmul %0, %1, %cst {dimension_numbers = #tpu.dot_dimension_numbers<[1], [0], [0], [1], [0, 0, 1, 1], [], []>} : vector<64x128xf32>, vector<128x512xf32>, vector<64x512xf32> -> vector<64x512xf32>
    %c0_3 = arith.constant 0 : index
    %c0_4 = arith.constant 0 : index
    %3 = vector.load %arg3[%c0_3, %c0_4] : memref<1x512xf32, #tpu.memory_space<vmem>>, vector<1x512xf32>
    %4 = vector.broadcast %3 : vector<1x512xf32> to vector<64x512xf32>
    %5 = arith.addf %2, %4 : vector<64x512xf32>
    %c0_5 = arith.constant 0 : index
    %c0_6 = arith.constant 0 : index
    %6 = vector.load %arg9[%c0_5, %c0_6] : memref<64x512xf32, #tpu.memory_space<vmem>>, vector<64x512xf32>
    tpu.vector_store %arg9[%c0_5, %c0_6], %5 {strides = array<i32>} : memref<64x512xf32, #tpu.memory_space<vmem>>, vector<64x512xf32>,
    %c0_7 = arith.constant 0 : index
    %c0_8 = arith.constant 0 : index
    %7 = vector.load %arg5[%c0_7, %c0_8] : memref<1x512xf32, #tpu.memory_space<vmem>>, vector<1x512xf32>
    %8 = vector.shape_cast %7 : vector<1x512xf32> to vector<1x512xf32>
    %9 = vector.broadcast %8 : vector<1x512xf32> to vector<8x512xf32>
    %cst_9 = arith.constant 0.000000e+00 : f32
    %10 = vector.broadcast %cst_9 : f32 to vector<8x128xf32>
    %c0_10 = arith.constant 0 : index
    %c0_11 = arith.constant 0 : index
    %11 = vector.load %arg9[%c0_10, %c0_11] : memref<64x512xf32, #tpu.memory_space<vmem>>, vector<8x512xf32>
    %c0_12 = arith.constant 0 : index
    %c0_13 = arith.constant 0 : index
    %12 = vector.load %arg2[%c0_12, %c0_13] : memref<128x512xf32, #tpu.memory_space<vmem>>, vector<128x512xf32>
    %cst_14 = arith.constant dense<0.000000e+00> : vector<8x512xf32>
    %13 = tpu.matmul %10, %12, %cst_14 {dimension_numbers = #tpu.dot_dimension_numbers<[1], [0], [0], [1], [0, 0, 1, 1], [], []>} : vector<8x128xf32>, vector<128x512xf32>, vector<8x512xf32> -> vector<8x512xf32>
    %14 = arith.addf %11, %13 : vector<8x512xf32>
    %15 = vector.extract_strided_slice %14 {offsets = [0, 0], sizes = [8, 128], strides = [1, 1]} : vector<8x512xf32> to vector<8x128xf32>
    %cst_15 = arith.constant 5.000000e-01 : f32
    %16 = vector.broadcast %cst_15 : f32 to vector<8x128xf32>
    %17 = arith.mulf %16, %15 : vector<8x128xf32>
    %18 = math.tanh %17 : vector<8x128xf32>
    %cst_16 = arith.constant 1.000000e+00 : f32
    %19 = vector.broadcast %cst_16 : f32 to vector<8x128xf32>
    %20 = arith.addf %18, %19 : vector<8x128xf32>
    %cst_17 = arith.constant 5.000000e-01 : f32
    %21 = vector.broadcast %cst_17 : f32 to vector<8x128xf32>
    %22 = arith.mulf %21, %20 : vector<8x128xf32>
    %23 = vector.extract_strided_slice %14 {offsets = [0, 128], sizes = [8, 128], strides = [1, 1]} : vector<8x512xf32> to vector<8x128xf32>
    %cst_18 = arith.constant 5.000000e-01 : f32
    %24 = vector.broadcast %cst_18 : f32 to vector<8x128xf32>
    %25 = arith.mulf %24, %23 : vector<8x128xf32>
    %26 = math.tanh %25 : vector<8x128xf32>
    %cst_19 = arith.constant 1.000000e+00 : f32
    %27 = vector.broadcast %cst_19 : f32 to vector<8x128xf32>
    %28 = arith.addf %26, %27 : vector<8x128xf32>
    %cst_20 = arith.constant 5.000000e-01 : f32
    %29 = vector.broadcast %cst_20 : f32 to vector<8x128xf32>
    %30 = arith.mulf %29, %28 : vector<8x128xf32>
    %31 = vector.extract_strided_slice %14 {offsets = [0, 256], sizes = [8, 128], strides = [1, 1]} : vector<8x512xf32> to vector<8x128xf32>
    %32 = math.tanh %31 : vector<8x128xf32>
    %33 = vector.extract_strided_slice %14 {offsets = [0, 384], sizes = [8, 128], strides = [1, 1]} : vector<8x512xf32> to vector<8x128xf32>
    %cst_21 = arith.constant 5.000000e-01 : f32
    %34 = vector.broadcast %cst_21 : f32 to vector<8x128xf32>
    %35 = arith.mulf %34, %33 : vector<8x128xf32>
    %36 = math.tanh %35 : vector<8x128xf32>
    %cst_22 = arith.constant 1.000000e+00 : f32
    %37 = vector.broadcast %cst_22 : f32 to vector<8x128xf32>
    %38 = arith.addf %36, %37 : vector<8x128xf32>
    %cst_23 = arith.constant 5.000000e-01 : f32
    %39 = vector.broadcast %cst_23 : f32 to vector<8x128xf32>
    %40 = arith.mulf %39, %38 : vector<8x128xf32>
    %41 = arith.mulf %30, %10 : vector<8x128xf32>
    %42 = arith.mulf %22, %32 : vector<8x128xf32>
    %43 = arith.addf %41, %42 : vector<8x128xf32>
    %44 = math.tanh %43 : vector<8x128xf32>
    %45 = arith.mulf %40, %44 : vector<8x128xf32>
    %46 = tpu.concatenate %45, %10 in 1 : vector<8x128xf32>, vector<8x128xf32> -> vector<8x256xf32>
    %c0_24 = arith.constant 0 : index
    %c0_25 = arith.constant 0 : index
    %47 = vector.load %arg4[%c0_24, %c0_25] : memref<256x512xf32, #tpu.memory_space<vmem>>, vector<256x512xf32>
    %cst_26 = arith.constant dense<0.000000e+00> : vector<8x512xf32>
    %48 = tpu.matmul %46, %47, %cst_26 {dimension_numbers = #tpu.dot_dimension_numbers<[1], [0], [0], [1], [0, 0, 1, 1], [], []>} : vector<8x256xf32>, vector<256x512xf32>, vector<8x512xf32> -> vector<8x512xf32>
    %49 = arith.addf %48, %9 : vector<8x512xf32>
    %50 = vector.extract_strided_slice %49 {offsets = [0, 0], sizes = [8, 128], strides = [1, 1]} : vector<8x512xf32> to vector<8x128xf32>
    %cst_27 = arith.constant 5.000000e-01 : f32
    %51 = vector.broadcast %cst_27 : f32 to vector<8x128xf32>
    %52 = arith.mulf %51, %50 : vector<8x128xf32>
    %53 = math.tanh %52 : vector<8x128xf32>
    %cst_28 = arith.constant 1.000000e+00 : f32
    %54 = vector.broadcast %cst_28 : f32 to vector<8x128xf32>
    %55 = arith.addf %53, %54 : vector<8x128xf32>
    %cst_29 = arith.constant 5.000000e-01 : f32
    %56 = vector.broadcast %cst_29 : f32 to vector<8x128xf32>
    %57 = arith.mulf %56, %55 : vector<8x128xf32>
    %58 = vector.extract_strided_slice %49 {offsets = [0, 128], sizes = [8, 128], strides = [1, 1]} : vector<8x512xf32> to vector<8x128xf32>
    %cst_30 = arith.constant 5.000000e-01 : f32
    %59 = vector.broadcast %cst_30 : f32 to vector<8x128xf32>
    %60 = arith.mulf %59, %58 : vector<8x128xf32>
    %61 = math.tanh %60 : vector<8x128xf32>
    %cst_31 = arith.constant 1.000000e+00 : f32
    %62 = vector.broadcast %cst_31 : f32 to vector<8x128xf32>
    %63 = arith.addf %61, %62 : vector<8x128xf32>
    %cst_32 = arith.constant 5.000000e-01 : f32
    %64 = vector.broadcast %cst_32 : f32 to vector<8x128xf32>
    %65 = arith.mulf %64, %63 : vector<8x128xf32>
    %66 = vector.extract_strided_slice %49 {offsets = [0, 256], sizes = [8, 128], strides = [1, 1]} : vector<8x512xf32> to vector<8x128xf32>
    %67 = math.tanh %66 : vector<8x128xf32>
    %68 = vector.extract_strided_slice %49 {offsets = [0, 384], sizes = [8, 128], strides = [1, 1]} : vector<8x512xf32> to vector<8x128xf32>
    %cst_33 = arith.constant 5.000000e-01 : f32
    %69 = vector.broadcast %cst_33 : f32 to vector<8x128xf32>
    %70 = arith.mulf %69, %68 : vector<8x128xf32>
    %71 = math.tanh %70 : vector<8x128xf32>
    %cst_34 = arith.constant 1.000000e+00 : f32
    %72 = vector.broadcast %cst_34 : f32 to vector<8x128xf32>
    %73 = arith.addf %71, %72 : vector<8x128xf32>
    %cst_35 = arith.constant 5.000000e-01 : f32
    %74 = vector.broadcast %cst_35 : f32 to vector<8x128xf32>
    %75 = arith.mulf %74, %73 : vector<8x128xf32>
    %76 = arith.mulf %65, %10 : vector<8x128xf32>
    %77 = arith.mulf %57, %67 : vector<8x128xf32>
    %78 = arith.addf %76, %77 : vector<8x128xf32>
    %79 = math.tanh %78 : vector<8x128xf32>
    %80 = arith.mulf %75, %79 : vector<8x128xf32>
    %81 = arith.addf %10, %80 : vector<8x128xf32>
    %c8 = arith.constant 8 : index
    %c0_36 = arith.constant 0 : index
    %82 = vector.load %arg9[%c8, %c0_36] : memref<64x512xf32, #tpu.memory_space<vmem>>, vector<8x512xf32>
    %c0_37 = arith.constant 0 : index
    %c0_38 = arith.constant 0 : index
    %83 = vector.load %arg2[%c0_37, %c0_38] : memref<128x512xf32, #tpu.memory_space<vmem>>, vector<128x512xf32>
    %cst_39 = arith.constant dense<0.000000e+00> : vector<8x512xf32>
    %84 = tpu.matmul %45, %83, %cst_39 {dimension_numbers = #tpu.dot_dimension_numbers<[1], [0], [0], [1], [0, 0, 1, 1], [], []>} : vector<8x128xf32>, vector<128x512xf32>, vector<8x512xf32> -> vector<8x512xf32>
    %85 = arith.addf %82, %84 : vector<8x512xf32>
    %86 = vector.extract_strided_slice %85 {offsets = [0, 0], sizes = [8, 128], strides = [1, 1]} : vector<8x512xf32> to vector<8x128xf32>
    %cst_40 = arith.constant 5.000000e-01 : f32
    %87 = vector.broadcast %cst_40 : f32 to vector<8x128xf32>
    %88 = arith.mulf %87, %86 : vector<8x128xf32>
    %89 = math.tanh %88 : vector<8x128xf32>
    %cst_41 = arith.constant 1.000000e+00 : f32
    %90 = vector.broadcast %cst_41 : f32 to vector<8x128xf32>
    %91 = arith.addf %89, %90 : vector<8x128xf32>
    %cst_42 = arith.constant 5.000000e-01 : f32
    %92 = vector.broadcast %cst_42 : f32 to vector<8x128xf32>
    %93 = arith.mulf %92, %91 : vector<8x128xf32>
    %94 = vector.extract_strided_slice %85 {offsets = [0, 128], sizes = [8, 128], strides = [1, 1]} : vector<8x512xf32> to vector<8x128xf32>
    %cst_43 = arith.constant 5.000000e-01 : f32
    %95 = vector.broadcast %cst_43 : f32 to vector<8x128xf32>
    %96 = arith.mulf %95, %94 : vector<8x128xf32>
    %97 = math.tanh %96 : vector<8x128xf32>
    %cst_44 = arith.constant 1.000000e+00 : f32
    %98 = vector.broadcast %cst_44 : f32 to vector<8x128xf32>
    %99 = arith.addf %97, %98 : vector<8x128xf32>
    %cst_45 = arith.constant 5.000000e-01 : f32
    %100 = vector.broadcast %cst_45 : f32 to vector<8x128xf32>
    %101 = arith.mulf %100, %99 : vector<8x128xf32>
    %102 = vector.extract_strided_slice %85 {offsets = [0, 256], sizes = [8, 128], strides = [1, 1]} : vector<8x512xf32> to vector<8x128xf32>
    %103 = math.tanh %102 : vector<8x128xf32>
    %104 = vector.extract_strided_slice %85 {offsets = [0, 384], sizes = [8, 128], strides = [1, 1]} : vector<8x512xf32> to vector<8x128xf32>
    %cst_46 = arith.constant 5.000000e-01 : f32
    %105 = vector.broadcast %cst_46 : f32 to vector<8x128xf32>
    %106 = arith.mulf %105, %104 : vector<8x128xf32>
    %107 = math.tanh %106 : vector<8x128xf32>
    %cst_47 = arith.constant 1.000000e+00 : f32
    %108 = vector.broadcast %cst_47 : f32 to vector<8x128xf32>
    %109 = arith.addf %107, %108 : vector<8x128xf32>
    %cst_48 = arith.constant 5.000000e-01 : f32
    %110 = vector.broadcast %cst_48 : f32 to vector<8x128xf32>
    %111 = arith.mulf %110, %109 : vector<8x128xf32>
    %112 = arith.mulf %101, %43 : vector<8x128xf32>
    %113 = arith.mulf %93, %103 : vector<8x128xf32>
    %114 = arith.addf %112, %113 : vector<8x128xf32>
    %115 = math.tanh %114 : vector<8x128xf32>
    %116 = arith.mulf %111, %115 : vector<8x128xf32>
    %117 = tpu.concatenate %116, %80 in 1 : vector<8x128xf32>, vector<8x128xf32> -> vector<8x256xf32>
    %c0_49 = arith.constant 0 : index
    %c0_50 = arith.constant 0 : index
    %118 = vector.load %arg4[%c0_49, %c0_50] : memref<256x512xf32, #tpu.memory_space<vmem>>, vector<256x512xf32>
    %cst_51 = arith.constant dense<0.000000e+00> : vector<8x512xf32>
    %119 = tpu.matmul %117, %118, %cst_51 {dimension_numbers = #tpu.dot_dimension_numbers<[1], [0], [0], [1], [0, 0, 1, 1], [], []>} : vector<8x256xf32>, vector<256x512xf32>, vector<8x512xf32> -> vector<8x512xf32>
    %120 = arith.addf %119, %9 : vector<8x512xf32>
    %121 = vector.extract_strided_slice %120 {offsets = [0, 0], sizes = [8, 128], strides = [1, 1]} : vector<8x512xf32> to vector<8x128xf32>
    %cst_52 = arith.constant 5.000000e-01 : f32
    %122 = vector.broadcast %cst_52 : f32 to vector<8x128xf32>
    %123 = arith.mulf %122, %121 : vector<8x128xf32>
    %124 = math.tanh %123 : vector<8x128xf32>
    %cst_53 = arith.constant 1.000000e+00 : f32
    %125 = vector.broadcast %cst_53 : f32 to vector<8x128xf32>
    %126 = arith.addf %124, %125 : vector<8x128xf32>
    %cst_54 = arith.constant 5.000000e-01 : f32
    %127 = vector.broadcast %cst_54 : f32 to vector<8x128xf32>
    %128 = arith.mulf %127, %126 : vector<8x128xf32>
    %129 = vector.extract_strided_slice %120 {offsets = [0, 128], sizes = [8, 128], strides = [1, 1]} : vector<8x512xf32> to vector<8x128xf32>
    %cst_55 = arith.constant 5.000000e-01 : f32
    %130 = vector.broadcast %cst_55 : f32 to vector<8x128xf32>
    %131 = arith.mulf %130, %129 : vector<8x128xf32>
    %132 = math.tanh %131 : vector<8x128xf32>
    %cst_56 = arith.constant 1.000000e+00 : f32
    %133 = vector.broadcast %cst_56 : f32 to vector<8x128xf32>
    %134 = arith.addf %132, %133 : vector<8x128xf32>
    %cst_57 = arith.constant 5.000000e-01 : f32
    %135 = vector.broadcast %cst_57 : f32 to vector<8x128xf32>
    %136 = arith.mulf %135, %134 : vector<8x128xf32>
    %137 = vector.extract_strided_slice %120 {offsets = [0, 256], sizes = [8, 128], strides = [1, 1]} : vector<8x512xf32> to vector<8x128xf32>
    %138 = math.tanh %137 : vector<8x128xf32>
    %139 = vector.extract_strided_slice %120 {offsets = [0, 384], sizes = [8, 128], strides = [1, 1]} : vector<8x512xf32> to vector<8x128xf32>
    %cst_58 = arith.constant 5.000000e-01 : f32
    %140 = vector.broadcast %cst_58 : f32 to vector<8x128xf32>
    %141 = arith.mulf %140, %139 : vector<8x128xf32>
    %142 = math.tanh %141 : vector<8x128xf32>
    %cst_59 = arith.constant 1.000000e+00 : f32
    %143 = vector.broadcast %cst_59 : f32 to vector<8x128xf32>
    %144 = arith.addf %142, %143 : vector<8x128xf32>
    %cst_60 = arith.constant 5.000000e-01 : f32
    %145 = vector.broadcast %cst_60 : f32 to vector<8x128xf32>
    %146 = arith.mulf %145, %144 : vector<8x128xf32>
    %147 = arith.mulf %136, %78 : vector<8x128xf32>
    %148 = arith.mulf %128, %138 : vector<8x128xf32>
    %149 = arith.addf %147, %148 : vector<8x128xf32>
    %150 = math.tanh %149 : vector<8x128xf32>
    %151 = arith.mulf %146, %150 : vector<8x128xf32>
    %152 = arith.addf %81, %151 : vector<8x128xf32>
    %c16 = arith.constant 16 : index
    %c0_61 = arith.constant 0 : index
    %153 = vector.load %arg9[%c16, %c0_61] : memref<64x512xf32, #tpu.memory_space<vmem>>, vector<8x512xf32>
    %c0_62 = arith.constant 0 : index
    %c0_63 = arith.constant 0 : index
    %154 = vector.load %arg2[%c0_62, %c0_63] : memref<128x512xf32, #tpu.memory_space<vmem>>, vector<128x512xf32>
    %cst_64 = arith.constant dense<0.000000e+00> : vector<8x512xf32>
    %155 = tpu.matmul %116, %154, %cst_64 {dimension_numbers = #tpu.dot_dimension_numbers<[1], [0], [0], [1], [0, 0, 1, 1], [], []>} : vector<8x128xf32>, vector<128x512xf32>, vector<8x512xf32> -> vector<8x512xf32>
    %156 = arith.addf %153, %155 : vector<8x512xf32>
    %157 = vector.extract_strided_slice %156 {offsets = [0, 0], sizes = [8, 128], strides = [1, 1]} : vector<8x512xf32> to vector<8x128xf32>
    %cst_65 = arith.constant 5.000000e-01 : f32
    %158 = vector.broadcast %cst_65 : f32 to vector<8x128xf32>
    %159 = arith.mulf %158, %157 : vector<8x128xf32>
    %160 = math.tanh %159 : vector<8x128xf32>
    %cst_66 = arith.constant 1.000000e+00 : f32
    %161 = vector.broadcast %cst_66 : f32 to vector<8x128xf32>
    %162 = arith.addf %160, %161 : vector<8x128xf32>
    %cst_67 = arith.constant 5.000000e-01 : f32
    %163 = vector.broadcast %cst_67 : f32 to vector<8x128xf32>
    %164 = arith.mulf %163, %162 : vector<8x128xf32>
    %165 = vector.extract_strided_slice %156 {offsets = [0, 128], sizes = [8, 128], strides = [1, 1]} : vector<8x512xf32> to vector<8x128xf32>
    %cst_68 = arith.constant 5.000000e-01 : f32
    %166 = vector.broadcast %cst_68 : f32 to vector<8x128xf32>
    %167 = arith.mulf %166, %165 : vector<8x128xf32>
    %168 = math.tanh %167 : vector<8x128xf32>
    %cst_69 = arith.constant 1.000000e+00 : f32
    %169 = vector.broadcast %cst_69 : f32 to vector<8x128xf32>
    %170 = arith.addf %168, %169 : vector<8x128xf32>
    %cst_70 = arith.constant 5.000000e-01 : f32
    %171 = vector.broadcast %cst_70 : f32 to vector<8x128xf32>
    %172 = arith.mulf %171, %170 : vector<8x128xf32>
    %173 = vector.extract_strided_slice %156 {offsets = [0, 256], sizes = [8, 128], strides = [1, 1]} : vector<8x512xf32> to vector<8x128xf32>
    %174 = math.tanh %173 : vector<8x128xf32>
    %175 = vector.extract_strided_slice %156 {offsets = [0, 384], sizes = [8, 128], strides = [1, 1]} : vector<8x512xf32> to vector<8x128xf32>
    %cst_71 = arith.constant 5.000000e-01 : f32
    %176 = vector.broadcast %cst_71 : f32 to vector<8x128xf32>
    %177 = arith.mulf %176, %175 : vector<8x128xf32>
    %178 = math.tanh %177 : vector<8x128xf32>
    %cst_72 = arith.constant 1.000000e+00 : f32
    %179 = vector.broadcast %cst_72 : f32 to vector<8x128xf32>
    %180 = arith.addf %178, %179 : vector<8x128xf32>
    %cst_73 = arith.constant 5.000000e-01 : f32
    %181 = vector.broadcast %cst_73 : f32 to vector<8x128xf32>
    %182 = arith.mulf %181, %180 : vector<8x128xf32>
    %183 = arith.mulf %172, %114 : vector<8x128xf32>
    %184 = arith.mulf %164, %174 : vector<8x128xf32>
    %185 = arith.addf %183, %184 : vector<8x128xf32>
    %186 = math.tanh %185 : vector<8x128xf32>
    %187 = arith.mulf %182, %186 : vector<8x128xf32>
    %188 = tpu.concatenate %187, %151 in 1 : vector<8x128xf32>, vector<8x128xf32> -> vector<8x256xf32>
    %c0_74 = arith.constant 0 : index
    %c0_75 = arith.constant 0 : index
    %189 = vector.load %arg4[%c0_74, %c0_75] : memref<256x512xf32, #tpu.memory_space<vmem>>, vector<256x512xf32>
    %cst_76 = arith.constant dense<0.000000e+00> : vector<8x512xf32>
    %190 = tpu.matmul %188, %189, %cst_76 {dimension_numbers = #tpu.dot_dimension_numbers<[1], [0], [0], [1], [0, 0, 1, 1], [], []>} : vector<8x256xf32>, vector<256x512xf32>, vector<8x512xf32> -> vector<8x512xf32>
    %191 = arith.addf %190, %9 : vector<8x512xf32>
    %192 = vector.extract_strided_slice %191 {offsets = [0, 0], sizes = [8, 128], strides = [1, 1]} : vector<8x512xf32> to vector<8x128xf32>
    %cst_77 = arith.constant 5.000000e-01 : f32
    %193 = vector.broadcast %cst_77 : f32 to vector<8x128xf32>
    %194 = arith.mulf %193, %192 : vector<8x128xf32>
    %195 = math.tanh %194 : vector<8x128xf32>
    %cst_78 = arith.constant 1.000000e+00 : f32
    %196 = vector.broadcast %cst_78 : f32 to vector<8x128xf32>
    %197 = arith.addf %195, %196 : vector<8x128xf32>
    %cst_79 = arith.constant 5.000000e-01 : f32
    %198 = vector.broadcast %cst_79 : f32 to vector<8x128xf32>
    %199 = arith.mulf %198, %197 : vector<8x128xf32>
    %200 = vector.extract_strided_slice %191 {offsets = [0, 128], sizes = [8, 128], strides = [1, 1]} : vector<8x512xf32> to vector<8x128xf32>
    %cst_80 = arith.constant 5.000000e-01 : f32
    %201 = vector.broadcast %cst_80 : f32 to vector<8x128xf32>
    %202 = arith.mulf %201, %200 : vector<8x128xf32>
    %203 = math.tanh %202 : vector<8x128xf32>
    %cst_81 = arith.constant 1.000000e+00 : f32
    %204 = vector.broadcast %cst_81 : f32 to vector<8x128xf32>
    %205 = arith.addf %203, %204 : vector<8x128xf32>
    %cst_82 = arith.constant 5.000000e-01 : f32
    %206 = vector.broadcast %cst_82 : f32 to vector<8x128xf32>
    %207 = arith.mulf %206, %205 : vector<8x128xf32>
    %208 = vector.extract_strided_slice %191 {offsets = [0, 256], sizes = [8, 128], strides = [1, 1]} : vector<8x512xf32> to vector<8x128xf32>
    %209 = math.tanh %208 : vector<8x128xf32>
    %210 = vector.extract_strided_slice %191 {offsets = [0, 384], sizes = [8, 128], strides = [1, 1]} : vector<8x512xf32> to vector<8x128xf32>
    %cst_83 = arith.constant 5.000000e-01 : f32
    %211 = vector.broadcast %cst_83 : f32 to vector<8x128xf32>
    %212 = arith.mulf %211, %210 : vector<8x128xf32>
    %213 = math.tanh %212 : vector<8x128xf32>
    %cst_84 = arith.constant 1.000000e+00 : f32
    %214 = vector.broadcast %cst_84 : f32 to vector<8x128xf32>
    %215 = arith.addf %213, %214 : vector<8x128xf32>
    %cst_85 = arith.constant 5.000000e-01 : f32
    %216 = vector.broadcast %cst_85 : f32 to vector<8x128xf32>
    %217 = arith.mulf %216, %215 : vector<8x128xf32>
    %218 = arith.mulf %207, %149 : vector<8x128xf32>
    %219 = arith.mulf %199, %209 : vector<8x128xf32>
    %220 = arith.addf %218, %219 : vector<8x128xf32>
    %221 = math.tanh %220 : vector<8x128xf32>
    %222 = arith.mulf %217, %221 : vector<8x128xf32>
    %223 = arith.addf %152, %222 : vector<8x128xf32>
    %c24 = arith.constant 24 : index
    %c0_86 = arith.constant 0 : index
    %224 = vector.load %arg9[%c24, %c0_86] : memref<64x512xf32, #tpu.memory_space<vmem>>, vector<8x512xf32>
    %c0_87 = arith.constant 0 : index
    %c0_88 = arith.constant 0 : index
    %225 = vector.load %arg2[%c0_87, %c0_88] : memref<128x512xf32, #tpu.memory_space<vmem>>, vector<128x512xf32>
    %cst_89 = arith.constant dense<0.000000e+00> : vector<8x512xf32>
    %226 = tpu.matmul %187, %225, %cst_89 {dimension_numbers = #tpu.dot_dimension_numbers<[1], [0], [0], [1], [0, 0, 1, 1], [], []>} : vector<8x128xf32>, vector<128x512xf32>, vector<8x512xf32> -> vector<8x512xf32>
    %227 = arith.addf %224, %226 : vector<8x512xf32>
    %228 = vector.extract_strided_slice %227 {offsets = [0, 0], sizes = [8, 128], strides = [1, 1]} : vector<8x512xf32> to vector<8x128xf32>
    %cst_90 = arith.constant 5.000000e-01 : f32
    %229 = vector.broadcast %cst_90 : f32 to vector<8x128xf32>
    %230 = arith.mulf %229, %228 : vector<8x128xf32>
    %231 = math.tanh %230 : vector<8x128xf32>
    %cst_91 = arith.constant 1.000000e+00 : f32
    %232 = vector.broadcast %cst_91 : f32 to vector<8x128xf32>
    %233 = arith.addf %231, %232 : vector<8x128xf32>
    %cst_92 = arith.constant 5.000000e-01 : f32
    %234 = vector.broadcast %cst_92 : f32 to vector<8x128xf32>
    %235 = arith.mulf %234, %233 : vector<8x128xf32>
    %236 = vector.extract_strided_slice %227 {offsets = [0, 128], sizes = [8, 128], strides = [1, 1]} : vector<8x512xf32> to vector<8x128xf32>
    %cst_93 = arith.constant 5.000000e-01 : f32
    %237 = vector.broadcast %cst_93 : f32 to vector<8x128xf32>
    %238 = arith.mulf %237, %236 : vector<8x128xf32>
    %239 = math.tanh %238 : vector<8x128xf32>
    %cst_94 = arith.constant 1.000000e+00 : f32
    %240 = vector.broadcast %cst_94 : f32 to vector<8x128xf32>
    %241 = arith.addf %239, %240 : vector<8x128xf32>
    %cst_95 = arith.constant 5.000000e-01 : f32
    %242 = vector.broadcast %cst_95 : f32 to vector<8x128xf32>
    %243 = arith.mulf %242, %241 : vector<8x128xf32>
    %244 = vector.extract_strided_slice %227 {offsets = [0, 256], sizes = [8, 128], strides = [1, 1]} : vector<8x512xf32> to vector<8x128xf32>
    %245 = math.tanh %244 : vector<8x128xf32>
    %246 = vector.extract_strided_slice %227 {offsets = [0, 384], sizes = [8, 128], strides = [1, 1]} : vector<8x512xf32> to vector<8x128xf32>
    %cst_96 = arith.constant 5.000000e-01 : f32
    %247 = vector.broadcast %cst_96 : f32 to vector<8x128xf32>
    %248 = arith.mulf %247, %246 : vector<8x128xf32>
    %249 = math.tanh %248 : vector<8x128xf32>
    %cst_97 = arith.constant 1.000000e+00 : f32
    %250 = vector.broadcast %cst_97 : f32 to vector<8x128xf32>
    %251 = arith.addf %249, %250 : vector<8x128xf32>
    %cst_98 = arith.constant 5.000000e-01 : f32
    %252 = vector.broadcast %cst_98 : f32 to vector<8x128xf32>
    %253 = arith.mulf %252, %251 : vector<8x128xf32>
    %254 = arith.mulf %243, %185 : vector<8x128xf32>
    %255 = arith.mulf %235, %245 : vector<8x128xf32>
    %256 = arith.addf %254, %255 : vector<8x128xf32>
    %257 = math.tanh %256 : vector<8x128xf32>
    %258 = arith.mulf %253, %257 : vector<8x128xf32>
    %259 = tpu.concatenate %258, %222 in 1 : vector<8x128xf32>, vector<8x128xf32> -> vector<8x256xf32>
    %c0_99 = arith.constant 0 : index
    %c0_100 = arith.constant 0 : index
    %260 = vector.load %arg4[%c0_99, %c0_100] : memref<256x512xf32, #tpu.memory_space<vmem>>, vector<256x512xf32>
    %cst_101 = arith.constant dense<0.000000e+00> : vector<8x512xf32>
    %261 = tpu.matmul %259, %260, %cst_101 {dimension_numbers = #tpu.dot_dimension_numbers<[1], [0], [0], [1], [0, 0, 1, 1], [], []>} : vector<8x256xf32>, vector<256x512xf32>, vector<8x512xf32> -> vector<8x512xf32>
    %262 = arith.addf %261, %9 : vector<8x512xf32>
    %263 = vector.extract_strided_slice %262 {offsets = [0, 0], sizes = [8, 128], strides = [1, 1]} : vector<8x512xf32> to vector<8x128xf32>
    %cst_102 = arith.constant 5.000000e-01 : f32
    %264 = vector.broadcast %cst_102 : f32 to vector<8x128xf32>
    %265 = arith.mulf %264, %263 : vector<8x128xf32>
    %266 = math.tanh %265 : vector<8x128xf32>
    %cst_103 = arith.constant 1.000000e+00 : f32
    %267 = vector.broadcast %cst_103 : f32 to vector<8x128xf32>
    %268 = arith.addf %266, %267 : vector<8x128xf32>
    %cst_104 = arith.constant 5.000000e-01 : f32
    %269 = vector.broadcast %cst_104 : f32 to vector<8x128xf32>
    %270 = arith.mulf %269, %268 : vector<8x128xf32>
    %271 = vector.extract_strided_slice %262 {offsets = [0, 128], sizes = [8, 128], strides = [1, 1]} : vector<8x512xf32> to vector<8x128xf32>
    %cst_105 = arith.constant 5.000000e-01 : f32
    %272 = vector.broadcast %cst_105 : f32 to vector<8x128xf32>
    %273 = arith.mulf %272, %271 : vector<8x128xf32>
    %274 = math.tanh %273 : vector<8x128xf32>
    %cst_106 = arith.constant 1.000000e+00 : f32
    %275 = vector.broadcast %cst_106 : f32 to vector<8x128xf32>
    %276 = arith.addf %274, %275 : vector<8x128xf32>
    %cst_107 = arith.constant 5.000000e-01 : f32
    %277 = vector.broadcast %cst_107 : f32 to vector<8x128xf32>
    %278 = arith.mulf %277, %276 : vector<8x128xf32>
    %279 = vector.extract_strided_slice %262 {offsets = [0, 256], sizes = [8, 128], strides = [1, 1]} : vector<8x512xf32> to vector<8x128xf32>
    %280 = math.tanh %279 : vector<8x128xf32>
    %281 = vector.extract_strided_slice %262 {offsets = [0, 384], sizes = [8, 128], strides = [1, 1]} : vector<8x512xf32> to vector<8x128xf32>
    %cst_108 = arith.constant 5.000000e-01 : f32
    %282 = vector.broadcast %cst_108 : f32 to vector<8x128xf32>
    %283 = arith.mulf %282, %281 : vector<8x128xf32>
    %284 = math.tanh %283 : vector<8x128xf32>
    %cst_109 = arith.constant 1.000000e+00 : f32
    %285 = vector.broadcast %cst_109 : f32 to vector<8x128xf32>
    %286 = arith.addf %284, %285 : vector<8x128xf32>
    %cst_110 = arith.constant 5.000000e-01 : f32
    %287 = vector.broadcast %cst_110 : f32 to vector<8x128xf32>
    %288 = arith.mulf %287, %286 : vector<8x128xf32>
    %289 = arith.mulf %278, %220 : vector<8x128xf32>
    %290 = arith.mulf %270, %280 : vector<8x128xf32>
    %291 = arith.addf %289, %290 : vector<8x128xf32>
    %292 = math.tanh %291 : vector<8x128xf32>
    %293 = arith.mulf %288, %292 : vector<8x128xf32>
    %294 = arith.addf %223, %293 : vector<8x128xf32>
    %c32 = arith.constant 32 : index
    %c0_111 = arith.constant 0 : index
    %295 = vector.load %arg9[%c32, %c0_111] : memref<64x512xf32, #tpu.memory_space<vmem>>, vector<8x512xf32>
    %c0_112 = arith.constant 0 : index
    %c0_113 = arith.constant 0 : index
    %296 = vector.load %arg2[%c0_112, %c0_113] : memref<128x512xf32, #tpu.memory_space<vmem>>, vector<128x512xf32>
    %cst_114 = arith.constant dense<0.000000e+00> : vector<8x512xf32>
    %297 = tpu.matmul %258, %296, %cst_114 {dimension_numbers = #tpu.dot_dimension_numbers<[1], [0], [0], [1], [0, 0, 1, 1], [], []>} : vector<8x128xf32>, vector<128x512xf32>, vector<8x512xf32> -> vector<8x512xf32>
    %298 = arith.addf %295, %297 : vector<8x512xf32>
    %299 = vector.extract_strided_slice %298 {offsets = [0, 0], sizes = [8, 128], strides = [1, 1]} : vector<8x512xf32> to vector<8x128xf32>
    %cst_115 = arith.constant 5.000000e-01 : f32
    %300 = vector.broadcast %cst_115 : f32 to vector<8x128xf32>
    %301 = arith.mulf %300, %299 : vector<8x128xf32>
    %302 = math.tanh %301 : vector<8x128xf32>
    %cst_116 = arith.constant 1.000000e+00 : f32
    %303 = vector.broadcast %cst_116 : f32 to vector<8x128xf32>
    %304 = arith.addf %302, %303 : vector<8x128xf32>
    %cst_117 = arith.constant 5.000000e-01 : f32
    %305 = vector.broadcast %cst_117 : f32 to vector<8x128xf32>
    %306 = arith.mulf %305, %304 : vector<8x128xf32>
    %307 = vector.extract_strided_slice %298 {offsets = [0, 128], sizes = [8, 128], strides = [1, 1]} : vector<8x512xf32> to vector<8x128xf32>
    %cst_118 = arith.constant 5.000000e-01 : f32
    %308 = vector.broadcast %cst_118 : f32 to vector<8x128xf32>
    %309 = arith.mulf %308, %307 : vector<8x128xf32>
    %310 = math.tanh %309 : vector<8x128xf32>
    %cst_119 = arith.constant 1.000000e+00 : f32
    %311 = vector.broadcast %cst_119 : f32 to vector<8x128xf32>
    %312 = arith.addf %310, %311 : vector<8x128xf32>
    %cst_120 = arith.constant 5.000000e-01 : f32
    %313 = vector.broadcast %cst_120 : f32 to vector<8x128xf32>
    %314 = arith.mulf %313, %312 : vector<8x128xf32>
    %315 = vector.extract_strided_slice %298 {offsets = [0, 256], sizes = [8, 128], strides = [1, 1]} : vector<8x512xf32> to vector<8x128xf32>
    %316 = math.tanh %315 : vector<8x128xf32>
    %317 = vector.extract_strided_slice %298 {offsets = [0, 384], sizes = [8, 128], strides = [1, 1]} : vector<8x512xf32> to vector<8x128xf32>
    %cst_121 = arith.constant 5.000000e-01 : f32
    %318 = vector.broadcast %cst_121 : f32 to vector<8x128xf32>
    %319 = arith.mulf %318, %317 : vector<8x128xf32>
    %320 = math.tanh %319 : vector<8x128xf32>
    %cst_122 = arith.constant 1.000000e+00 : f32
    %321 = vector.broadcast %cst_122 : f32 to vector<8x128xf32>
    %322 = arith.addf %320, %321 : vector<8x128xf32>
    %cst_123 = arith.constant 5.000000e-01 : f32
    %323 = vector.broadcast %cst_123 : f32 to vector<8x128xf32>
    %324 = arith.mulf %323, %322 : vector<8x128xf32>
    %325 = arith.mulf %314, %256 : vector<8x128xf32>
    %326 = arith.mulf %306, %316 : vector<8x128xf32>
    %327 = arith.addf %325, %326 : vector<8x128xf32>
    %328 = math.tanh %327 : vector<8x128xf32>
    %329 = arith.mulf %324, %328 : vector<8x128xf32>
    %330 = tpu.concatenate %329, %293 in 1 : vector<8x128xf32>, vector<8x128xf32> -> vector<8x256xf32>
    %c0_124 = arith.constant 0 : index
    %c0_125 = arith.constant 0 : index
    %331 = vector.load %arg4[%c0_124, %c0_125] : memref<256x512xf32, #tpu.memory_space<vmem>>, vector<256x512xf32>
    %cst_126 = arith.constant dense<0.000000e+00> : vector<8x512xf32>
    %332 = tpu.matmul %330, %331, %cst_126 {dimension_numbers = #tpu.dot_dimension_numbers<[1], [0], [0], [1], [0, 0, 1, 1], [], []>} : vector<8x256xf32>, vector<256x512xf32>, vector<8x512xf32> -> vector<8x512xf32>
    %333 = arith.addf %332, %9 : vector<8x512xf32>
    %334 = vector.extract_strided_slice %333 {offsets = [0, 0], sizes = [8, 128], strides = [1, 1]} : vector<8x512xf32> to vector<8x128xf32>
    %cst_127 = arith.constant 5.000000e-01 : f32
    %335 = vector.broadcast %cst_127 : f32 to vector<8x128xf32>
    %336 = arith.mulf %335, %334 : vector<8x128xf32>
    %337 = math.tanh %336 : vector<8x128xf32>
    %cst_128 = arith.constant 1.000000e+00 : f32
    %338 = vector.broadcast %cst_128 : f32 to vector<8x128xf32>
    %339 = arith.addf %337, %338 : vector<8x128xf32>
    %cst_129 = arith.constant 5.000000e-01 : f32
    %340 = vector.broadcast %cst_129 : f32 to vector<8x128xf32>
    %341 = arith.mulf %340, %339 : vector<8x128xf32>
    %342 = vector.extract_strided_slice %333 {offsets = [0, 128], sizes = [8, 128], strides = [1, 1]} : vector<8x512xf32> to vector<8x128xf32>
    %cst_130 = arith.constant 5.000000e-01 : f32
    %343 = vector.broadcast %cst_130 : f32 to vector<8x128xf32>
    %344 = arith.mulf %343, %342 : vector<8x128xf32>
    %345 = math.tanh %344 : vector<8x128xf32>
    %cst_131 = arith.constant 1.000000e+00 : f32
    %346 = vector.broadcast %cst_131 : f32 to vector<8x128xf32>
    %347 = arith.addf %345, %346 : vector<8x128xf32>
    %cst_132 = arith.constant 5.000000e-01 : f32
    %348 = vector.broadcast %cst_132 : f32 to vector<8x128xf32>
    %349 = arith.mulf %348, %347 : vector<8x128xf32>
    %350 = vector.extract_strided_slice %333 {offsets = [0, 256], sizes = [8, 128], strides = [1, 1]} : vector<8x512xf32> to vector<8x128xf32>
    %351 = math.tanh %350 : vector<8x128xf32>
    %352 = vector.extract_strided_slice %333 {offsets = [0, 384], sizes = [8, 128], strides = [1, 1]} : vector<8x512xf32> to vector<8x128xf32>
    %cst_133 = arith.constant 5.000000e-01 : f32
    %353 = vector.broadcast %cst_133 : f32 to vector<8x128xf32>
    %354 = arith.mulf %353, %352 : vector<8x128xf32>
    %355 = math.tanh %354 : vector<8x128xf32>
    %cst_134 = arith.constant 1.000000e+00 : f32
    %356 = vector.broadcast %cst_134 : f32 to vector<8x128xf32>
    %357 = arith.addf %355, %356 : vector<8x128xf32>
    %cst_135 = arith.constant 5.000000e-01 : f32
    %358 = vector.broadcast %cst_135 : f32 to vector<8x128xf32>
    %359 = arith.mulf %358, %357 : vector<8x128xf32>
    %360 = arith.mulf %349, %291 : vector<8x128xf32>
    %361 = arith.mulf %341, %351 : vector<8x128xf32>
    %362 = arith.addf %360, %361 : vector<8x128xf32>
    %363 = math.tanh %362 : vector<8x128xf32>
    %364 = arith.mulf %359, %363 : vector<8x128xf32>
    %365 = arith.addf %294, %364 : vector<8x128xf32>
    %c40 = arith.constant 40 : index
    %c0_136 = arith.constant 0 : index
    %366 = vector.load %arg9[%c40, %c0_136] : memref<64x512xf32, #tpu.memory_space<vmem>>, vector<8x512xf32>
    %c0_137 = arith.constant 0 : index
    %c0_138 = arith.constant 0 : index
    %367 = vector.load %arg2[%c0_137, %c0_138] : memref<128x512xf32, #tpu.memory_space<vmem>>, vector<128x512xf32>
    %cst_139 = arith.constant dense<0.000000e+00> : vector<8x512xf32>
    %368 = tpu.matmul %329, %367, %cst_139 {dimension_numbers = #tpu.dot_dimension_numbers<[1], [0], [0], [1], [0, 0, 1, 1], [], []>} : vector<8x128xf32>, vector<128x512xf32>, vector<8x512xf32> -> vector<8x512xf32>
    %369 = arith.addf %366, %368 : vector<8x512xf32>
    %370 = vector.extract_strided_slice %369 {offsets = [0, 0], sizes = [8, 128], strides = [1, 1]} : vector<8x512xf32> to vector<8x128xf32>
    %cst_140 = arith.constant 5.000000e-01 : f32
    %371 = vector.broadcast %cst_140 : f32 to vector<8x128xf32>
    %372 = arith.mulf %371, %370 : vector<8x128xf32>
    %373 = math.tanh %372 : vector<8x128xf32>
    %cst_141 = arith.constant 1.000000e+00 : f32
    %374 = vector.broadcast %cst_141 : f32 to vector<8x128xf32>
    %375 = arith.addf %373, %374 : vector<8x128xf32>
    %cst_142 = arith.constant 5.000000e-01 : f32
    %376 = vector.broadcast %cst_142 : f32 to vector<8x128xf32>
    %377 = arith.mulf %376, %375 : vector<8x128xf32>
    %378 = vector.extract_strided_slice %369 {offsets = [0, 128], sizes = [8, 128], strides = [1, 1]} : vector<8x512xf32> to vector<8x128xf32>
    %cst_143 = arith.constant 5.000000e-01 : f32
    %379 = vector.broadcast %cst_143 : f32 to vector<8x128xf32>
    %380 = arith.mulf %379, %378 : vector<8x128xf32>
    %381 = math.tanh %380 : vector<8x128xf32>
    %cst_144 = arith.constant 1.000000e+00 : f32
    %382 = vector.broadcast %cst_144 : f32 to vector<8x128xf32>
    %383 = arith.addf %381, %382 : vector<8x128xf32>
    %cst_145 = arith.constant 5.000000e-01 : f32
    %384 = vector.broadcast %cst_145 : f32 to vector<8x128xf32>
    %385 = arith.mulf %384, %383 : vector<8x128xf32>
    %386 = vector.extract_strided_slice %369 {offsets = [0, 256], sizes = [8, 128], strides = [1, 1]} : vector<8x512xf32> to vector<8x128xf32>
    %387 = math.tanh %386 : vector<8x128xf32>
    %388 = vector.extract_strided_slice %369 {offsets = [0, 384], sizes = [8, 128], strides = [1, 1]} : vector<8x512xf32> to vector<8x128xf32>
    %cst_146 = arith.constant 5.000000e-01 : f32
    %389 = vector.broadcast %cst_146 : f32 to vector<8x128xf32>
    %390 = arith.mulf %389, %388 : vector<8x128xf32>
    %391 = math.tanh %390 : vector<8x128xf32>
    %cst_147 = arith.constant 1.000000e+00 : f32
    %392 = vector.broadcast %cst_147 : f32 to vector<8x128xf32>
    %393 = arith.addf %391, %392 : vector<8x128xf32>
    %cst_148 = arith.constant 5.000000e-01 : f32
    %394 = vector.broadcast %cst_148 : f32 to vector<8x128xf32>
    %395 = arith.mulf %394, %393 : vector<8x128xf32>
    %396 = arith.mulf %385, %327 : vector<8x128xf32>
    %397 = arith.mulf %377, %387 : vector<8x128xf32>
    %398 = arith.addf %396, %397 : vector<8x128xf32>
    %399 = math.tanh %398 : vector<8x128xf32>
    %400 = arith.mulf %395, %399 : vector<8x128xf32>
    %401 = tpu.concatenate %400, %364 in 1 : vector<8x128xf32>, vector<8x128xf32> -> vector<8x256xf32>
    %c0_149 = arith.constant 0 : index
    %c0_150 = arith.constant 0 : index
    %402 = vector.load %arg4[%c0_149, %c0_150] : memref<256x512xf32, #tpu.memory_space<vmem>>, vector<256x512xf32>
    %cst_151 = arith.constant dense<0.000000e+00> : vector<8x512xf32>
    %403 = tpu.matmul %401, %402, %cst_151 {dimension_numbers = #tpu.dot_dimension_numbers<[1], [0], [0], [1], [0, 0, 1, 1], [], []>} : vector<8x256xf32>, vector<256x512xf32>, vector<8x512xf32> -> vector<8x512xf32>
    %404 = arith.addf %403, %9 : vector<8x512xf32>
    %405 = vector.extract_strided_slice %404 {offsets = [0, 0], sizes = [8, 128], strides = [1, 1]} : vector<8x512xf32> to vector<8x128xf32>
    %cst_152 = arith.constant 5.000000e-01 : f32
    %406 = vector.broadcast %cst_152 : f32 to vector<8x128xf32>
    %407 = arith.mulf %406, %405 : vector<8x128xf32>
    %408 = math.tanh %407 : vector<8x128xf32>
    %cst_153 = arith.constant 1.000000e+00 : f32
    %409 = vector.broadcast %cst_153 : f32 to vector<8x128xf32>
    %410 = arith.addf %408, %409 : vector<8x128xf32>
    %cst_154 = arith.constant 5.000000e-01 : f32
    %411 = vector.broadcast %cst_154 : f32 to vector<8x128xf32>
    %412 = arith.mulf %411, %410 : vector<8x128xf32>
    %413 = vector.extract_strided_slice %404 {offsets = [0, 128], sizes = [8, 128], strides = [1, 1]} : vector<8x512xf32> to vector<8x128xf32>
    %cst_155 = arith.constant 5.000000e-01 : f32
    %414 = vector.broadcast %cst_155 : f32 to vector<8x128xf32>
    %415 = arith.mulf %414, %413 : vector<8x128xf32>
    %416 = math.tanh %415 : vector<8x128xf32>
    %cst_156 = arith.constant 1.000000e+00 : f32
    %417 = vector.broadcast %cst_156 : f32 to vector<8x128xf32>
    %418 = arith.addf %416, %417 : vector<8x128xf32>
    %cst_157 = arith.constant 5.000000e-01 : f32
    %419 = vector.broadcast %cst_157 : f32 to vector<8x128xf32>
    %420 = arith.mulf %419, %418 : vector<8x128xf32>
    %421 = vector.extract_strided_slice %404 {offsets = [0, 256], sizes = [8, 128], strides = [1, 1]} : vector<8x512xf32> to vector<8x128xf32>
    %422 = math.tanh %421 : vector<8x128xf32>
    %423 = vector.extract_strided_slice %404 {offsets = [0, 384], sizes = [8, 128], strides = [1, 1]} : vector<8x512xf32> to vector<8x128xf32>
    %cst_158 = arith.constant 5.000000e-01 : f32
    %424 = vector.broadcast %cst_158 : f32 to vector<8x128xf32>
    %425 = arith.mulf %424, %423 : vector<8x128xf32>
    %426 = math.tanh %425 : vector<8x128xf32>
    %cst_159 = arith.constant 1.000000e+00 : f32
    %427 = vector.broadcast %cst_159 : f32 to vector<8x128xf32>
    %428 = arith.addf %426, %427 : vector<8x128xf32>
    %cst_160 = arith.constant 5.000000e-01 : f32
    %429 = vector.broadcast %cst_160 : f32 to vector<8x128xf32>
    %430 = arith.mulf %429, %428 : vector<8x128xf32>
    %431 = arith.mulf %420, %362 : vector<8x128xf32>
    %432 = arith.mulf %412, %422 : vector<8x128xf32>
    %433 = arith.addf %431, %432 : vector<8x128xf32>
    %434 = math.tanh %433 : vector<8x128xf32>
    %435 = arith.mulf %430, %434 : vector<8x128xf32>
    %436 = arith.addf %365, %435 : vector<8x128xf32>
    %c48 = arith.constant 48 : index
    %c0_161 = arith.constant 0 : index
    %437 = vector.load %arg9[%c48, %c0_161] : memref<64x512xf32, #tpu.memory_space<vmem>>, vector<8x512xf32>
    %c0_162 = arith.constant 0 : index
    %c0_163 = arith.constant 0 : index
    %438 = vector.load %arg2[%c0_162, %c0_163] : memref<128x512xf32, #tpu.memory_space<vmem>>, vector<128x512xf32>
    %cst_164 = arith.constant dense<0.000000e+00> : vector<8x512xf32>
    %439 = tpu.matmul %400, %438, %cst_164 {dimension_numbers = #tpu.dot_dimension_numbers<[1], [0], [0], [1], [0, 0, 1, 1], [], []>} : vector<8x128xf32>, vector<128x512xf32>, vector<8x512xf32> -> vector<8x512xf32>
    %440 = arith.addf %437, %439 : vector<8x512xf32>
    %441 = vector.extract_strided_slice %440 {offsets = [0, 0], sizes = [8, 128], strides = [1, 1]} : vector<8x512xf32> to vector<8x128xf32>
    %cst_165 = arith.constant 5.000000e-01 : f32
    %442 = vector.broadcast %cst_165 : f32 to vector<8x128xf32>
    %443 = arith.mulf %442, %441 : vector<8x128xf32>
    %444 = math.tanh %443 : vector<8x128xf32>
    %cst_166 = arith.constant 1.000000e+00 : f32
    %445 = vector.broadcast %cst_166 : f32 to vector<8x128xf32>
    %446 = arith.addf %444, %445 : vector<8x128xf32>
    %cst_167 = arith.constant 5.000000e-01 : f32
    %447 = vector.broadcast %cst_167 : f32 to vector<8x128xf32>
    %448 = arith.mulf %447, %446 : vector<8x128xf32>
    %449 = vector.extract_strided_slice %440 {offsets = [0, 128], sizes = [8, 128], strides = [1, 1]} : vector<8x512xf32> to vector<8x128xf32>
    %cst_168 = arith.constant 5.000000e-01 : f32
    %450 = vector.broadcast %cst_168 : f32 to vector<8x128xf32>
    %451 = arith.mulf %450, %449 : vector<8x128xf32>
    %452 = math.tanh %451 : vector<8x128xf32>
    %cst_169 = arith.constant 1.000000e+00 : f32
    %453 = vector.broadcast %cst_169 : f32 to vector<8x128xf32>
    %454 = arith.addf %452, %453 : vector<8x128xf32>
    %cst_170 = arith.constant 5.000000e-01 : f32
    %455 = vector.broadcast %cst_170 : f32 to vector<8x128xf32>
    %456 = arith.mulf %455, %454 : vector<8x128xf32>
    %457 = vector.extract_strided_slice %440 {offsets = [0, 256], sizes = [8, 128], strides = [1, 1]} : vector<8x512xf32> to vector<8x128xf32>
    %458 = math.tanh %457 : vector<8x128xf32>
    %459 = vector.extract_strided_slice %440 {offsets = [0, 384], sizes = [8, 128], strides = [1, 1]} : vector<8x512xf32> to vector<8x128xf32>
    %cst_171 = arith.constant 5.000000e-01 : f32
    %460 = vector.broadcast %cst_171 : f32 to vector<8x128xf32>
    %461 = arith.mulf %460, %459 : vector<8x128xf32>
    %462 = math.tanh %461 : vector<8x128xf32>
    %cst_172 = arith.constant 1.000000e+00 : f32
    %463 = vector.broadcast %cst_172 : f32 to vector<8x128xf32>
    %464 = arith.addf %462, %463 : vector<8x128xf32>
    %cst_173 = arith.constant 5.000000e-01 : f32
    %465 = vector.broadcast %cst_173 : f32 to vector<8x128xf32>
    %466 = arith.mulf %465, %464 : vector<8x128xf32>
    %467 = arith.mulf %456, %398 : vector<8x128xf32>
    %468 = arith.mulf %448, %458 : vector<8x128xf32>
    %469 = arith.addf %467, %468 : vector<8x128xf32>
    %470 = math.tanh %469 : vector<8x128xf32>
    %471 = arith.mulf %466, %470 : vector<8x128xf32>
    %472 = tpu.concatenate %471, %435 in 1 : vector<8x128xf32>, vector<8x128xf32> -> vector<8x256xf32>
    %c0_174 = arith.constant 0 : index
    %c0_175 = arith.constant 0 : index
    %473 = vector.load %arg4[%c0_174, %c0_175] : memref<256x512xf32, #tpu.memory_space<vmem>>, vector<256x512xf32>
    %cst_176 = arith.constant dense<0.000000e+00> : vector<8x512xf32>
    %474 = tpu.matmul %472, %473, %cst_176 {dimension_numbers = #tpu.dot_dimension_numbers<[1], [0], [0], [1], [0, 0, 1, 1], [], []>} : vector<8x256xf32>, vector<256x512xf32>, vector<8x512xf32> -> vector<8x512xf32>
    %475 = arith.addf %474, %9 : vector<8x512xf32>
    %476 = vector.extract_strided_slice %475 {offsets = [0, 0], sizes = [8, 128], strides = [1, 1]} : vector<8x512xf32> to vector<8x128xf32>
    %cst_177 = arith.constant 5.000000e-01 : f32
    %477 = vector.broadcast %cst_177 : f32 to vector<8x128xf32>
    %478 = arith.mulf %477, %476 : vector<8x128xf32>
    %479 = math.tanh %478 : vector<8x128xf32>
    %cst_178 = arith.constant 1.000000e+00 : f32
    %480 = vector.broadcast %cst_178 : f32 to vector<8x128xf32>
    %481 = arith.addf %479, %480 : vector<8x128xf32>
    %cst_179 = arith.constant 5.000000e-01 : f32
    %482 = vector.broadcast %cst_179 : f32 to vector<8x128xf32>
    %483 = arith.mulf %482, %481 : vector<8x128xf32>
    %484 = vector.extract_strided_slice %475 {offsets = [0, 128], sizes = [8, 128], strides = [1, 1]} : vector<8x512xf32> to vector<8x128xf32>
    %cst_180 = arith.constant 5.000000e-01 : f32
    %485 = vector.broadcast %cst_180 : f32 to vector<8x128xf32>
    %486 = arith.mulf %485, %484 : vector<8x128xf32>
    %487 = math.tanh %486 : vector<8x128xf32>
    %cst_181 = arith.constant 1.000000e+00 : f32
    %488 = vector.broadcast %cst_181 : f32 to vector<8x128xf32>
    %489 = arith.addf %487, %488 : vector<8x128xf32>
    %cst_182 = arith.constant 5.000000e-01 : f32
    %490 = vector.broadcast %cst_182 : f32 to vector<8x128xf32>
    %491 = arith.mulf %490, %489 : vector<8x128xf32>
    %492 = vector.extract_strided_slice %475 {offsets = [0, 256], sizes = [8, 128], strides = [1, 1]} : vector<8x512xf32> to vector<8x128xf32>
    %493 = math.tanh %492 : vector<8x128xf32>
    %494 = vector.extract_strided_slice %475 {offsets = [0, 384], sizes = [8, 128], strides = [1, 1]} : vector<8x512xf32> to vector<8x128xf32>
    %cst_183 = arith.constant 5.000000e-01 : f32
    %495 = vector.broadcast %cst_183 : f32 to vector<8x128xf32>
    %496 = arith.mulf %495, %494 : vector<8x128xf32>
    %497 = math.tanh %496 : vector<8x128xf32>
    %cst_184 = arith.constant 1.000000e+00 : f32
    %498 = vector.broadcast %cst_184 : f32 to vector<8x128xf32>
    %499 = arith.addf %497, %498 : vector<8x128xf32>
    %cst_185 = arith.constant 5.000000e-01 : f32
    %500 = vector.broadcast %cst_185 : f32 to vector<8x128xf32>
    %501 = arith.mulf %500, %499 : vector<8x128xf32>
    %502 = arith.mulf %491, %433 : vector<8x128xf32>
    %503 = arith.mulf %483, %493 : vector<8x128xf32>
    %504 = arith.addf %502, %503 : vector<8x128xf32>
    %505 = math.tanh %504 : vector<8x128xf32>
    %506 = arith.mulf %501, %505 : vector<8x128xf32>
    %507 = arith.addf %436, %506 : vector<8x128xf32>
    %c56 = arith.constant 56 : index
    %c0_186 = arith.constant 0 : index
    %508 = vector.load %arg9[%c56, %c0_186] : memref<64x512xf32, #tpu.memory_space<vmem>>, vector<8x512xf32>
    %c0_187 = arith.constant 0 : index
    %c0_188 = arith.constant 0 : index
    %509 = vector.load %arg2[%c0_187, %c0_188] : memref<128x512xf32, #tpu.memory_space<vmem>>, vector<128x512xf32>
    %cst_189 = arith.constant dense<0.000000e+00> : vector<8x512xf32>
    %510 = tpu.matmul %471, %509, %cst_189 {dimension_numbers = #tpu.dot_dimension_numbers<[1], [0], [0], [1], [0, 0, 1, 1], [], []>} : vector<8x128xf32>, vector<128x512xf32>, vector<8x512xf32> -> vector<8x512xf32>
    %511 = arith.addf %508, %510 : vector<8x512xf32>
    %512 = vector.extract_strided_slice %511 {offsets = [0, 0], sizes = [8, 128], strides = [1, 1]} : vector<8x512xf32> to vector<8x128xf32>
    %cst_190 = arith.constant 5.000000e-01 : f32
    %513 = vector.broadcast %cst_190 : f32 to vector<8x128xf32>
    %514 = arith.mulf %513, %512 : vector<8x128xf32>
    %515 = math.tanh %514 : vector<8x128xf32>
    %cst_191 = arith.constant 1.000000e+00 : f32
    %516 = vector.broadcast %cst_191 : f32 to vector<8x128xf32>
    %517 = arith.addf %515, %516 : vector<8x128xf32>
    %cst_192 = arith.constant 5.000000e-01 : f32
    %518 = vector.broadcast %cst_192 : f32 to vector<8x128xf32>
    %519 = arith.mulf %518, %517 : vector<8x128xf32>
    %520 = vector.extract_strided_slice %511 {offsets = [0, 128], sizes = [8, 128], strides = [1, 1]} : vector<8x512xf32> to vector<8x128xf32>
    %cst_193 = arith.constant 5.000000e-01 : f32
    %521 = vector.broadcast %cst_193 : f32 to vector<8x128xf32>
    %522 = arith.mulf %521, %520 : vector<8x128xf32>
    %523 = math.tanh %522 : vector<8x128xf32>
    %cst_194 = arith.constant 1.000000e+00 : f32
    %524 = vector.broadcast %cst_194 : f32 to vector<8x128xf32>
    %525 = arith.addf %523, %524 : vector<8x128xf32>
    %cst_195 = arith.constant 5.000000e-01 : f32
    %526 = vector.broadcast %cst_195 : f32 to vector<8x128xf32>
    %527 = arith.mulf %526, %525 : vector<8x128xf32>
    %528 = vector.extract_strided_slice %511 {offsets = [0, 256], sizes = [8, 128], strides = [1, 1]} : vector<8x512xf32> to vector<8x128xf32>
    %529 = math.tanh %528 : vector<8x128xf32>
    %530 = vector.extract_strided_slice %511 {offsets = [0, 384], sizes = [8, 128], strides = [1, 1]} : vector<8x512xf32> to vector<8x128xf32>
    %cst_196 = arith.constant 5.000000e-01 : f32
    %531 = vector.broadcast %cst_196 : f32 to vector<8x128xf32>
    %532 = arith.mulf %531, %530 : vector<8x128xf32>
    %533 = math.tanh %532 : vector<8x128xf32>
    %cst_197 = arith.constant 1.000000e+00 : f32
    %534 = vector.broadcast %cst_197 : f32 to vector<8x128xf32>
    %535 = arith.addf %533, %534 : vector<8x128xf32>
    %cst_198 = arith.constant 5.000000e-01 : f32
    %536 = vector.broadcast %cst_198 : f32 to vector<8x128xf32>
    %537 = arith.mulf %536, %535 : vector<8x128xf32>
    %538 = arith.mulf %527, %469 : vector<8x128xf32>
    %539 = arith.mulf %519, %529 : vector<8x128xf32>
    %540 = arith.addf %538, %539 : vector<8x128xf32>
    %541 = math.tanh %540 : vector<8x128xf32>
    %542 = arith.mulf %537, %541 : vector<8x128xf32>
    %543 = tpu.concatenate %542, %506 in 1 : vector<8x128xf32>, vector<8x128xf32> -> vector<8x256xf32>
    %c0_199 = arith.constant 0 : index
    %c0_200 = arith.constant 0 : index
    %544 = vector.load %arg4[%c0_199, %c0_200] : memref<256x512xf32, #tpu.memory_space<vmem>>, vector<256x512xf32>
    %cst_201 = arith.constant dense<0.000000e+00> : vector<8x512xf32>
    %545 = tpu.matmul %543, %544, %cst_201 {dimension_numbers = #tpu.dot_dimension_numbers<[1], [0], [0], [1], [0, 0, 1, 1], [], []>} : vector<8x256xf32>, vector<256x512xf32>, vector<8x512xf32> -> vector<8x512xf32>
    %546 = arith.addf %545, %9 : vector<8x512xf32>
    %547 = vector.extract_strided_slice %546 {offsets = [0, 0], sizes = [8, 128], strides = [1, 1]} : vector<8x512xf32> to vector<8x128xf32>
    %cst_202 = arith.constant 5.000000e-01 : f32
    %548 = vector.broadcast %cst_202 : f32 to vector<8x128xf32>
    %549 = arith.mulf %548, %547 : vector<8x128xf32>
    %550 = math.tanh %549 : vector<8x128xf32>
    %cst_203 = arith.constant 1.000000e+00 : f32
    %551 = vector.broadcast %cst_203 : f32 to vector<8x128xf32>
    %552 = arith.addf %550, %551 : vector<8x128xf32>
    %cst_204 = arith.constant 5.000000e-01 : f32
    %553 = vector.broadcast %cst_204 : f32 to vector<8x128xf32>
    %554 = arith.mulf %553, %552 : vector<8x128xf32>
    %555 = vector.extract_strided_slice %546 {offsets = [0, 128], sizes = [8, 128], strides = [1, 1]} : vector<8x512xf32> to vector<8x128xf32>
    %cst_205 = arith.constant 5.000000e-01 : f32
    %556 = vector.broadcast %cst_205 : f32 to vector<8x128xf32>
    %557 = arith.mulf %556, %555 : vector<8x128xf32>
    %558 = math.tanh %557 : vector<8x128xf32>
    %cst_206 = arith.constant 1.000000e+00 : f32
    %559 = vector.broadcast %cst_206 : f32 to vector<8x128xf32>
    %560 = arith.addf %558, %559 : vector<8x128xf32>
    %cst_207 = arith.constant 5.000000e-01 : f32
    %561 = vector.broadcast %cst_207 : f32 to vector<8x128xf32>
    %562 = arith.mulf %561, %560 : vector<8x128xf32>
    %563 = vector.extract_strided_slice %546 {offsets = [0, 256], sizes = [8, 128], strides = [1, 1]} : vector<8x512xf32> to vector<8x128xf32>
    %564 = math.tanh %563 : vector<8x128xf32>
    %565 = vector.extract_strided_slice %546 {offsets = [0, 384], sizes = [8, 128], strides = [1, 1]} : vector<8x512xf32> to vector<8x128xf32>
    %cst_208 = arith.constant 5.000000e-01 : f32
    %566 = vector.broadcast %cst_208 : f32 to vector<8x128xf32>
    %567 = arith.mulf %566, %565 : vector<8x128xf32>
    %568 = math.tanh %567 : vector<8x128xf32>
    %cst_209 = arith.constant 1.000000e+00 : f32
    %569 = vector.broadcast %cst_209 : f32 to vector<8x128xf32>
    %570 = arith.addf %568, %569 : vector<8x128xf32>
    %cst_210 = arith.constant 5.000000e-01 : f32
    %571 = vector.broadcast %cst_210 : f32 to vector<8x128xf32>
    %572 = arith.mulf %571, %570 : vector<8x128xf32>
    %573 = arith.mulf %562, %504 : vector<8x128xf32>
    %574 = arith.mulf %554, %564 : vector<8x128xf32>
    %575 = arith.addf %573, %574 : vector<8x128xf32>
    %576 = math.tanh %575 : vector<8x128xf32>
    %577 = arith.mulf %572, %576 : vector<8x128xf32>
    %578 = arith.addf %507, %577 : vector<8x128xf32>
    %cst_211 = arith.constant 1.250000e-01 : f32
    %579 = vector.broadcast %cst_211 : f32 to vector<8x128xf32>
    %580 = arith.mulf %578, %579 : vector<8x128xf32>
    %c0_212 = arith.constant 0 : index
    %c0_213 = arith.constant 0 : index
    %581 = vector.load %arg6[%c0_212, %c0_213] : memref<8x128xf32, #tpu.memory_space<vmem>>, vector<8x128xf32>
    tpu.vector_store %arg6[%c0_212, %c0_213], %580 {strides = array<i32>} : memref<8x128xf32, #tpu.memory_space<vmem>>, vector<8x128xf32>,
    %c0_214 = arith.constant 0 : index
    %c0_215 = arith.constant 0 : index
    %c0_216 = arith.constant 0 : index
    %582 = vector.load %arg7[%c0_214, %c0_215, %c0_216] : memref<2x8x128xf32, #tpu.memory_space<vmem>>, vector<1x8x128xf32>
    %583 = vector.shape_cast %582 : vector<1x8x128xf32> to vector<8x128xf32>
    %584 = vector.shape_cast %542 : vector<8x128xf32> to vector<1x8x128xf32>
    tpu.vector_store %arg7[%c0_214, %c0_215, %c0_216], %584 {strides = array<i32>} : memref<2x8x128xf32, #tpu.memory_space<vmem>>, vector<1x8x128xf32>,
    %c1 = arith.constant 1 : index
    %c0_217 = arith.constant 0 : index
    %c0_218 = arith.constant 0 : index
    %585 = vector.load %arg7[%c1, %c0_217, %c0_218] : memref<2x8x128xf32, #tpu.memory_space<vmem>>, vector<1x8x128xf32>
    %586 = vector.shape_cast %585 : vector<1x8x128xf32> to vector<8x128xf32>
    %587 = vector.shape_cast %577 : vector<8x128xf32> to vector<1x8x128xf32>
    tpu.vector_store %arg7[%c1, %c0_217, %c0_218], %587 {strides = array<i32>} : memref<2x8x128xf32, #tpu.memory_space<vmem>>, vector<1x8x128xf32>,
    %c0_219 = arith.constant 0 : index
    %c0_220 = arith.constant 0 : index
    %c0_221 = arith.constant 0 : index
    %588 = vector.load %arg8[%c0_219, %c0_220, %c0_221] : memref<2x8x128xf32, #tpu.memory_space<vmem>>, vector<1x8x128xf32>
    %589 = vector.shape_cast %588 : vector<1x8x128xf32> to vector<8x128xf32>
    %590 = vector.shape_cast %540 : vector<8x128xf32> to vector<1x8x128xf32>
    tpu.vector_store %arg8[%c0_219, %c0_220, %c0_221], %590 {strides = array<i32>} : memref<2x8x128xf32, #tpu.memory_space<vmem>>, vector<1x8x128xf32>,
    %c1_222 = arith.constant 1 : index
    %c0_223 = arith.constant 0 : index
    %c0_224 = arith.constant 0 : index
    %591 = vector.load %arg8[%c1_222, %c0_223, %c0_224] : memref<2x8x128xf32, #tpu.memory_space<vmem>>, vector<1x8x128xf32>
    %592 = vector.shape_cast %591 : vector<1x8x128xf32> to vector<8x128xf32>
    %593 = vector.shape_cast %575 : vector<8x128xf32> to vector<1x8x128xf32>
    tpu.vector_store %arg8[%c1_222, %c0_223, %c0_224], %593 {strides = array<i32>} : memref<2x8x128xf32, #tpu.memory_space<vmem>>, vector<1x8x128xf32>,
    return
  }
}

</mosaic_0001>

<bundles_post_ra>
// kernel: rnn_forward.1
= control target key start
LH: loop header
LB: loop body
LE: loop exit
PB: predicated region body
PF: predicated region fallthrough
CT: control target
= control target key end

     0   :  { %14 = vsyncpa [#allocation4], 0  ;;  %s6513_s0 = inlined_call_operand.vmem [shape: f32[64,128], index: 0, kind: input, shape index: {}]   ;;  %s6514_s1 = inlined_call_operand.hbm [shape: f32[128,512], index: 1, kind: input, shape index: {}]   ;;  %s6515_s2 = inlined_call_operand.hbm [shape: f32[128,512], index: 2, kind: input, shape index: {}]   ;;  %s6516_s3 = inlined_call_operand.vmem [shape: f32[1,512], index: 3, kind: input, shape index: {}]   ;;  %s6517_s4 = inlined_call_operand.hbm [shape: f32[256,512], index: 4, kind: input, shape index: {}]   ;;  %s6518_s5 = inlined_call_operand.vmem [shape: f32[1,512], index: 5, kind: input, shape index: {}]   ;;  %s6519_s6 = inlined_call_operand.vmem [shape: f32[8,128], index: 6, kind: output, shape index: {0}]   ;;  %s6520_s7 = inlined_call_operand.vmem [shape: f32[2,8,128], index: 7, kind: output, shape index: {1}]   ;;  %s6521_s8 = inlined_call_operand.vmem [shape: f32[2,8,128], index: 8, kind: output, shape index: {2}]  }
   0x1   :  { %15 = vsyncpa [#allocation6], 0  ;;  %s5189_s27 = smov [#allocation5]   ;;  %s5190_s29 = smov [#allocation3]  }
   0x2   :  { %s35_s28 = sshll.u32 %s5189_s27, 4  ;;  %s23_s30 = sshll.u32 %s5190_s29, 4  ;;  %s36_s28 = int_to_ptr.vmem [resolvable:$true] %s35_s28  ;;  %s5240_s30 = int_to_ptr.vmem [resolvable:$true] %s23_s30 }
   0x3   :  { %s5119_s11 = scalar_lea.hbm %s6515_s2, 8192 }
   0x4   :  { %p5120_p0 = scmp.ne.s32.totalorder %s6515_s2, %s5119_s11  ;;  %p5123_p1 = scmp.lt.u32.totalorder %s5119_s11, %s6515_s2 }
   0x6   :  { %p5125_p2 = pnand %p5123_p1, %p5120_p0 }
   0x8   :  { %5128 = shalt.err (!%p5125_p2)
}
   0x9   :  { %s5129_s16 = scalar_lea.vmem %s36_s28, 8192  ;;  %p5134_p4 = scmp.lt.s32.totalorder %s36_s28, %s36_s28 }
   0xa   :  { %p5130_p3 = scmp.ne.s32.totalorder %s36_s28, %s5129_s16  ;;  %p5135_p5 = scmp.lt.s32.totalorder %s5129_s16, %s5129_s16 }
   0xc   :  { %p5136_p6 = por %p5135_p5, %p5134_p4 }
   0xe   :  { %p5137_p7 = pnand %p5136_p6, %p5130_p3 }
  0x10   :  { %5140 = shalt.err (!%p5137_p7)
}
  0x11   :  { %s5191_s17 = smov 512   ;;  %s5192_s18 = smov 32  }
  0x12   :  { %41 = dma.hbm_to_vmem [thread:$0]  %s6515_s2, 8192, %s36_s28, [#allocation6], %s5191_s17, %s5191_s17, %s5192_s18  }
  0x13   :  { %s5141_s23 = scalar_lea.hbm %s6514_s1, 8192 }
  0x14   :  { %p5142_p8 = scmp.ne.s32.totalorder %s6514_s1, %s5141_s23  ;;  %p5145_p9 = scmp.lt.u32.totalorder %s5141_s23, %s6514_s1 }
  0x16   :  { %p5147_p10 = pnand %p5145_p9, %p5142_p8 }
  0x18   :  { %5150 = shalt.err (!%p5147_p10)
}
  0x19   :  { %s5151_s29 = scalar_lea.vmem %s5240_s30, 8192  ;;  %p5156_p12 = scmp.lt.s32.totalorder %s5240_s30, %s5240_s30 }
  0x1a   :  { %p5152_p11 = scmp.ne.s32.totalorder %s5240_s30, %s5151_s29  ;;  %p5157_p13 = scmp.lt.s32.totalorder %s5151_s29, %s5151_s29 }
  0x1c   :  { %p5158_p0 = por %p5157_p13, %p5156_p12 }
  0x1e   :  { %p5159_p1 = pnand %p5158_p0, %p5152_p11 }
  0x20   :  { %5162 = shalt.err (!%p5159_p1)
}
  0x21   :  { %29 = dma.hbm_to_vmem [thread:$0]  %s6514_s1, 8192, %s5240_s30, [#allocation4], %s5191_s17, %s5191_s17, %s5192_s18  }
  0x22   :  { %s5193_s9 = smov [#allocation7]   ;;  %s5163_s13 = scalar_lea.hbm %s6517_s4, 16384 }
  0x23   :  { %s49_s10 = sshll.u32 %s5193_s9, 4  ;;  %p5164_p2 = scmp.ne.s32.totalorder %s6517_s4, %s5163_s13  ;;  %s50_s10 = int_to_ptr.vmem [resolvable:$true] %s49_s10 }
  0x24   :  { %p5167_p3 = scmp.lt.u32.totalorder %s5163_s13, %s6517_s4 }
  0x26   :  { %p5169_p4 = pnand %p5167_p3, %p5164_p2 }
  0x28   :  { %5172 = shalt.err (!%p5169_p4)
}
  0x29   :  { %s5173_s20 = scalar_lea.vmem %s50_s10, 16384  ;;  %p5178_p6 = scmp.lt.s32.totalorder %s50_s10, %s50_s10 }
  0x2a   :  { %p5174_p5 = scmp.ne.s32.totalorder %s50_s10, %s5173_s20  ;;  %p5179_p7 = scmp.lt.s32.totalorder %s5173_s20, %s5173_s20 }
  0x2c   :  { %p5180_p8 = por %p5179_p7, %p5178_p6 }
  0x2e   :  { %p5181_p9 = pnand %p5180_p8, %p5174_p5 }
  0x30   :  { %5184 = shalt.err (!%p5181_p9)
}
  0x31   :  { %55 = dma.hbm_to_vmem [thread:$0]  %s6517_s4, 16384, %s50_s10, [#allocation6], %s5191_s17, %s5191_s17, %s5192_s18  }
  0x32   :  { %5185 = dma.done.wait [#allocation4], 8192  }
  0x33   :  { %5186 = vsyncadd [#allocation4], 4294959104 }
  0x34   :  { %5187 = dma.done.wait [#allocation6], 24576  }
  0x35   :  { %5188 = vsyncadd [#allocation6], 4294942720  ;;  %v6522_v0 = vmov 0.0   ;;  %v76_v1 = vld [vmem:[#allocation3 + $0x8] sm:$0xff]  ;;  %v78_v3 = vld [vmem:[#allocation3 + $0x18] sm:$0xff] }
  0x36   :  { %225 = vmatprep.mubr.f32.mxu0 %v6522_v0  ;;  %338 = vmatprep.mubr.f32.mxu1 %v6522_v0  ;;  %v80_v2 = vld [vmem:[#allocation3 + $0x28] sm:$0xff]  ;;  %v82_v5 = vld [vmem:[#allocation3 + $0x38] sm:$0xff]  ;;  %v75_v6 = vld [vmem:[#allocation3] sm:$0xff] }
  0x37   :  { %v3289_v4 = vpack.c.bf16 %v80_v2, %v76_v1  ;;  %v79_v7 = vld [vmem:[#allocation3 + $0x20] sm:$0xff]  ;;  %v3321_v8 = vpack.c.bf16 %v82_v5, %v78_v3  ;;  %v77_v10 = vld [vmem:[#allocation3 + $0x10] sm:$0xff]  ;;  %v84_v12 = vld [vmem:[#allocation3 + $0x48] sm:$0xff] }
  0x38   :  { %v3291_v9 = vpack.c.bf16 %v79_v7, %v75_v6  ;;  %v81_v11 = vld [vmem:[#allocation3 + $0x30] sm:$0xff]  ;;  %v88_v14 = vld [vmem:[#allocation3 + $0x68] sm:$0xff]  ;;  %v86_v15 = vld [vmem:[#allocation3 + $0x58] sm:$0xff] }
  0x39   :  { %3290 = vmatprep.subr.bf16.mxu0 %v3289_v4  ;;  %v3323_v13 = vpack.c.bf16 %v81_v11, %v77_v10  ;;  %v90_v16 = vld [vmem:[#allocation3 + $0x78] sm:$0xff]  ;;  %3322 = vmatprep.subr.bf16.mxu1 %v3321_v8  ;;  %v3293_v17 = vpack.c.bf16 %v88_v14, %v84_v12  ;;  %v83_v19 = vld [vmem:[#allocation3 + $0x40] sm:$0xff]  ;;  %v85_v21 = vld [vmem:[#allocation3 + $0x50] sm:$0xff] }
  0x3a   :  { %3292 = vmatpush1.bf16.msra.mxu0 %v3291_v9  ;;  %v3325_v18 = vpack.c.bf16 %v90_v16, %v86_v15  ;;  %v87_v20 = vld [vmem:[#allocation3 + $0x60] sm:$0xff]  ;;  %v89_v23 = vld [vmem:[#allocation3 + $0x70] sm:$0xff]  ;;  %v92_v24 = vld [vmem:[#allocation3 + $0x88] sm:$0xff] }
  0x3b   :  { %3324 = vmatpush1.bf16.msra.mxu1 %v3323_v13  ;;  %v3295_v22 = vpack.c.bf16 %v87_v20, %v83_v19  ;;  %v96_v25 = vld [vmem:[#allocation3 + $0xa8] sm:$0xff]  ;;  %3294 = vmatprep.subr.bf16.mxu0 %v3293_v17  ;;  %v3327_v26 = vpack.c.bf16 %v89_v23, %v85_v21  ;;  %v94_v28 = vld [vmem:[#allocation3 + $0x98] sm:$0xff]  ;;  %v91_v30 = vld [vmem:[#allocation3 + $0x80] sm:$0xff] }
  0x3c   :  { %3326 = vmatprep.subr.bf16.mxu1 %v3325_v18  ;;  %v3297_v27 = vpack.c.bf16 %v96_v25, %v92_v24  ;;  %v98_v29 = vld [vmem:[#allocation3 + $0xb8] sm:$0xff]  ;;  %v95_v32 = vld [vmem:[#allocation3 + $0xa0] sm:$0xff]  ;;  %v93_v33 = vld [vmem:[#allocation3 + $0x90] sm:$0xff] }
  0x3d   :  { %v3329_v31 = vpack.c.bf16 %v98_v29, %v94_v28  ;;  %v97_v34 = vld [vmem:[#allocation3 + $0xb0] sm:$0xff]  ;;  %v3299_v35 = vpack.c.bf16 %v95_v32, %v91_v30  ;;  %v100_v36 = vld [vmem:[#allocation3 + $0xc8] sm:$0xff]  ;;  %v102_v38 = vld [vmem:[#allocation3 + $0xd8] sm:$0xff] }
  0x3e   :  { %3296 = vmatpush1.bf16.msra.mxu0 %v3295_v22  ;;  %v104_v37 = vld [vmem:[#allocation3 + $0xe8] sm:$0xff]  ;;  %v3331_v39 = vpack.c.bf16 %v97_v34, %v93_v33  ;;  %v106_v41 = vld [vmem:[#allocation3 + $0xf8] sm:$0xff]  ;;  %v99_v42 = vld [vmem:[#allocation3 + $0xc0] sm:$0xff] }
  0x3f   :  { %3328 = vmatpush1.bf16.msra.mxu1 %v3327_v26  ;;  %3298 = vmatprep.subr.bf16.mxu0 %v3297_v27  ;;  %v3301_v40 = vpack.c.bf16 %v104_v37, %v100_v36  ;;  %v103_v43 = vld [vmem:[#allocation3 + $0xe0] sm:$0xff]  ;;  %v3333_v44 = vpack.c.bf16 %v106_v41, %v102_v38  ;;  %v101_v45 = vld [vmem:[#allocation3 + $0xd0] sm:$0xff]  ;;  %v108_v47 = vld [vmem:[#allocation3 + $0x108] sm:$0xff] }
  0x40   :  { %3330 = vmatprep.subr.bf16.mxu1 %v3329_v31  ;;  %v105_v46 = vld [vmem:[#allocation3 + $0xf0] sm:$0xff]  ;;  %v112_v48 = vld [vmem:[#allocation3 + $0x128] sm:$0xff]  ;;  %v110_v49 = vld [vmem:[#allocation3 + $0x118] sm:$0xff]  ;;  %v3303_v51 = vpack.c.bf16 %v103_v43, %v99_v42 }
  0x41   :  { %v114_v50 = vld [vmem:[#allocation3 + $0x138] sm:$0xff]  ;;  %v3335_v52 = vpack.c.bf16 %v105_v46, %v101_v45  ;;  %v3305_v53 = vpack.c.bf16 %v112_v48, %v108_v47  ;;  %v107_v54 = vld [vmem:[#allocation3 + $0x100] sm:$0xff]  ;;  %v109_v56 = vld [vmem:[#allocation3 + $0x110] sm:$0xff] }
  0x42   :  { %3300 = vmatpush1.bf16.msra.mxu0 %v3299_v35  ;;  %v111_v55 = vld [vmem:[#allocation3 + $0x120] sm:$0xff]  ;;  %v3337_v57 = vpack.c.bf16 %v114_v50, %v110_v49  ;;  %v113_v58 = vld [vmem:[#allocation3 + $0x130] sm:$0xff]  ;;  %v116_v59 = vld [vmem:[#allocation3 + $0x148] sm:$0xff] }
  0x43   :  { %3332 = vmatpush1.bf16.msra.mxu1 %v3331_v39  ;;  %3302 = vmatprep.subr.bf16.mxu0 %v3301_v40  ;;  %v120_v60 = vld [vmem:[#allocation3 + $0x168] sm:$0xff]  ;;  %v118_v61 = vld [vmem:[#allocation3 + $0x158] sm:$0xff]  ;;  %v3307_v63 = vpack.c.bf16 %v111_v55, %v107_v54  ;;  %v3339_v1 = vpack.c.bf16 %v113_v58, %v109_v56  ;;  %v115_v3 = vld [vmem:[#allocation3 + $0x140] sm:$0xff] }
  0x44   :  { %3334 = vmatprep.subr.bf16.mxu1 %v3333_v44  ;;  %v122_v62 = vld [vmem:[#allocation3 + $0x178] sm:$0xff]  ;;  %v3309_v2 = vpack.c.bf16 %v120_v60, %v116_v59  ;;  %v119_v4 = vld [vmem:[#allocation3 + $0x160] sm:$0xff]  ;;  %v117_v5 = vld [vmem:[#allocation3 + $0x150] sm:$0xff] }
  0x45   :  { %v3341_v6 = vpack.c.bf16 %v122_v62, %v118_v61  ;;  %v121_v7 = vld [vmem:[#allocation3 + $0x170] sm:$0xff]  ;;  %v124_v8 = vld [vmem:[#allocation3 + $0x188] sm:$0xff]  ;;  %v126_v10 = vld [vmem:[#allocation3 + $0x198] sm:$0xff]  ;;  %v3311_v12 = vpack.c.bf16 %v119_v4, %v115_v3 }
  0x46   :  { %3304 = vmatpush1.bf16.msra.mxu0 %v3303_v51  ;;  %v128_v9 = vld [vmem:[#allocation3 + $0x1a8] sm:$0xff]  ;;  %v130_v11 = vld [vmem:[#allocation3 + $0x1b8] sm:$0xff]  ;;  %v3343_v13 = vpack.c.bf16 %v121_v7, %v117_v5  ;;  %v123_v15 = vld [vmem:[#allocation3 + $0x180] sm:$0xff] }
  0x47   :  { %3336 = vmatpush1.bf16.msra.mxu1 %v3335_v52  ;;  %3306 = vmatprep.subr.bf16.mxu0 %v3305_v53  ;;  %v3313_v14 = vpack.c.bf16 %v128_v9, %v124_v8  ;;  %v127_v16 = vld [vmem:[#allocation3 + $0x1a0] sm:$0xff]  ;;  %v125_v17 = vld [vmem:[#allocation3 + $0x190] sm:$0xff]  ;;  %v3345_v18 = vpack.c.bf16 %v130_v11, %v126_v10  ;;  %v132_v20 = vld [vmem:[#allocation3 + $0x1c8] sm:$0xff] }
  0x48   :  { %3338 = vmatprep.subr.bf16.mxu1 %v3337_v57  ;;  %v129_v19 = vld [vmem:[#allocation3 + $0x1b0] sm:$0xff]  ;;  %v136_v21 = vld [vmem:[#allocation3 + $0x1e8] sm:$0xff]  ;;  %v134_v22 = vld [vmem:[#allocation3 + $0x1d8] sm:$0xff]  ;;  %v3315_v24 = vpack.c.bf16 %v127_v16, %v123_v15 }
  0x49   :  { %v138_v23 = vld [vmem:[#allocation3 + $0x1f8] sm:$0xff]  ;;  %v3347_v25 = vpack.c.bf16 %v129_v19, %v125_v17  ;;  %v3317_v26 = vpack.c.bf16 %v136_v21, %v132_v20  ;;  %v131_v27 = vld [vmem:[#allocation3 + $0x1c0] sm:$0xff]  ;;  %v133_v29 = vld [vmem:[#allocation3 + $0x1d0] sm:$0xff] }
  0x4a   :  { %3308 = vmatpush1.bf16.msra.mxu0 %v3307_v63  ;;  %v135_v28 = vld [vmem:[#allocation3 + $0x1e0] sm:$0xff]  ;;  %v3349_v30 = vpack.c.bf16 %v138_v23, %v134_v22  ;;  %v137_v31 = vld [vmem:[#allocation3 + $0x1f0] sm:$0xff]  ;;  %v446_v32 = vld [vmem:[#allocation5 + $0x8] sm:$0xff] }
  0x4b   :  { %3340 = vmatpush1.bf16.msra.mxu1 %v3339_v1  ;;  %3310 = vmatprep.subr.bf16.mxu0 %v3309_v2  ;;  %v450_v33 = vld [vmem:[#allocation5 + $0x28] sm:$0xff]  ;;  %v448_v34 = vld [vmem:[#allocation5 + $0x18] sm:$0xff]  ;;  %v3319_v36 = vpack.c.bf16 %v135_v28, %v131_v27  ;;  %v3351_v37 = vpack.c.bf16 %v137_v31, %v133_v29  ;;  %v445_v39 = vld [vmem:[#allocation5] sm:$0xff] }
  0x4c   :  { %3342 = vmatprep.subr.bf16.mxu1 %v3341_v6  ;;  %v452_v35 = vld [vmem:[#allocation5 + $0x38] sm:$0xff]  ;;  %v5294_v38 = vpack.c.bf16 %v450_v33, %v446_v32  ;;  %v449_v40 = vld [vmem:[#allocation5 + $0x20] sm:$0xff]  ;;  %v447_v42 = vld [vmem:[#allocation5 + $0x10] sm:$0xff] }
  0x4d   :  { %v5296_v41 = vpack.c.bf16 %v452_v35, %v448_v34  ;;  %v451_v43 = vld [vmem:[#allocation5 + $0x30] sm:$0xff]  ;;  %v454_v44 = vld [vmem:[#allocation5 + $0x48] sm:$0xff]  ;;  %v67_v46 = vld [vmem:[%s6513_s0] sm:$0xff]  ;;  %v5301_v47 = vpack.c.bf16 %v449_v40, %v445_v39 }
  0x4e   :  { %3312 = vmatpush1.bf16.msra.mxu0 %v3311_v12  ;;  %6663 = vst [vmem:[#allocation10_spill] sm:$0xff] %v5294_v38  ;;  %v458_v45 = vld [vmem:[#allocation5 + $0x68] sm:$0xff]  ;;  %v456_v48 = vld [vmem:[#allocation5 + $0x58] sm:$0xff]  ;;  %v5304_v50 = vpack.c.bf16 %v451_v43, %v447_v42  ;;  %v453_v51 = vld [vmem:[#allocation5 + $0x40] sm:$0xff] }
  0x4f   :  { %3344 = vmatpush1.bf16.msra.mxu1 %v3343_v13  ;;  %3314 = vmatprep.subr.bf16.mxu0 %v3313_v14  ;;  %6664 = vst [vmem:[#allocation11_spill] sm:$0xff] %v5296_v41  ;;  %v460_v49 = vld [vmem:[#allocation5 + $0x78] sm:$0xff]  ;;  %v457_v52 = vld [vmem:[#allocation5 + $0x60] sm:$0xff]  ;;  %v5307_v53 = vpack.c.bf16 %v458_v45, %v454_v44  ;;  %v455_v54 = vld [vmem:[#allocation5 + $0x50] sm:$0xff] }
  0x50   :  { %3346 = vmatprep.subr.bf16.mxu1 %v3345_v18  ;;  %v459_v55 = vld [vmem:[#allocation5 + $0x70] sm:$0xff]  ;;  %v5309_v56 = vpack.c.bf16 %v460_v49, %v456_v48  ;;  %v462_v57 = vld [vmem:[#allocation5 + $0x88] sm:$0xff]  ;;  %v5315_v60 = vpack.c.bf16 %v457_v52, %v453_v51  ;;  %v464_v61 = vld [vmem:[#allocation5 + $0x98] sm:$0xff] }
  0x51   :  { %v466_v58 = vld [vmem:[#allocation5 + $0xa8] sm:$0xff]  ;;  %v468_v62 = vld [vmem:[#allocation5 + $0xb8] sm:$0xff]  ;;  %v5319_v63 = vpack.c.bf16 %v459_v55, %v455_v54  ;;  %v461_v1 = vld [vmem:[#allocation5 + $0x80] sm:$0xff] }
  0x52   :  { %3316 = vmatpush1.bf16.msra.mxu0 %v3315_v24  ;;  %v68_v59 = vld [vmem:[%s6513_s0 + $0x8] sm:$0xff]  ;;  %v465_v2 = vld [vmem:[#allocation5 + $0xa0] sm:$0xff]  ;;  %v5323_v3 = vpack.c.bf16 %v466_v58, %v462_v57  ;;  %v463_v4 = vld [vmem:[#allocation5 + $0x90] sm:$0xff]  ;;  %v5326_v6 = vpack.c.bf16 %v468_v62, %v464_v61 }
  0x53   :  { %3348 = vmatpush1.bf16.msra.mxu1 %v3347_v25  ;;  %3318 = vmatprep.subr.bf16.mxu0 %v3317_v26  ;;  %v467_v5 = vld [vmem:[#allocation5 + $0xb0] sm:$0xff]  ;;  %v470_v7 = vld [vmem:[#allocation5 + $0xc8] sm:$0xff]  ;;  %v5332_v10 = vpack.c.bf16 %v465_v2, %v461_v1  ;;  %v472_v11 = vld [vmem:[#allocation5 + $0xd8] sm:$0xff] }
  0x54   :  { %3350 = vmatprep.subr.bf16.mxu1 %v3349_v30  ;;  %v474_v8 = vld [vmem:[#allocation5 + $0xe8] sm:$0xff]  ;;  %v69_v9 = vld [vmem:[%s6513_s0 + $0x10] sm:$0xff]  ;;  %v476_v12 = vld [vmem:[#allocation5 + $0xf8] sm:$0xff]  ;;  %v5336_v13 = vpack.c.bf16 %v467_v5, %v463_v4 }
  0x55   :  { %v469_v14 = vld [vmem:[#allocation5 + $0xc0] sm:$0xff]  ;;  %v5340_v16 = vpack.c.bf16 %v474_v8, %v470_v7  ;;  %v471_v17 = vld [vmem:[#allocation5 + $0xd0] sm:$0xff]  ;;  %v5343_v19 = vpack.c.bf16 %v476_v12, %v472_v11  ;;  %v478_v20 = vld [vmem:[#allocation5 + $0x108] sm:$0xff] }
  0x56   :  { %3320 = vmatpush1.bf16.msra.mxu0 %v3319_v36  ;;  %v473_v15 = vld [vmem:[#allocation5 + $0xe0] sm:$0xff]  ;;  %v475_v18 = vld [vmem:[#allocation5 + $0xf0] sm:$0xff]  ;;  %v482_v21 = vld [vmem:[#allocation5 + $0x128] sm:$0xff] }
  0x57   :  { %3352 = vmatpush1.bf16.msra.mxu1 %v3351_v37  ;;  %3354 = vmatprep.subr.bf16.mxu0 %v5294_v38  ;;  %v70_v22 = vld [vmem:[%s6513_s0 + $0x18] sm:$0xff]  ;;  %v5349_v23 = vpack.c.bf16 %v473_v15, %v469_v14  ;;  %v5353_v26 = vpack.c.bf16 %v475_v18, %v471_v17  ;;  %v477_v27 = vld [vmem:[#allocation5 + $0x100] sm:$0xff]  ;;  %v5357_v29 = vpack.c.bf16 %v482_v21, %v478_v20  ;;  %v479_v30 = vld [vmem:[#allocation5 + $0x110] sm:$0xff] }
  0x58   :  { %3386 = vmatprep.subr.bf16.mxu1 %v5296_v41  ;;  %v480_v24 = vld [vmem:[#allocation5 + $0x118] sm:$0xff]  ;;  %v481_v28 = vld [vmem:[#allocation5 + $0x120] sm:$0xff]  ;;  %v483_v31 = vld [vmem:[#allocation5 + $0x130] sm:$0xff] }
  0x59   :  { %226 = vmatmul.mubr.f32.vlgmr.msra.gmra.mrb[0].mxu0 %v67_v46  ;;  %v484_v25 = vld [vmem:[#allocation5 + $0x138] sm:$0xff]  ;;  %v486_v33 = vld [vmem:[#allocation5 + $0x148] sm:$0xff]  ;;  %v71_v35 = vld [vmem:[%s6513_s0 + $0x20] sm:$0xff]  ;;  %v5366_v36 = vpack.c.bf16 %v481_v28, %v477_v27  ;;  %v5370_v40 = vpack.c.bf16 %v483_v31, %v479_v30 }
  0x5a   :  { %339 = vmatmul.mubr.f32.vlgmr.msra.gmra.mrb[0].mxu1 %v67_v46  ;;  %3356 = vmatpush1.bf16.msra.mxu0 %v5301_v47  ;;  %v5360_v32 = vpack.c.bf16 %v484_v25, %v480_v24  ;;  %v490_v34 = vld [vmem:[#allocation5 + $0x168] sm:$0xff]  ;;  %v488_v37 = vld [vmem:[#allocation5 + $0x158] sm:$0xff]  ;;  %v485_v42 = vld [vmem:[#allocation5 + $0x140] sm:$0xff] }
  0x5b   :  { %3388 = vmatpush1.bf16.msra.mxu1 %v5304_v50  ;;  %231 = vmatprep.mubr.f32.mxu0 %v6522_v0  ;;  %v492_v39 = vld [vmem:[#allocation5 + $0x178] sm:$0xff]  ;;  %v489_v43 = vld [vmem:[#allocation5 + $0x160] sm:$0xff]  ;;  %v5374_v44 = vpack.c.bf16 %v490_v34, %v486_v33  ;;  %v487_v45 = vld [vmem:[#allocation5 + $0x150] sm:$0xff] }
  0x5c   :  { %344 = vmatprep.mubr.f32.mxu1 %v6522_v0  ;;  %3358 = vmatprep.subr.bf16.mxu0 %v5307_v53  ;;  %v491_v46 = vld [vmem:[#allocation5 + $0x170] sm:$0xff]  ;;  %v5377_v48 = vpack.c.bf16 %v492_v39, %v488_v37  ;;  %v494_v49 = vld [vmem:[#allocation5 + $0x188] sm:$0xff]  ;;  %v5383_v54 = vpack.c.bf16 %v489_v43, %v485_v42  ;;  %v496_v55 = vld [vmem:[#allocation5 + $0x198] sm:$0xff] }
  0x5d   :  { %232 = vmatmul.mubr.f32.gmra.mrb[2].mxu0 %v68_v59  ;;  %3390 = vmatprep.subr.bf16.mxu1 %v5309_v56  ;;  %v498_v51 = vld [vmem:[#allocation5 + $0x1a8] sm:$0xff]  ;;  %v500_v57 = vld [vmem:[#allocation5 + $0x1b8] sm:$0xff]  ;;  %v5387_v58 = vpack.c.bf16 %v491_v46, %v487_v45  ;;  %v497_v61 = vld [vmem:[#allocation5 + $0x1a0] sm:$0xff] }
  0x5e   :  { %345 = vmatmul.mubr.f32.gmra.mrb[2].mxu1 %v68_v59  ;;  %3360 = vmatpush1.bf16.msra.mxu0 %v5315_v60  ;;  %v72_v52 = vld [vmem:[%s6513_s0 + $0x28] sm:$0xff]  ;;  %v493_v59 = vld [vmem:[#allocation5 + $0x180] sm:$0xff]  ;;  %v5391_v62 = vpack.c.bf16 %v498_v51, %v494_v49  ;;  %v495_v1 = vld [vmem:[#allocation5 + $0x190] sm:$0xff]  ;;  %v5394_v4 = vpack.c.bf16 %v500_v57, %v496_v55 }
  0x5f   :  { %3392 = vmatpush1.bf16.msra.mxu1 %v5319_v63  ;;  %237 = vmatprep.mubr.f32.mxu0 %v6522_v0  ;;  %v499_v2 = vld [vmem:[#allocation5 + $0x1b0] sm:$0xff]  ;;  %v502_v5 = vld [vmem:[#allocation5 + $0x1c8] sm:$0xff]  ;;  %v504_v11 = vld [vmem:[#allocation5 + $0x1d8] sm:$0xff] }
  0x60   :  { %350 = vmatprep.mubr.f32.mxu1 %v6522_v0  ;;  %3362 = vmatprep.subr.bf16.mxu0 %v5323_v3  ;;  %v506_v7 = vld [vmem:[#allocation5 + $0x1e8] sm:$0xff]  ;;  %v73_v8 = vld [vmem:[%s6513_s0 + $0x30] sm:$0xff]  ;;  %v508_v12 = vld [vmem:[#allocation5 + $0x1f8] sm:$0xff]  ;;  %v5404_v14 = vpack.c.bf16 %v499_v2, %v495_v1 }
  0x61   :  { %238 = vmatmul.mubr.f32.gmra.mrb[4].mxu0 %v69_v9  ;;  %3394 = vmatprep.subr.bf16.mxu1 %v5326_v6  ;;  %v501_v15 = vld [vmem:[#allocation5 + $0x1c0] sm:$0xff]  ;;  %v5408_v18 = vpack.c.bf16 %v506_v7, %v502_v5  ;;  %v503_v20 = vld [vmem:[#allocation5 + $0x1d0] sm:$0xff]  ;;  %v674_v24 = vld [vmem:[#allocation7 + $0x8] sm:$0xff] }
  0x62   :  { %351 = vmatmul.mubr.f32.gmra.mrb[4].mxu1 %v69_v9  ;;  %3364 = vmatpush1.bf16.msra.mxu0 %v5332_v10  ;;  %v5400_v9 = vpack.c.bf16 %v497_v61, %v493_v59  ;;  %v505_v17 = vld [vmem:[#allocation5 + $0x1e0] sm:$0xff]  ;;  %v507_v21 = vld [vmem:[#allocation5 + $0x1f0] sm:$0xff]  ;;  %v678_v25 = vld [vmem:[#allocation7 + $0x28] sm:$0xff] }
  0x63   :  { %3396 = vmatpush1.bf16.msra.mxu1 %v5336_v13  ;;  %243 = vmatprep.mubr.f32.mxu0 %v6522_v0  ;;  %v74_v27 = vld [vmem:[%s6513_s0 + $0x38] sm:$0xff]  ;;  %v5417_v28 = vpack.c.bf16 %v505_v17, %v501_v15  ;;  %v5421_v33 = vpack.c.bf16 %v507_v21, %v503_v20  ;;  %v673_v34 = vld [vmem:[#allocation7] sm:$0xff]  ;;  %v675_v37 = vld [vmem:[#allocation7 + $0x10] sm:$0xff]  ;;  %v5425_v39 = vpack.c.bf16 %v678_v25, %v674_v24 }
  0x64   :  { %356 = vmatprep.mubr.f32.mxu1 %v6522_v0  ;;  %3366 = vmatprep.subr.bf16.mxu0 %v5340_v16  ;;  %v676_v30 = vld [vmem:[#allocation7 + $0x18] sm:$0xff]  ;;  %v679_v42 = vld [vmem:[#allocation7 + $0x30] sm:$0xff]  ;;  %v682_v43 = vld [vmem:[#allocation7 + $0x48] sm:$0xff] }
  0x65   :  { %244 = vmatmul.mubr.f32.gmra.mrb[6].mxu0 %v70_v22  ;;  %3398 = vmatprep.subr.bf16.mxu1 %v5343_v19  ;;  %v680_v31 = vld [vmem:[#allocation7 + $0x38] sm:$0xff]  ;;  %v686_v45 = vld [vmem:[#allocation7 + $0x68] sm:$0xff]  ;;  %v5435_v55 = vpack.c.bf16 %v679_v42, %v675_v37  ;;  %v681_v59 = vld [vmem:[#allocation7 + $0x40] sm:$0xff] }
  0x66   :  { %357 = vmatmul.mubr.f32.gmra.mrb[6].mxu1 %v70_v22  ;;  %3368 = vmatpush1.bf16.msra.mxu0 %v5349_v23  ;;  %v5411_v22 = vpack.c.bf16 %v508_v12, %v504_v11  ;;  %v5428_v46 = vpack.c.bf16 %v680_v31, %v676_v30  ;;  %v684_v49 = vld [vmem:[#allocation7 + $0x58] sm:$0xff]  ;;  %v5437_v57 = vpack.c.bf16 %v686_v45, %v682_v43  ;;  %v685_v61 = vld [vmem:[#allocation7 + $0x60] sm:$0xff]  ;;  %v683_v1 = vld [vmem:[#allocation7 + $0x50] sm:$0xff] }
  0x67   :  { %3400 = vmatpush1.bf16.msra.mxu1 %v5353_v26  ;;  %249 = vmatprep.mubr.f32.mxu0 %v6522_v0  ;;  %v688_v51 = vld [vmem:[#allocation7 + $0x78] sm:$0xff]  ;;  %v687_v5 = vld [vmem:[#allocation7 + $0x70] sm:$0xff]  ;;  %v690_v7 = vld [vmem:[#allocation7 + $0x88] sm:$0xff]  ;;  %v5447_v15 = vpack.c.bf16 %v685_v61, %v681_v59 }
  0x68   :  { %362 = vmatprep.mubr.f32.mxu1 %v6522_v0  ;;  %3370 = vmatprep.subr.bf16.mxu0 %v5357_v29  ;;  %v5441_v2 = vpack.c.bf16 %v688_v51, %v684_v49  ;;  %v692_v11 = vld [vmem:[#allocation7 + $0x98] sm:$0xff]  ;;  %v5451_v17 = vpack.c.bf16 %v687_v5, %v683_v1  ;;  %v689_v21 = vld [vmem:[#allocation7 + $0x80] sm:$0xff]  ;;  %v691_v25 = vld [vmem:[#allocation7 + $0x90] sm:$0xff] }
  0x69   :  { %250 = vmatmul.mubr.f32.gmra.mrb[8].mxu0 %v71_v35  ;;  %3402 = vmatprep.subr.bf16.mxu1 %v5360_v32  ;;  %v696_v12 = vld [vmem:[#allocation7 + $0xb8] sm:$0xff]  ;;  %6666 = vst [vmem:[#allocation13_spill] sm:$0xff] %v5447_v15  ;;  %v693_v24 = vld [vmem:[#allocation7 + $0xa0] sm:$0xff]  ;;  %v695_v30 = vld [vmem:[#allocation7 + $0xb0] sm:$0xff] }
  0x6a   :  { %363 = vmatmul.mubr.f32.gmra.mrb[8].mxu1 %v71_v35  ;;  %3372 = vmatpush1.bf16.msra.mxu0 %v5366_v36  ;;  %v677_v35 = vld [vmem:[#allocation7 + $0x20] sm:$0xff]  ;;  %6665 = vst [vmem:[#allocation12_spill] sm:$0xff] %v5441_v2  ;;  %6667 = vst [vmem:[#allocation14_spill] sm:$0xff] %v5451_v17  ;;  %v698_v31 = vld [vmem:[#allocation7 + $0xc8] sm:$0xff]  ;;  %v5461_v42 = vpack.c.bf16 %v693_v24, %v689_v21  ;;  %v5465_v43 = vpack.c.bf16 %v695_v30, %v691_v25 }
  0x6b   :  { %3404 = vmatpush1.bf16.msra.mxu1 %v5370_v40  ;;  %255 = vmatprep.mubr.f32.mxu0 %v6522_v0  ;;  %v704_v37 = vld [vmem:[#allocation7 + $0xf8] sm:$0xff]  ;;  %v697_v49 = vld [vmem:[#allocation7 + $0xc0] sm:$0xff]  ;;  %v699_v59 = vld [vmem:[#allocation7 + $0xd0] sm:$0xff] }
  0x6c   :  { %368 = vmatprep.mubr.f32.mxu1 %v6522_v0  ;;  %3374 = vmatprep.subr.bf16.mxu0 %v5374_v44  ;;  %6670 = vst [vmem:[#allocation17_spill] sm:$0xff] %v5461_v42  ;;  %6671 = vst [vmem:[#allocation18_spill] sm:$0xff] %v5465_v43  ;;  %v701_v51 = vld [vmem:[#allocation7 + $0xe0] sm:$0xff]  ;;  %v703_v1 = vld [vmem:[#allocation7 + $0xf0] sm:$0xff] }
  0x6d   :  { %256 = vmatmul.mubr.f32.gmra.mrb[10].mxu0 %v72_v52  ;;  %3406 = vmatprep.subr.bf16.mxu1 %v5377_v48  ;;  %v706_v5 = vld [vmem:[#allocation7 + $0x108] sm:$0xff]  ;;  %v5477_v21 = vpack.c.bf16 %v703_v1, %v699_v59  ;;  %v705_v25 = vld [vmem:[#allocation7 + $0x100] sm:$0xff] }
  0x6e   :  { %369 = vmatmul.mubr.f32.gmra.mrb[10].mxu1 %v72_v52  ;;  %3376 = vmatpush1.bf16.msra.mxu0 %v5383_v54  ;;  %v5431_v52 = vpack.c.bf16 %v677_v35, %v673_v34  ;;  %v702_v34 = vld [vmem:[#allocation7 + $0xe8] sm:$0xff]  ;;  %v700_v35 = vld [vmem:[#allocation7 + $0xd8] sm:$0xff]  ;;  %v709_v30 = vld [vmem:[#allocation7 + $0x120] sm:$0xff] }
  0x6f   :  { %3408 = vmatpush1.bf16.msra.mxu1 %v5387_v58  ;;  %261 = vmatprep.mubr.f32.mxu0 %v6522_v0  ;;  %v5467_v45 = vpack.c.bf16 %v702_v34, %v698_v31  ;;  %v5470_v61 = vpack.c.bf16 %v704_v37, %v700_v35  ;;  %6675 = vst [vmem:[#allocation22_spill] sm:$0xff] %v5477_v21  ;;  %v707_v31 = vld [vmem:[#allocation7 + $0x110] sm:$0xff]  ;;  %v714_v37 = vld [vmem:[#allocation7 + $0x148] sm:$0xff] }
  0x70   :  { %374 = vmatprep.mubr.f32.mxu1 %v6522_v0  ;;  %3378 = vmatprep.subr.bf16.mxu0 %v5391_v62  ;;  %v711_v35 = vld [vmem:[#allocation7 + $0x130] sm:$0xff] }
  0x71   :  { %262 = vmatmul.mubr.f32.gmra.mrb[12].mxu0 %v73_v8  ;;  %3410 = vmatprep.subr.bf16.mxu1 %v5394_v4  ;;  %6672 = vst [vmem:[#allocation19_spill] sm:$0xff] %v5467_v45  ;;  %6673 = vst [vmem:[#allocation20_spill] sm:$0xff] %v5470_v61  ;;  %v5489_v59 = vpack.c.bf16 %v711_v35, %v707_v31  ;;  %v721_v35 = vld [vmem:[#allocation7 + $0x180] sm:$0xff] }
  0x72   :  { %375 = vmatmul.mubr.f32.gmra.mrb[12].mxu1 %v73_v8  ;;  %3380 = vmatpush1.bf16.msra.mxu0 %v5400_v9  ;;  %v694_v8 = vld [vmem:[#allocation7 + $0xa8] sm:$0xff] }
  0x73   :  { %3412 = vmatpush1.bf16.msra.mxu1 %v5404_v14  ;;  %267 = vmatprep.mubr.f32.mxu0 %v6522_v0  ;;  %v5453_v20 = vpack.c.bf16 %v694_v8, %v690_v7  ;;  %v710_v7 = vld [vmem:[#allocation7 + $0x128] sm:$0xff]  ;;  %v708_v8 = vld [vmem:[#allocation7 + $0x118] sm:$0xff]  ;;  %6679 = vst [vmem:[#allocation26_spill] sm:$0xff] %v5489_v59 }
  0x74   :  { %380 = vmatprep.mubr.f32.mxu1 %v6522_v0  ;;  %3382 = vmatprep.subr.bf16.mxu0 %v5408_v18  ;;  %v5479_v24 = vpack.c.bf16 %v710_v7, %v706_v5  ;;  %v713_v5 = vld [vmem:[#allocation7 + $0x140] sm:$0xff] }
  0x75   :  { %268 = vmatmul.mubr.f32.gmra.mrb[14].mxu0 %v74_v27  ;;  %3414 = vmatprep.subr.bf16.mxu1 %v5411_v22  ;;  %6668 = vst [vmem:[#allocation15_spill] sm:$0xff] %v5453_v20  ;;  %v717_v7 = vld [vmem:[#allocation7 + $0x160] sm:$0xff] }
  0x76   :  { %381 = vmatmul.mubr.f32.gmra.mrb[14].mxu1 %v74_v27  ;;  %3384 = vmatpush1.bf16.msra.mxu0 %v5417_v28  ;;  %v5456_v27 = vpack.c.bf16 %v696_v12, %v692_v11  ;;  %v712_v11 = vld [vmem:[#allocation7 + $0x138] sm:$0xff]  ;;  %v5473_v12 = vpack.c.bf16 %v701_v51, %v697_v49  ;;  %6676 = vst [vmem:[#allocation23_spill] sm:$0xff] %v5479_v24 }
  0x77   :  { %3416 = vmatpush1.bf16.msra.mxu1 %v5421_v33  ;;  %573 = vmatprep.mubr.f32.mxu0 %v6522_v0  ;;  %v5482_v34 = vpack.c.bf16 %v712_v11, %v708_v8  ;;  %v716_v49 = vld [vmem:[#allocation7 + $0x158] sm:$0xff]  ;;  %v715_v8 = vld [vmem:[#allocation7 + $0x150] sm:$0xff] }
  0x78   :  { %644 = vmatprep.mubr.f32.mxu1 %v6522_v0  ;;  %3418 = vmatprep.subr.bf16.mxu0 %v5425_v39  ;;  %6669 = vst [vmem:[#allocation16_spill] sm:$0xff] %v5456_v27  ;;  %6674 = vst [vmem:[#allocation21_spill] sm:$0xff] %v5473_v12  ;;  %v720_v51 = vld [vmem:[#allocation7 + $0x178] sm:$0xff] }
  0x79   :  { %574 = vmatmul.mubr.f32.vlgmr.msra.gmra.mrb[0].mxu0 %v6522_v0  ;;  %3482 = vmatprep.subr.bf16.mxu1 %v5428_v46  ;;  %6677 = vst [vmem:[#allocation24_spill] sm:$0xff] %v5482_v34  ;;  %v5494_v11 = vpack.c.bf16 %v720_v51, %v716_v49  ;;  %v723_v51 = vld [vmem:[#allocation7 + $0x190] sm:$0xff] }
  0x7a   :  { %645 = vmatmul.mubr.f32.vlgmr.msra.gmra.mrb[0].mxu1 %v6522_v0  ;;  %3420 = vmatpush1.bf16.msra.mxu0 %v5431_v52 }
  0x7b   :  { %3484 = vmatpush1.bf16.msra.mxu1 %v5435_v55  ;;  %3422 = vmatprep.subr.bf16.mxu0 %v5437_v57  ;;  %6681 = vst [vmem:[#allocation28_spill] sm:$0xff] %v5494_v11 }
  0x7c   :  { %3486 = vmatprep.subr.bf16.mxu1 %v5441_v2  ;;  %865 = vmatprep.mubr.f32.mxu0 %v6522_v0 }
  0x7d   :  { %936 = vmatprep.mubr.f32.mxu1 %v6522_v0  ;;  %v718_v0 = vld [vmem:[#allocation7 + $0x168] sm:$0xff] }
  0x7e   :  { %3424 = vmatpush1.bf16.msra.mxu0 %v5447_v15  ;;  %v5491_v1 = vpack.c.bf16 %v718_v0, %v714_v37  ;;  %v725_v37 = vld [vmem:[#allocation7 + $0x1a0] sm:$0xff] }
  0x7f   :  { %3488 = vmatpush1.bf16.msra.mxu1 %v5451_v17  ;;  %3426 = vmatprep.subr.bf16.mxu0 %v5453_v20 }
  0x80   :  { %3490 = vmatprep.subr.bf16.mxu1 %v5456_v27  ;;  %6680 = vst [vmem:[#allocation27_spill] sm:$0xff] %v5491_v1 }
  0x82   :  { %3428 = vmatpush1.bf16.msra.mxu0 %v5461_v42 }
  0x83   :  { %3492 = vmatpush1.bf16.msra.mxu1 %v5465_v43  ;;  %3430 = vmatprep.subr.bf16.mxu0 %v5467_v45  ;;  %v5485_v43 = vpack.c.bf16 %v709_v30, %v705_v25  ;;  %v722_v45 = vld [vmem:[#allocation7 + $0x188] sm:$0xff]  ;;  %v724_v25 = vld [vmem:[#allocation7 + $0x198] sm:$0xff] }
  0x84   :  { %3494 = vmatprep.subr.bf16.mxu1 %v5470_v61  ;;  %v719_v61 = vld [vmem:[#allocation7 + $0x170] sm:$0xff]  ;;  %v728_v30 = vld [vmem:[#allocation7 + $0x1b8] sm:$0xff] }
  0x85   :  { %6678 = vst [vmem:[#allocation25_spill] sm:$0xff] %v5485_v43  ;;  %v5501_v0 = vpack.c.bf16 %v719_v61, %v715_v8  ;;  %v5506_v49 = vpack.c.bf16 %v728_v30, %v724_v25  ;;  %v736_v25 = vld [vmem:[#allocation7 + $0x1f8] sm:$0xff]  ;;  %v729_v30 = vld [vmem:[#allocation7 + $0x1c0] sm:$0xff] }
  0x86   :  { %3432 = vmatpush1.bf16.msra.mxu0 %v5473_v12  ;;  %v726_v12 = vld [vmem:[#allocation7 + $0x1a8] sm:$0xff] }
  0x87   :  { %3496 = vmatpush1.bf16.msra.mxu1 %v5477_v21  ;;  %3434 = vmatprep.subr.bf16.mxu0 %v5479_v24  ;;  %v5497_v21 = vpack.c.bf16 %v717_v7, %v713_v5  ;;  %6683 = vst [vmem:[#allocation30_spill] sm:$0xff] %v5501_v0  ;;  %v5503_v31 = vpack.c.bf16 %v726_v12, %v722_v45  ;;  %6685 = vst [vmem:[#allocation32_spill] sm:$0xff] %v5506_v49  ;;  %v730_v45 = vld [vmem:[#allocation7 + $0x1c8] sm:$0xff]  ;;  %v732_v7 = vld [vmem:[#allocation7 + $0x1d8] sm:$0xff] }
  0x88   :  { %3498 = vmatprep.subr.bf16.mxu1 %v5482_v34  ;;  %v727_v34 = vld [vmem:[#allocation7 + $0x1b0] sm:$0xff]  ;;  %v5509_v5 = vpack.c.bf16 %v725_v37, %v721_v35  ;;  %v734_v12 = vld [vmem:[#allocation7 + $0x1e8] sm:$0xff]  ;;  %v733_v35 = vld [vmem:[#allocation7 + $0x1e0] sm:$0xff]  ;;  %v5520_v37 = vpack.c.bf16 %v736_v25, %v732_v7 }
  0x89   :  { %6682 = vst [vmem:[#allocation29_spill] sm:$0xff] %v5497_v21  ;;  %6684 = vst [vmem:[#allocation31_spill] sm:$0xff] %v5503_v31  ;;  %v5513_v61 = vpack.c.bf16 %v727_v34, %v723_v51  ;;  %v5518_v8 = vpack.c.bf16 %v734_v12, %v730_v45  ;;  %v731_v34 = vld [vmem:[#allocation7 + $0x1d0] sm:$0xff]  ;;  %v742_v45 = vld [vmem:[#allocation7 + $0x228] sm:$0xff] }
  0x8a   :  { %3436 = vmatpush1.bf16.msra.mxu0 %v5485_v43  ;;  %6686 = vst [vmem:[#allocation33_spill] sm:$0xff] %v5509_v5  ;;  %6689 = vst [vmem:[#allocation36_spill] sm:$0xff] %v5520_v37  ;;  %v735_v51 = vld [vmem:[#allocation7 + $0x1f0] sm:$0xff]  ;;  %v740_v12 = vld [vmem:[#allocation7 + $0x218] sm:$0xff] }
  0x8b   :  { %3500 = vmatpush1.bf16.msra.mxu1 %v5489_v59  ;;  %3438 = vmatprep.subr.bf16.mxu0 %v5491_v1  ;;  %6687 = vst [vmem:[#allocation34_spill] sm:$0xff] %v5513_v61  ;;  %6688 = vst [vmem:[#allocation35_spill] sm:$0xff] %v5518_v8  ;;  %v744_v7 = vld [vmem:[#allocation7 + $0x238] sm:$0xff]  ;;  %v737_v25 = vld [vmem:[#allocation7 + $0x200] sm:$0xff] }
  0x8c   :  { %3502 = vmatprep.subr.bf16.mxu1 %v5494_v11 }
  0x8e   :  { %3440 = vmatpush1.bf16.msra.mxu0 %v5497_v21 }
  0x8f   :  { %3504 = vmatpush1.bf16.msra.mxu1 %v5501_v0  ;;  %3442 = vmatprep.subr.bf16.mxu0 %v5503_v31  ;;  %v5522_v0 = vpack.c.bf16 %v733_v35, %v729_v30  ;;  %v741_v30 = vld [vmem:[#allocation7 + $0x220] sm:$0xff]  ;;  %v5532_v35 = vpack.c.bf16 %v744_v7, %v740_v12  ;;  %v752_v12 = vld [vmem:[#allocation7 + $0x278] sm:$0xff] }
  0x90   :  { %3506 = vmatprep.subr.bf16.mxu1 %v5506_v49  ;;  %v5525_v49 = vpack.c.bf16 %v735_v51, %v731_v34  ;;  %v5534_v31 = vpack.c.bf16 %v741_v30, %v737_v25  ;;  %v739_v34 = vld [vmem:[#allocation7 + $0x210] sm:$0xff]  ;;  %v745_v7 = vld [vmem:[#allocation7 + $0x240] sm:$0xff] }
  0x91   :  { %6690 = vst [vmem:[#allocation37_spill] sm:$0xff] %v5522_v0  ;;  %6693 = vst [vmem:[#allocation40_spill] sm:$0xff] %v5532_v35  ;;  %v743_v51 = vld [vmem:[#allocation7 + $0x230] sm:$0xff]  ;;  %v749_v25 = vld [vmem:[#allocation7 + $0x260] sm:$0xff] }
  0x92   :  { %3444 = vmatpush1.bf16.msra.mxu0 %v5509_v5  ;;  %6691 = vst [vmem:[#allocation38_spill] sm:$0xff] %v5525_v49  ;;  %6694 = vst [vmem:[#allocation41_spill] sm:$0xff] %v5534_v31 }
  0x93   :  { %3508 = vmatpush1.bf16.msra.mxu1 %v5513_v61  ;;  %3446 = vmatprep.subr.bf16.mxu0 %v5518_v8  ;;  %v738_v61 = vld [vmem:[#allocation7 + $0x208] sm:$0xff]  ;;  %v5546_v8 = vpack.c.bf16 %v749_v25, %v745_v7  ;;  %v757_v7 = vld [vmem:[#allocation7 + $0x2a0] sm:$0xff] }
  0x94   :  { %3510 = vmatprep.subr.bf16.mxu1 %v5520_v37  ;;  %v5530_v5 = vpack.c.bf16 %v742_v45, %v738_v61  ;;  %v5537_v37 = vpack.c.bf16 %v743_v51, %v739_v34  ;;  %v750_v61 = vld [vmem:[#allocation7 + $0x268] sm:$0xff]  ;;  %v748_v45 = vld [vmem:[#allocation7 + $0x258] sm:$0xff]  ;;  %v747_v34 = vld [vmem:[#allocation7 + $0x250] sm:$0xff] }
  0x95   :  { %v5544_v30 = vpack.c.bf16 %v752_v12, %v748_v45  ;;  %6698 = vst [vmem:[#allocation45_spill] sm:$0xff] %v5546_v8  ;;  %v751_v51 = vld [vmem:[#allocation7 + $0x270] sm:$0xff]  ;;  %v760_v45 = vld [vmem:[#allocation7 + $0x2b8] sm:$0xff]  ;;  %v753_v12 = vld [vmem:[#allocation7 + $0x280] sm:$0xff] }
  0x96   :  { %3448 = vmatpush1.bf16.msra.mxu0 %v5522_v0  ;;  %6692 = vst [vmem:[#allocation39_spill] sm:$0xff] %v5530_v5  ;;  %6695 = vst [vmem:[#allocation42_spill] sm:$0xff] %v5537_v37 }
  0x97   :  { %3512 = vmatpush1.bf16.msra.mxu1 %v5525_v49  ;;  %3450 = vmatprep.subr.bf16.mxu0 %v5530_v5  ;;  %v746_v49 = vld [vmem:[#allocation7 + $0x248] sm:$0xff]  ;;  %6697 = vst [vmem:[#allocation44_spill] sm:$0xff] %v5544_v30  ;;  %v5558_v5 = vpack.c.bf16 %v757_v7, %v753_v12  ;;  %v765_v12 = vld [vmem:[#allocation7 + $0x2e0] sm:$0xff] }
  0x98   :  { %3514 = vmatprep.subr.bf16.mxu1 %v5532_v35  ;;  %v5542_v0 = vpack.c.bf16 %v750_v61, %v746_v49  ;;  %v5549_v35 = vpack.c.bf16 %v751_v51, %v747_v34  ;;  %v758_v49 = vld [vmem:[#allocation7 + $0x2a8] sm:$0xff]  ;;  %v756_v61 = vld [vmem:[#allocation7 + $0x298] sm:$0xff]  ;;  %v755_v34 = vld [vmem:[#allocation7 + $0x290] sm:$0xff] }
  0x99   :  { %v5556_v25 = vpack.c.bf16 %v760_v45, %v756_v61  ;;  %6702 = vst [vmem:[#allocation49_spill] sm:$0xff] %v5558_v5  ;;  %v759_v51 = vld [vmem:[#allocation7 + $0x2b0] sm:$0xff]  ;;  %v768_v61 = vld [vmem:[#allocation7 + $0x2f8] sm:$0xff]  ;;  %v761_v45 = vld [vmem:[#allocation7 + $0x2c0] sm:$0xff] }
  0x9a   :  { %3452 = vmatpush1.bf16.msra.mxu0 %v5534_v31  ;;  %6696 = vst [vmem:[#allocation43_spill] sm:$0xff] %v5542_v0  ;;  %6699 = vst [vmem:[#allocation46_spill] sm:$0xff] %v5549_v35 }
  0x9b   :  { %3516 = vmatpush1.bf16.msra.mxu1 %v5537_v37  ;;  %3454 = vmatprep.subr.bf16.mxu0 %v5542_v0  ;;  %v754_v37 = vld [vmem:[#allocation7 + $0x288] sm:$0xff]  ;;  %6701 = vst [vmem:[#allocation48_spill] sm:$0xff] %v5556_v25  ;;  %v5570_v0 = vpack.c.bf16 %v765_v12, %v761_v45  ;;  %v773_v45 = vld [vmem:[#allocation7 + $0x320] sm:$0xff] }
  0x9c   :  { %3518 = vmatprep.subr.bf16.mxu1 %v5544_v30  ;;  %v5554_v31 = vpack.c.bf16 %v758_v49, %v754_v37  ;;  %v5561_v30 = vpack.c.bf16 %v759_v51, %v755_v34  ;;  %v766_v37 = vld [vmem:[#allocation7 + $0x2e8] sm:$0xff]  ;;  %v764_v49 = vld [vmem:[#allocation7 + $0x2d8] sm:$0xff]  ;;  %v763_v34 = vld [vmem:[#allocation7 + $0x2d0] sm:$0xff] }
  0x9d   :  { %v5568_v7 = vpack.c.bf16 %v768_v61, %v764_v49  ;;  %6706 = vst [vmem:[#allocation53_spill] sm:$0xff] %v5570_v0  ;;  %v767_v51 = vld [vmem:[#allocation7 + $0x2f0] sm:$0xff]  ;;  %v776_v49 = vld [vmem:[#allocation7 + $0x338] sm:$0xff]  ;;  %v769_v61 = vld [vmem:[#allocation7 + $0x300] sm:$0xff] }
  0x9e   :  { %3456 = vmatpush1.bf16.msra.mxu0 %v5546_v8  ;;  %6700 = vst [vmem:[#allocation47_spill] sm:$0xff] %v5554_v31  ;;  %6703 = vst [vmem:[#allocation50_spill] sm:$0xff] %v5561_v30 }
  0x9f   :  { %3520 = vmatpush1.bf16.msra.mxu1 %v5549_v35  ;;  %3458 = vmatprep.subr.bf16.mxu0 %v5554_v31  ;;  %v762_v35 = vld [vmem:[#allocation7 + $0x2c8] sm:$0xff]  ;;  %6705 = vst [vmem:[#allocation52_spill] sm:$0xff] %v5568_v7  ;;  %v5582_v31 = vpack.c.bf16 %v773_v45, %v769_v61  ;;  %v781_v61 = vld [vmem:[#allocation7 + $0x360] sm:$0xff] }
  0xa0   :  { %3522 = vmatprep.subr.bf16.mxu1 %v5556_v25  ;;  %v5566_v8 = vpack.c.bf16 %v766_v37, %v762_v35  ;;  %v5573_v25 = vpack.c.bf16 %v767_v51, %v763_v34  ;;  %v774_v35 = vld [vmem:[#allocation7 + $0x328] sm:$0xff]  ;;  %v772_v37 = vld [vmem:[#allocation7 + $0x318] sm:$0xff]  ;;  %v771_v34 = vld [vmem:[#allocation7 + $0x310] sm:$0xff] }
  0xa1   :  { %v5580_v12 = vpack.c.bf16 %v776_v49, %v772_v37  ;;  %6710 = vst [vmem:[#allocation57_spill] sm:$0xff] %v5582_v31  ;;  %v775_v51 = vld [vmem:[#allocation7 + $0x330] sm:$0xff]  ;;  %v784_v37 = vld [vmem:[#allocation7 + $0x378] sm:$0xff]  ;;  %v777_v49 = vld [vmem:[#allocation7 + $0x340] sm:$0xff] }
  0xa2   :  { %3460 = vmatpush1.bf16.msra.mxu0 %v5558_v5  ;;  %6704 = vst [vmem:[#allocation51_spill] sm:$0xff] %v5566_v8  ;;  %6707 = vst [vmem:[#allocation54_spill] sm:$0xff] %v5573_v25 }
  0xa3   :  { %3524 = vmatpush1.bf16.msra.mxu1 %v5561_v30  ;;  %3462 = vmatprep.subr.bf16.mxu0 %v5566_v8  ;;  %v770_v30 = vld [vmem:[#allocation7 + $0x308] sm:$0xff]  ;;  %6709 = vst [vmem:[#allocation56_spill] sm:$0xff] %v5580_v12  ;;  %v5594_v8 = vpack.c.bf16 %v781_v61, %v777_v49  ;;  %v789_v49 = vld [vmem:[#allocation7 + $0x3a0] sm:$0xff] }
  0xa4   :  { %3526 = vmatprep.subr.bf16.mxu1 %v5568_v7  ;;  %v5578_v5 = vpack.c.bf16 %v774_v35, %v770_v30  ;;  %v5585_v7 = vpack.c.bf16 %v775_v51, %v771_v34  ;;  %v782_v30 = vld [vmem:[#allocation7 + $0x368] sm:$0xff]  ;;  %v780_v35 = vld [vmem:[#allocation7 + $0x358] sm:$0xff]  ;;  %v779_v34 = vld [vmem:[#allocation7 + $0x350] sm:$0xff] }
  0xa5   :  { %v5592_v45 = vpack.c.bf16 %v784_v37, %v780_v35  ;;  %6714 = vst [vmem:[#allocation61_spill] sm:$0xff] %v5594_v8  ;;  %v783_v51 = vld [vmem:[#allocation7 + $0x370] sm:$0xff]  ;;  %v792_v35 = vld [vmem:[#allocation7 + $0x3b8] sm:$0xff]  ;;  %v785_v37 = vld [vmem:[#allocation7 + $0x380] sm:$0xff] }
  0xa6   :  { %3464 = vmatpush1.bf16.msra.mxu0 %v5570_v0  ;;  %6708 = vst [vmem:[#allocation55_spill] sm:$0xff] %v5578_v5  ;;  %6711 = vst [vmem:[#allocation58_spill] sm:$0xff] %v5585_v7 }
  0xa7   :  { %3528 = vmatpush1.bf16.msra.mxu1 %v5573_v25  ;;  %3466 = vmatprep.subr.bf16.mxu0 %v5578_v5  ;;  %v778_v25 = vld [vmem:[#allocation7 + $0x348] sm:$0xff]  ;;  %6713 = vst [vmem:[#allocation60_spill] sm:$0xff] %v5592_v45  ;;  %v5606_v5 = vpack.c.bf16 %v789_v49, %v785_v37  ;;  %v797_v37 = vld [vmem:[#allocation7 + $0x3e0] sm:$0xff] }
  0xa8   :  { %3530 = vmatprep.subr.bf16.mxu1 %v5580_v12  ;;  %v5590_v0 = vpack.c.bf16 %v782_v30, %v778_v25  ;;  %v5597_v12 = vpack.c.bf16 %v783_v51, %v779_v34  ;;  %v790_v25 = vld [vmem:[#allocation7 + $0x3a8] sm:$0xff]  ;;  %v788_v30 = vld [vmem:[#allocation7 + $0x398] sm:$0xff]  ;;  %v787_v34 = vld [vmem:[#allocation7 + $0x390] sm:$0xff] }
  0xa9   :  { %v5604_v61 = vpack.c.bf16 %v792_v35, %v788_v30  ;;  %6718 = vst [vmem:[#allocation65_spill] sm:$0xff] %v5606_v5  ;;  %v791_v51 = vld [vmem:[#allocation7 + $0x3b0] sm:$0xff]  ;;  %v800_v30 = vld [vmem:[#allocation7 + $0x3f8] sm:$0xff]  ;;  %v793_v35 = vld [vmem:[#allocation7 + $0x3c0] sm:$0xff] }
  0xaa   :  { %3468 = vmatpush1.bf16.msra.mxu0 %v5582_v31  ;;  %6712 = vst [vmem:[#allocation59_spill] sm:$0xff] %v5590_v0  ;;  %6715 = vst [vmem:[#allocation62_spill] sm:$0xff] %v5597_v12 }
  0xab   :  { %3532 = vmatpush1.bf16.msra.mxu1 %v5585_v7  ;;  %3470 = vmatprep.subr.bf16.mxu0 %v5590_v0  ;;  %v786_v7 = vld [vmem:[#allocation7 + $0x388] sm:$0xff]  ;;  %6717 = vst [vmem:[#allocation64_spill] sm:$0xff] %v5604_v61  ;;  %v5618_v0 = vpack.c.bf16 %v797_v37, %v793_v35 }
  0xac   :  { %3534 = vmatprep.subr.bf16.mxu1 %v5592_v45  ;;  %v5602_v31 = vpack.c.bf16 %v790_v25, %v786_v7  ;;  %v5609_v45 = vpack.c.bf16 %v791_v51, %v787_v34  ;;  %v798_v7 = vld [vmem:[#allocation7 + $0x3e8] sm:$0xff]  ;;  %v796_v25 = vld [vmem:[#allocation7 + $0x3d8] sm:$0xff]  ;;  %v795_v34 = vld [vmem:[#allocation7 + $0x3d0] sm:$0xff] }
  0xad   :  { %v5616_v49 = vpack.c.bf16 %v800_v30, %v796_v25  ;;  %6722 = vst [vmem:[#allocation69_spill] sm:$0xff] %v5618_v0  ;;  %v799_v51 = vld [vmem:[#allocation7 + $0x3f0] sm:$0xff]  ;;  %v139_v30 = vld [vmem:[%s6516_s3] sm:$0xf] }
  0xae   :  { %3472 = vmatpush1.bf16.msra.mxu0 %v5594_v8  ;;  %6716 = vst [vmem:[#allocation63_spill] sm:$0xff] %v5602_v31  ;;  %6719 = vst [vmem:[#allocation66_spill] sm:$0xff] %v5609_v45 }
  0xaf   :  { %3536 = vmatpush1.bf16.msra.mxu1 %v5597_v12  ;;  %3474 = vmatprep.subr.bf16.mxu0 %v5602_v31  ;;  %v794_v12 = vld [vmem:[#allocation7 + $0x3c8] sm:$0xff]  ;;  %6721 = vst [vmem:[#allocation68_spill] sm:$0xff] %v5616_v49 }
  0xb0   :  { %3538 = vmatprep.subr.bf16.mxu1 %v5604_v61  ;;  %v5614_v8 = vpack.c.bf16 %v798_v7, %v794_v12  ;;  %v5621_v61 = vpack.c.bf16 %v799_v51, %v795_v34  ;;  %v141_v12 = vlaneseq }
  0xb2   :  { %3476 = vmatpush1.bf16.msra.mxu0 %v5606_v5  ;;  %6720 = vst [vmem:[#allocation67_spill] sm:$0xff] %v5614_v8  ;;  %6723 = vst [vmem:[#allocation70_spill] sm:$0xff] %v5621_v61  ;;  %v5628_v7 = vshrl.u32 %v141_v12, 7 }
  0xb3   :  { %3540 = vmatpush1.bf16.msra.mxu1 %v5609_v45  ;;  %3478 = vmatprep.subr.bf16.mxu0 %v5614_v8 }
  0xb4   :  { %3542 = vmatprep.subr.bf16.mxu1 %v5616_v49  ;;  %v6614_v25 = vsub.s32 0, %v5628_v7  ;;  %v6621_v35 = vsub.s32 1, %v5628_v7  ;;  %v6624_v34 = vsub.s32 2, %v5628_v7  ;;  %v6635_v49 = vsub.s32 3, %v5628_v7 }
  0xb6   :  { %3480 = vmatpush1.bf16.msra.mxu0 %v5618_v0  ;;  %v5637_v37 = vrot.slane %v139_v30, %v6614_v25  ;;  %v5642_v51 = vrot.slane %v139_v30, %v6621_v35  ;;  %v5654_v31 = vrot.slane %v139_v30, %v6635_v49 }
  0xb7   :  { %3544 = vmatpush1.bf16.msra.mxu1 %v5621_v61  ;;  %3546 = vmatprep.subr.bf16.mxu0 %v5294_v38  ;;  %v5647_v38 = vrot.slane %v139_v30, %v6624_v34 }
  0xb8   :  { %3578 = vmatprep.subr.bf16.mxu1 %v5296_v41  ;;  %6724 = vst [vmem:[#allocation71_spill] sm:$0xff] %v5637_v37  ;;  %6725 = vst [vmem:[#allocation72_spill] sm:$0xff] %v5642_v51 }
 0x14c   :  { %v575_v12 = vpop.f32.mrb[0].mxu0 }
 0x14d   :  { %v4889_v41 = vadd.f32 %v575_v12, %v5637_v37  ;;  %v646_v61 = vpop.f32.mrb[0].mxu1  ;;  %v577_v0 = vpop.f32.mrb[1].mxu0 }
 0x14e   :  { %v4890_v25 = vadd.f32 %v577_v0, %v5642_v51  ;;  %v648_v8 = vpop.f32.mrb[1].mxu1  ;;  %v4905_v35 = vadd.f32 %v646_v61, %v5647_v38 }
 0x14f   :  { %v655_v45 = vmul.f32 0.5, %v4889_v41  ;;  %v4906_v12 = vadd.f32 %v648_v8, %v5654_v31 }
 0x150   :  { %v659_v5 = vmul.f32 0.5, %v4890_v25 }
 0x151   :  { %4959 = vtanh.f32 %v655_v45  ;;  %v664_v34 = vmul.f32 0.5, %v4906_v12  ;;  %v6733_v12 = vld [vmem:[#allocation27_spill] sm:$0xff] }
 0x152   :  { %4961 = vtanh.f32 %v659_v5 }
 0x153   :  { %4963 = vtanh.f32 %v4905_v35 }
 0x154   :  { %4965 = vtanh.f32 %v664_v34  ;;  %v6731_v34 = vld [vmem:[#allocation22_spill] sm:$0xff] }
 0x15b   :  { %v4960_v37 = vpop.eup %4959 }
 0x15c   :  { %v4962_v21 = vpop.eup %4961  ;;  %v657_v11 = vadd.f32 1.0, %v4960_v37  ;;  %v6730_v37 = vld [vmem:[#allocation21_spill] sm:$0xff] }
 0x15d   :  { %v661_v1 = vadd.f32 1.0, %v4962_v21  ;;  %v4964_v41 = vpop.eup %4963  ;;  %v6726_v21 = vmov 0.0  }
 0x15e   :  { %v658_v0 = vmul.f32 0.5, %v657_v11  ;;  %v4966_v30 = vpop.eup %4965  ;;  %v6728_v11 = vld [vmem:[#allocation19_spill] sm:$0xff] }
 0x15f   :  { %v662_v25 = vmul.f32 0.5, %v661_v1  ;;  %v666_v5 = vadd.f32 1.0, %v4966_v30  ;;  %v6727_v1 = vld [vmem:[#allocation18_spill] sm:$0xff]  ;;  %v6738_v30 = vld [vmem:[#allocation32_spill] sm:$0xff] }
 0x160   :  { %v669_v45 = vmul.f32 %v4964_v41, %v658_v0  ;;  %v6734_v0 = vld [vmem:[#allocation28_spill] sm:$0xff]  ;;  %v6735_v41 = vld [vmem:[#allocation29_spill] sm:$0xff] }
 0x161   :  { %v668_v51 = vmul.f32 0.0, %v662_v25  ;;  %v667_v35 = vmul.f32 0.5, %v666_v5  ;;  %v6736_v25 = vld [vmem:[#allocation30_spill] sm:$0xff]  ;;  %v6739_v5 = vld [vmem:[#allocation33_spill] sm:$0xff] }
 0x163   :  { %v5657_v61 = vadd.f32 %v669_v45, %v668_v51  ;;  %v6732_v51 = vld [vmem:[#allocation24_spill] sm:$0xff]  ;;  %v6737_v45 = vld [vmem:[#allocation31_spill] sm:$0xff] }
 0x165   :  { %4967 = vtanh.f32 %v5657_v61 }
 0x16f   :  { %v4968_v49 = vpop.eup %4967 }
 0x170   :  { %v672_v8 = vmul.f32 %v4968_v49, %v667_v35  ;;  %v6729_v49 = vld [vmem:[#allocation20_spill] sm:$0xff]  ;;  %v6740_v35 = vld [vmem:[#allocation34_spill] sm:$0xff] }
 0x172   :  { %866 = vmatmul.mubr.f32.vlgmr.msra.gmra.mrb[16].mxu0 %v672_v8  ;;  %937 = vmatmul.mubr.f32.vlgmr.msra.gmra.mrb[16].mxu1 %v672_v8 }
 0x173   :  { %3548 = vmatpush1.bf16.msra.mxu0 %v5301_v47  ;;  %3580 = vmatpush1.bf16.msra.mxu1 %v5304_v50 }
 0x174   :  { %3550 = vmatprep.subr.bf16.mxu0 %v5307_v53  ;;  %3582 = vmatprep.subr.bf16.mxu1 %v5309_v56 }
 0x175   :  { %1030 = vmatprep.mubr.f32.mxu0 %v6726_v21  ;;  %1101 = vmatprep.mubr.f32.mxu1 %v6726_v21 }
 0x177   :  { %3552 = vmatpush1.bf16.msra.mxu0 %v5315_v60  ;;  %3584 = vmatpush1.bf16.msra.mxu1 %v5319_v63 }
 0x178   :  { %3554 = vmatprep.subr.bf16.mxu0 %v5323_v3  ;;  %3586 = vmatprep.subr.bf16.mxu1 %v5326_v6 }
 0x17b   :  { %3556 = vmatpush1.bf16.msra.mxu0 %v5332_v10  ;;  %3588 = vmatpush1.bf16.msra.mxu1 %v5336_v13 }
 0x17c   :  { %3558 = vmatprep.subr.bf16.mxu0 %v5340_v16  ;;  %3590 = vmatprep.subr.bf16.mxu1 %v5343_v19 }
 0x17f   :  { %3560 = vmatpush1.bf16.msra.mxu0 %v5349_v23  ;;  %3592 = vmatpush1.bf16.msra.mxu1 %v5353_v26 }
 0x180   :  { %3562 = vmatprep.subr.bf16.mxu0 %v5357_v29  ;;  %3594 = vmatprep.subr.bf16.mxu1 %v5360_v32 }
 0x183   :  { %3564 = vmatpush1.bf16.msra.mxu0 %v5366_v36  ;;  %3596 = vmatpush1.bf16.msra.mxu1 %v5370_v40 }
 0x184   :  { %3566 = vmatprep.subr.bf16.mxu0 %v5374_v44  ;;  %3598 = vmatprep.subr.bf16.mxu1 %v5377_v48 }
 0x187   :  { %3568 = vmatpush1.bf16.msra.mxu0 %v5383_v54  ;;  %3600 = vmatpush1.bf16.msra.mxu1 %v5387_v58 }
 0x188   :  { %3570 = vmatprep.subr.bf16.mxu0 %v5391_v62  ;;  %3602 = vmatprep.subr.bf16.mxu1 %v5394_v4 }
 0x18b   :  { %3572 = vmatpush1.bf16.msra.mxu0 %v5400_v9  ;;  %3604 = vmatpush1.bf16.msra.mxu1 %v5404_v14 }
 0x18c   :  { %3574 = vmatprep.subr.bf16.mxu0 %v5408_v18  ;;  %3606 = vmatprep.subr.bf16.mxu1 %v5411_v22 }
 0x18f   :  { %3576 = vmatpush1.bf16.msra.mxu0 %v5417_v28  ;;  %3608 = vmatpush1.bf16.msra.mxu1 %v5421_v33 }
 0x190   :  { %3610 = vmatprep.subr.bf16.mxu0 %v5425_v39  ;;  %3674 = vmatprep.subr.bf16.mxu1 %v5428_v46 }
 0x192   :  { %1031 = vmatmul.mubr.f32.vlgmr.msra.gmra.mrb[2].mxu0 %v672_v8  ;;  %1102 = vmatmul.mubr.f32.vlgmr.msra.gmra.mrb[2].mxu1 %v672_v8  ;;  %v6741_v8 = vld [vmem:[#allocation35_spill] sm:$0xff] }
 0x193   :  { %3612 = vmatpush1.bf16.msra.mxu0 %v5431_v52  ;;  %3676 = vmatpush1.bf16.msra.mxu1 %v5435_v55 }
 0x194   :  { %3614 = vmatprep.subr.bf16.mxu0 %v5437_v57  ;;  %3678 = vmatprep.subr.bf16.mxu1 %v5441_v2 }
 0x197   :  { %3616 = vmatpush1.bf16.msra.mxu0 %v5447_v15  ;;  %3680 = vmatpush1.bf16.msra.mxu1 %v5451_v17 }
 0x198   :  { %3618 = vmatprep.subr.bf16.mxu0 %v5453_v20  ;;  %3682 = vmatprep.subr.bf16.mxu1 %v5456_v27 }
 0x19b   :  { %3620 = vmatpush1.bf16.msra.mxu0 %v5461_v42  ;;  %3684 = vmatpush1.bf16.msra.mxu1 %v6727_v1 }
 0x19c   :  { %3622 = vmatprep.subr.bf16.mxu0 %v6728_v11  ;;  %3686 = vmatprep.subr.bf16.mxu1 %v6729_v49 }
 0x19f   :  { %3624 = vmatpush1.bf16.msra.mxu0 %v6730_v37  ;;  %3688 = vmatpush1.bf16.msra.mxu1 %v6731_v34 }
 0x1a0   :  { %3626 = vmatprep.subr.bf16.mxu0 %v5479_v24  ;;  %3690 = vmatprep.subr.bf16.mxu1 %v6732_v51 }
 0x1a3   :  { %3628 = vmatpush1.bf16.msra.mxu0 %v5485_v43  ;;  %3692 = vmatpush1.bf16.msra.mxu1 %v5489_v59  ;;  %v6742_v43 = vld [vmem:[#allocation36_spill] sm:$0xff]  ;;  %v6743_v59 = vld [vmem:[#allocation37_spill] sm:$0xff] }
 0x1a4   :  { %3630 = vmatprep.subr.bf16.mxu0 %v6733_v12  ;;  %3694 = vmatprep.subr.bf16.mxu1 %v6734_v0  ;;  %v6744_v12 = vld [vmem:[#allocation38_spill] sm:$0xff]  ;;  %v6745_v0 = vld [vmem:[#allocation39_spill] sm:$0xff] }
 0x1a7   :  { %3632 = vmatpush1.bf16.msra.mxu0 %v6735_v41  ;;  %3696 = vmatpush1.bf16.msra.mxu1 %v6736_v25  ;;  %v6746_v41 = vld [vmem:[#allocation40_spill] sm:$0xff]  ;;  %v6747_v25 = vld [vmem:[#allocation41_spill] sm:$0xff] }
 0x1a8   :  { %3634 = vmatprep.subr.bf16.mxu0 %v6737_v45  ;;  %3698 = vmatprep.subr.bf16.mxu1 %v6738_v30  ;;  %v6748_v45 = vld [vmem:[#allocation42_spill] sm:$0xff]  ;;  %v6749_v30 = vld [vmem:[#allocation43_spill] sm:$0xff] }
 0x1ab   :  { %3636 = vmatpush1.bf16.msra.mxu0 %v6739_v5  ;;  %3700 = vmatpush1.bf16.msra.mxu1 %v6740_v35  ;;  %v6750_v5 = vld [vmem:[#allocation44_spill] sm:$0xff]  ;;  %v6751_v35 = vld [vmem:[#allocation45_spill] sm:$0xff] }
 0x1ac   :  { %3638 = vmatprep.subr.bf16.mxu0 %v6741_v8  ;;  %3702 = vmatprep.subr.bf16.mxu1 %v6742_v43  ;;  %v6752_v8 = vld [vmem:[#allocation46_spill] sm:$0xff]  ;;  %v6753_v43 = vld [vmem:[#allocation47_spill] sm:$0xff] }
 0x1af   :  { %3640 = vmatpush1.bf16.msra.mxu0 %v6743_v59  ;;  %3704 = vmatpush1.bf16.msra.mxu1 %v6744_v12  ;;  %v6754_v59 = vld [vmem:[#allocation48_spill] sm:$0xff]  ;;  %v6755_v12 = vld [vmem:[#allocation49_spill] sm:$0xff] }
 0x1b0   :  { %3642 = vmatprep.subr.bf16.mxu0 %v6745_v0  ;;  %3706 = vmatprep.subr.bf16.mxu1 %v6746_v41  ;;  %v6756_v0 = vld [vmem:[#allocation50_spill] sm:$0xff]  ;;  %v6757_v41 = vld [vmem:[#allocation51_spill] sm:$0xff] }
 0x1b3   :  { %3644 = vmatpush1.bf16.msra.mxu0 %v6747_v25  ;;  %3708 = vmatpush1.bf16.msra.mxu1 %v6748_v45  ;;  %v6758_v25 = vld [vmem:[#allocation52_spill] sm:$0xff]  ;;  %v6759_v45 = vld [vmem:[#allocation53_spill] sm:$0xff] }
 0x1b4   :  { %3646 = vmatprep.subr.bf16.mxu0 %v6749_v30  ;;  %3710 = vmatprep.subr.bf16.mxu1 %v6750_v5  ;;  %v6760_v30 = vld [vmem:[#allocation54_spill] sm:$0xff]  ;;  %v6761_v5 = vld [vmem:[#allocation55_spill] sm:$0xff] }
 0x1b7   :  { %3648 = vmatpush1.bf16.msra.mxu0 %v6751_v35  ;;  %3712 = vmatpush1.bf16.msra.mxu1 %v6752_v8  ;;  %v6762_v35 = vld [vmem:[#allocation56_spill] sm:$0xff]  ;;  %v6763_v8 = vld [vmem:[#allocation57_spill] sm:$0xff] }
 0x1b8   :  { %3650 = vmatprep.subr.bf16.mxu0 %v6753_v43  ;;  %3714 = vmatprep.subr.bf16.mxu1 %v6754_v59  ;;  %v6764_v43 = vld [vmem:[#allocation58_spill] sm:$0xff]  ;;  %v6765_v59 = vld [vmem:[#allocation59_spill] sm:$0xff] }
 0x1bb   :  { %3652 = vmatpush1.bf16.msra.mxu0 %v6755_v12  ;;  %3716 = vmatpush1.bf16.msra.mxu1 %v6756_v0  ;;  %v6766_v12 = vld [vmem:[#allocation60_spill] sm:$0xff]  ;;  %v6767_v0 = vld [vmem:[#allocation61_spill] sm:$0xff] }
 0x1bc   :  { %3654 = vmatprep.subr.bf16.mxu0 %v6757_v41  ;;  %3718 = vmatprep.subr.bf16.mxu1 %v6758_v25  ;;  %v6768_v41 = vld [vmem:[#allocation62_spill] sm:$0xff]  ;;  %v6769_v25 = vld [vmem:[#allocation63_spill] sm:$0xff] }
 0x1bf   :  { %3656 = vmatpush1.bf16.msra.mxu0 %v6759_v45  ;;  %3720 = vmatpush1.bf16.msra.mxu1 %v6760_v30  ;;  %v6770_v45 = vld [vmem:[#allocation64_spill] sm:$0xff]  ;;  %v6771_v30 = vld [vmem:[#allocation65_spill] sm:$0xff] }
 0x1c0   :  { %3658 = vmatprep.subr.bf16.mxu0 %v6761_v5  ;;  %3722 = vmatprep.subr.bf16.mxu1 %v6762_v35  ;;  %v6772_v5 = vld [vmem:[#allocation66_spill] sm:$0xff]  ;;  %v6773_v35 = vld [vmem:[#allocation67_spill] sm:$0xff] }
 0x1c3   :  { %3660 = vmatpush1.bf16.msra.mxu0 %v6763_v8  ;;  %3724 = vmatpush1.bf16.msra.mxu1 %v6764_v43  ;;  %v6774_v8 = vld [vmem:[#allocation68_spill] sm:$0xff]  ;;  %v6775_v43 = vld [vmem:[#allocation69_spill] sm:$0xff] }
 0x1c4   :  { %3662 = vmatprep.subr.bf16.mxu0 %v6765_v59  ;;  %3726 = vmatprep.subr.bf16.mxu1 %v6766_v12  ;;  %v6776_v59 = vld [vmem:[#allocation70_spill] sm:$0xff] }
 0x1c5   :  { %v6777_v12 = vld [vmem:[#allocation10_spill] sm:$0xff] }
 0x1c7   :  { %3664 = vmatpush1.bf16.msra.mxu0 %v6767_v0  ;;  %3728 = vmatpush1.bf16.msra.mxu1 %v6768_v41  ;;  %v6778_v0 = vld [vmem:[#allocation11_spill] sm:$0xff] }
 0x1c8   :  { %3666 = vmatprep.subr.bf16.mxu0 %v6769_v25  ;;  %3730 = vmatprep.subr.bf16.mxu1 %v6770_v45  ;;  %v419_v45 = vld [vmem:[%s6518_s5] sm:$0xf] }
 0x1cb   :  { %3668 = vmatpush1.bf16.msra.mxu0 %v6771_v30  ;;  %3732 = vmatpush1.bf16.msra.mxu1 %v6772_v5  ;;  %v6779_v30 = vsub.s32 0, %v5628_v7 }
 0x1cc   :  { %3670 = vmatprep.subr.bf16.mxu0 %v6773_v35  ;;  %3734 = vmatprep.subr.bf16.mxu1 %v6774_v8  ;;  %v6781_v35 = vsub.s32 1, %v5628_v7 }
 0x1cd   :  { %v5763_v25 = vrot.slane %v419_v45, %v6779_v30 }
 0x1ce   :  { %v5767_v5 = vrot.slane %v419_v45, %v6781_v35  ;;  %v6785_v35 = vsub.s32 3, %v5628_v7 }
 0x1cf   :  { %3672 = vmatpush1.bf16.msra.mxu0 %v6775_v43  ;;  %3736 = vmatpush1.bf16.msra.mxu1 %v6776_v59  ;;  %6780 = vst [vmem:[#allocation73_spill] sm:$0xff] %v5763_v25 }
 0x1d0   :  { %3738 = vmatprep.subr.bf16.mxu0 %v6777_v12  ;;  %3770 = vmatprep.subr.bf16.mxu1 %v6778_v0  ;;  %6782 = vst [vmem:[#allocation74_spill] sm:$0xff] %v5767_v5  ;;  %v6783_v12 = vsub.s32 2, %v5628_v7  ;;  %v5778_v49 = vrot.slane %v419_v45, %v6785_v35 }
 0x1d2   :  { %v5772_v41 = vrot.slane %v419_v45, %v6783_v12  ;;  %6786 = vst [vmem:[#allocation76_spill] sm:$0xff] %v5778_v49 }
 0x1d4   :  { %6784 = vst [vmem:[#allocation75_spill] sm:$0xff] %v5772_v41 }
 0x245   :  { %v867_v8 = vpop.f32.mrb[16].mxu0  ;;  %v938_v43 = vpop.f32.mrb[16].mxu1 }
 0x246   :  { %v868_v59 = vadd.f32 %v867_v8, %v5763_v25  ;;  %v869_v0 = vpop.f32.mrb[17].mxu0  ;;  %v940_v51 = vpop.f32.mrb[17].mxu1  ;;  %v939_v30 = vadd.f32 %v938_v43, %v5772_v41 }
 0x247   :  { %v870_v24 = vadd.f32 %v869_v0, %v5767_v5  ;;  %v941_v8 = vadd.f32 %v940_v51, %v5778_v49  ;;  %v6787_v51 = vld [vmem:[#allocation71_spill] sm:$0xff] }
 0x248   :  { %v943_v34 = vmul.f32 0.5, %v868_v59 }
 0x249   :  { %v947_v37 = vmul.f32 0.5, %v870_v24  ;;  %v952_v25 = vmul.f32 0.5, %v941_v8 }
 0x24a   :  { %4969 = vtanh.f32 %v943_v34 }
 0x24b   :  { %4971 = vtanh.f32 %v947_v37 }
 0x24c   :  { %4973 = vtanh.f32 %v939_v30 }
 0x24d   :  { %4975 = vtanh.f32 %v952_v25 }
 0x254   :  { %v4970_v12 = vpop.eup %4969 }
 0x255   :  { %v4972_v11 = vpop.eup %4971  ;;  %v945_v1 = vadd.f32 1.0, %v4970_v12 }
 0x256   :  { %v949_v42 = vadd.f32 1.0, %v4972_v11  ;;  %v4974_v59 = vpop.eup %4973  ;;  %v6788_v11 = vld [vmem:[#allocation72_spill] sm:$0xff] }
 0x257   :  { %v946_v0 = vmul.f32 0.5, %v945_v1  ;;  %v4976_v7 = vpop.eup %4975 }
 0x258   :  { %v950_v24 = vmul.f32 0.5, %v949_v42  ;;  %v954_v37 = vadd.f32 1.0, %v4976_v7 }
 0x259   :  { %v957_v34 = vmul.f32 %v4974_v59, %v946_v0 }
 0x25a   :  { %v956_v5 = vmul.f32 0.0, %v950_v24  ;;  %v955_v12 = vmul.f32 0.5, %v954_v37 }
 0x25c   :  { %v5781_v43 = vadd.f32 %v957_v34, %v956_v5 }
 0x25e   :  { %4977 = vtanh.f32 %v5781_v43 }
 0x265   :  { %v1032_v45 = vpop.f32.mrb[2].mxu0  ;;  %v1103_v30 = vpop.f32.mrb[2].mxu1 }
 0x266   :  { %v4891_v35 = vadd.f32 %v1032_v45, %v6787_v51  ;;  %v1034_v8 = vpop.f32.mrb[3].mxu0  ;;  %v1105_v49 = vpop.f32.mrb[3].mxu1  ;;  %v4907_v5 = vadd.f32 %v1103_v30, %v5647_v38 }
 0x267   :  { %v4892_v25 = vadd.f32 %v1034_v8, %v6788_v11  ;;  %v4908_v59 = vadd.f32 %v1105_v49, %v5654_v31 }
 0x268   :  { %v4978_v1 = vpop.eup %4977  ;;  %v1112_v41 = vmul.f32 0.5, %v4891_v35 }
 0x269   :  { %v1116_v42 = vmul.f32 0.5, %v4892_v25  ;;  %v5786_v0 = vmul.f32 %v4978_v1, %v955_v12  ;;  %v1121_v24 = vmul.f32 0.5, %v4908_v59 }
 0x26a   :  { %4979 = vtanh.f32 %v1112_v41 }
 0x26b   :  { %6789 = vst [vmem:[#allocation71_spill] sm:$0xff] %v5786_v0  ;;  %4981 = vtanh.f32 %v1116_v42  ;;  %1194 = vmatprep.mubr.f32.mxu0 %v5786_v0  ;;  %1265 = vmatprep.mubr.f32.mxu1 %v5786_v0  ;;  %v6806_v0 = vld [vmem:[#allocation33_spill] sm:$0xff] }
 0x26c   :  { %4983 = vtanh.f32 %v4907_v5 }
 0x26d   :  { %4985 = vtanh.f32 %v1121_v24  ;;  %v6791_v24 = vld [vmem:[#allocation18_spill] sm:$0xff] }
 0x274   :  { %v4980_v34 = vpop.eup %4979 }
 0x275   :  { %v4982_v7 = vpop.eup %4981  ;;  %v1114_v37 = vadd.f32 1.0, %v4980_v34  ;;  %v6792_v34 = vld [vmem:[#allocation19_spill] sm:$0xff] }
 0x276   :  { %v1118_v45 = vadd.f32 1.0, %v4982_v7  ;;  %v4984_v8 = vpop.eup %4983  ;;  %v6793_v7 = vld [vmem:[#allocation20_spill] sm:$0xff] }
 0x277   :  { %v1115_v35 = vmul.f32 0.5, %v1114_v37  ;;  %v4986_v1 = vpop.eup %4985  ;;  %v6794_v37 = vld [vmem:[#allocation21_spill] sm:$0xff] }
 0x278   :  { %v1119_v12 = vmul.f32 0.5, %v1118_v45  ;;  %v1123_v42 = vadd.f32 1.0, %v4986_v1  ;;  %v6795_v45 = vld [vmem:[#allocation22_spill] sm:$0xff]  ;;  %v6801_v1 = vld [vmem:[#allocation28_spill] sm:$0xff] }
 0x279   :  { %v1126_v41 = vmul.f32 %v4984_v8, %v1115_v35  ;;  %v6796_v35 = vld [vmem:[#allocation23_spill] sm:$0xff]  ;;  %v6797_v8 = vld [vmem:[#allocation24_spill] sm:$0xff] }
 0x27a   :  { %v1125_v30 = vmul.f32 %v1119_v12, %v5657_v61  ;;  %v1124_v5 = vmul.f32 0.5, %v1123_v42  ;;  %v6790_v61 = vld [vmem:[#allocation17_spill] sm:$0xff] }
 0x27b   :  { %v6798_v12 = vld [vmem:[#allocation25_spill] sm:$0xff] }
 0x27c   :  { %v5793_v25 = vadd.f32 %v1126_v41, %v1125_v30  ;;  %v6799_v41 = vld [vmem:[#allocation26_spill] sm:$0xff]  ;;  %v6800_v30 = vld [vmem:[#allocation27_spill] sm:$0xff]  ;;  %v6802_v42 = vld [vmem:[#allocation29_spill] sm:$0xff] }
 0x27e   :  { %4987 = vtanh.f32 %v5793_v25 }
 0x288   :  { %v4988_v49 = vpop.eup %4987 }
 0x289   :  { %v1129_v59 = vmul.f32 %v4988_v49, %v1124_v5  ;;  %v6803_v5 = vld [vmem:[#allocation30_spill] sm:$0xff]  ;;  %v6804_v49 = vld [vmem:[#allocation31_spill] sm:$0xff] }
 0x28b   :  { %1195 = vmatmul.mubr.f32.vlgmr.msra.gmra.mrb[18].mxu0 %v1129_v59  ;;  %1266 = vmatmul.mubr.f32.vlgmr.msra.gmra.mrb[18].mxu1 %v1129_v59 }
 0x28c   :  { %3740 = vmatpush1.bf16.msra.mxu0 %v5301_v47  ;;  %3772 = vmatpush1.bf16.msra.mxu1 %v5304_v50 }
 0x28d   :  { %3742 = vmatprep.subr.bf16.mxu0 %v5307_v53  ;;  %3774 = vmatprep.subr.bf16.mxu1 %v5309_v56 }
 0x28e   :  { %1359 = vmatprep.mubr.f32.mxu0 %v6726_v21  ;;  %1430 = vmatprep.mubr.f32.mxu1 %v6726_v21 }
 0x290   :  { %3744 = vmatpush1.bf16.msra.mxu0 %v5315_v60  ;;  %3776 = vmatpush1.bf16.msra.mxu1 %v5319_v63 }
 0x291   :  { %3746 = vmatprep.subr.bf16.mxu0 %v5323_v3  ;;  %3778 = vmatprep.subr.bf16.mxu1 %v5326_v6 }
 0x294   :  { %3748 = vmatpush1.bf16.msra.mxu0 %v5332_v10  ;;  %3780 = vmatpush1.bf16.msra.mxu1 %v5336_v13 }
 0x295   :  { %3750 = vmatprep.subr.bf16.mxu0 %v5340_v16  ;;  %3782 = vmatprep.subr.bf16.mxu1 %v5343_v19 }
 0x298   :  { %3752 = vmatpush1.bf16.msra.mxu0 %v5349_v23  ;;  %3784 = vmatpush1.bf16.msra.mxu1 %v5353_v26 }
 0x299   :  { %3754 = vmatprep.subr.bf16.mxu0 %v5357_v29  ;;  %3786 = vmatprep.subr.bf16.mxu1 %v5360_v32 }
 0x29c   :  { %3756 = vmatpush1.bf16.msra.mxu0 %v5366_v36  ;;  %3788 = vmatpush1.bf16.msra.mxu1 %v5370_v40 }
 0x29d   :  { %3758 = vmatprep.subr.bf16.mxu0 %v5374_v44  ;;  %3790 = vmatprep.subr.bf16.mxu1 %v5377_v48 }
 0x2a0   :  { %3760 = vmatpush1.bf16.msra.mxu0 %v5383_v54  ;;  %3792 = vmatpush1.bf16.msra.mxu1 %v5387_v58 }
 0x2a1   :  { %3762 = vmatprep.subr.bf16.mxu0 %v5391_v62  ;;  %3794 = vmatprep.subr.bf16.mxu1 %v5394_v4 }
 0x2a4   :  { %3764 = vmatpush1.bf16.msra.mxu0 %v5400_v9  ;;  %3796 = vmatpush1.bf16.msra.mxu1 %v5404_v14 }
 0x2a5   :  { %3766 = vmatprep.subr.bf16.mxu0 %v5408_v18  ;;  %3798 = vmatprep.subr.bf16.mxu1 %v5411_v22 }
 0x2a8   :  { %3768 = vmatpush1.bf16.msra.mxu0 %v5417_v28  ;;  %3800 = vmatpush1.bf16.msra.mxu1 %v5421_v33 }
 0x2a9   :  { %3802 = vmatprep.subr.bf16.mxu0 %v5425_v39  ;;  %3866 = vmatprep.subr.bf16.mxu1 %v5428_v46 }
 0x2ab   :  { %1360 = vmatmul.mubr.f32.vlgmr.msra.gmra.mrb[4].mxu0 %v1129_v59  ;;  %1431 = vmatmul.mubr.f32.vlgmr.msra.gmra.mrb[4].mxu1 %v1129_v59  ;;  %v6805_v59 = vld [vmem:[#allocation32_spill] sm:$0xff] }
 0x2ac   :  { %3804 = vmatpush1.bf16.msra.mxu0 %v5431_v52  ;;  %3868 = vmatpush1.bf16.msra.mxu1 %v5435_v55 }
 0x2ad   :  { %3806 = vmatprep.subr.bf16.mxu0 %v5437_v57  ;;  %3870 = vmatprep.subr.bf16.mxu1 %v5441_v2 }
 0x2b0   :  { %3808 = vmatpush1.bf16.msra.mxu0 %v5447_v15  ;;  %3872 = vmatpush1.bf16.msra.mxu1 %v5451_v17 }
 0x2b1   :  { %3810 = vmatprep.subr.bf16.mxu0 %v5453_v20  ;;  %3874 = vmatprep.subr.bf16.mxu1 %v5456_v27 }
 0x2b4   :  { %3812 = vmatpush1.bf16.msra.mxu0 %v6790_v61  ;;  %3876 = vmatpush1.bf16.msra.mxu1 %v6791_v24 }
 0x2b5   :  { %3814 = vmatprep.subr.bf16.mxu0 %v6792_v34  ;;  %3878 = vmatprep.subr.bf16.mxu1 %v6793_v7  ;;  %v6847_v7 = vld [vmem:[#allocation74_spill] sm:$0xff] }
 0x2b8   :  { %3816 = vmatpush1.bf16.msra.mxu0 %v6794_v37  ;;  %3880 = vmatpush1.bf16.msra.mxu1 %v6795_v45  ;;  %v6846_v45 = vld [vmem:[#allocation73_spill] sm:$0xff] }
 0x2b9   :  { %3818 = vmatprep.subr.bf16.mxu0 %v6796_v35  ;;  %3882 = vmatprep.subr.bf16.mxu1 %v6797_v8  ;;  %v6807_v35 = vld [vmem:[#allocation34_spill] sm:$0xff]  ;;  %v6808_v8 = vld [vmem:[#allocation35_spill] sm:$0xff] }
 0x2bc   :  { %3820 = vmatpush1.bf16.msra.mxu0 %v6798_v12  ;;  %3884 = vmatpush1.bf16.msra.mxu1 %v6799_v41  ;;  %v6809_v12 = vld [vmem:[#allocation36_spill] sm:$0xff]  ;;  %v6810_v41 = vld [vmem:[#allocation37_spill] sm:$0xff] }
 0x2bd   :  { %3822 = vmatprep.subr.bf16.mxu0 %v6800_v30  ;;  %3886 = vmatprep.subr.bf16.mxu1 %v6801_v1  ;;  %v6811_v30 = vld [vmem:[#allocation38_spill] sm:$0xff]  ;;  %v6812_v1 = vld [vmem:[#allocation39_spill] sm:$0xff] }
 0x2c0   :  { %3824 = vmatpush1.bf16.msra.mxu0 %v6802_v42  ;;  %3888 = vmatpush1.bf16.msra.mxu1 %v6803_v5  ;;  %v6813_v42 = vld [vmem:[#allocation40_spill] sm:$0xff]  ;;  %v6814_v5 = vld [vmem:[#allocation41_spill] sm:$0xff] }
 0x2c1   :  { %3826 = vmatprep.subr.bf16.mxu0 %v6804_v49  ;;  %3890 = vmatprep.subr.bf16.mxu1 %v6805_v59  ;;  %v6815_v49 = vld [vmem:[#allocation42_spill] sm:$0xff]  ;;  %v6816_v59 = vld [vmem:[#allocation43_spill] sm:$0xff] }
 0x2c4   :  { %3828 = vmatpush1.bf16.msra.mxu0 %v6806_v0  ;;  %3892 = vmatpush1.bf16.msra.mxu1 %v6807_v35  ;;  %v6817_v0 = vld [vmem:[#allocation44_spill] sm:$0xff]  ;;  %v6818_v35 = vld [vmem:[#allocation45_spill] sm:$0xff] }
 0x2c5   :  { %3830 = vmatprep.subr.bf16.mxu0 %v6808_v8  ;;  %3894 = vmatprep.subr.bf16.mxu1 %v6809_v12  ;;  %v6819_v8 = vld [vmem:[#allocation46_spill] sm:$0xff]  ;;  %v6820_v12 = vld [vmem:[#allocation47_spill] sm:$0xff] }
 0x2c8   :  { %3832 = vmatpush1.bf16.msra.mxu0 %v6810_v41  ;;  %3896 = vmatpush1.bf16.msra.mxu1 %v6811_v30  ;;  %v6821_v41 = vld [vmem:[#allocation48_spill] sm:$0xff]  ;;  %v6822_v30 = vld [vmem:[#allocation49_spill] sm:$0xff] }
 0x2c9   :  { %3834 = vmatprep.subr.bf16.mxu0 %v6812_v1  ;;  %3898 = vmatprep.subr.bf16.mxu1 %v6813_v42  ;;  %v6823_v1 = vld [vmem:[#allocation50_spill] sm:$0xff]  ;;  %v6824_v42 = vld [vmem:[#allocation51_spill] sm:$0xff] }
 0x2cc   :  { %3836 = vmatpush1.bf16.msra.mxu0 %v6814_v5  ;;  %3900 = vmatpush1.bf16.msra.mxu1 %v6815_v49  ;;  %v6825_v5 = vld [vmem:[#allocation52_spill] sm:$0xff]  ;;  %v6826_v49 = vld [vmem:[#allocation53_spill] sm:$0xff] }
 0x2cd   :  { %3838 = vmatprep.subr.bf16.mxu0 %v6816_v59  ;;  %3902 = vmatprep.subr.bf16.mxu1 %v6817_v0  ;;  %v6827_v59 = vld [vmem:[#allocation54_spill] sm:$0xff]  ;;  %v6828_v0 = vld [vmem:[#allocation55_spill] sm:$0xff] }
 0x2d0   :  { %3840 = vmatpush1.bf16.msra.mxu0 %v6818_v35  ;;  %3904 = vmatpush1.bf16.msra.mxu1 %v6819_v8  ;;  %v6829_v35 = vld [vmem:[#allocation56_spill] sm:$0xff]  ;;  %v6830_v8 = vld [vmem:[#allocation57_spill] sm:$0xff] }
 0x2d1   :  { %3842 = vmatprep.subr.bf16.mxu0 %v6820_v12  ;;  %3906 = vmatprep.subr.bf16.mxu1 %v6821_v41  ;;  %v6831_v12 = vld [vmem:[#allocation58_spill] sm:$0xff]  ;;  %v6832_v41 = vld [vmem:[#allocation59_spill] sm:$0xff] }
 0x2d4   :  { %3844 = vmatpush1.bf16.msra.mxu0 %v6822_v30  ;;  %3908 = vmatpush1.bf16.msra.mxu1 %v6823_v1  ;;  %v6833_v30 = vld [vmem:[#allocation60_spill] sm:$0xff]  ;;  %v6834_v1 = vld [vmem:[#allocation61_spill] sm:$0xff] }
 0x2d5   :  { %3846 = vmatprep.subr.bf16.mxu0 %v6824_v42  ;;  %3910 = vmatprep.subr.bf16.mxu1 %v6825_v5  ;;  %v6835_v42 = vld [vmem:[#allocation62_spill] sm:$0xff]  ;;  %v6836_v5 = vld [vmem:[#allocation63_spill] sm:$0xff] }
 0x2d8   :  { %3848 = vmatpush1.bf16.msra.mxu0 %v6826_v49  ;;  %3912 = vmatpush1.bf16.msra.mxu1 %v6827_v59  ;;  %v6837_v49 = vld [vmem:[#allocation64_spill] sm:$0xff]  ;;  %v6838_v59 = vld [vmem:[#allocation65_spill] sm:$0xff] }
 0x2d9   :  { %3850 = vmatprep.subr.bf16.mxu0 %v6828_v0  ;;  %3914 = vmatprep.subr.bf16.mxu1 %v6829_v35  ;;  %v6839_v0 = vld [vmem:[#allocation66_spill] sm:$0xff]  ;;  %v6840_v35 = vld [vmem:[#allocation67_spill] sm:$0xff] }
 0x2dc   :  { %3852 = vmatpush1.bf16.msra.mxu0 %v6830_v8  ;;  %3916 = vmatpush1.bf16.msra.mxu1 %v6831_v12  ;;  %v6841_v8 = vld [vmem:[#allocation68_spill] sm:$0xff]  ;;  %v6842_v12 = vld [vmem:[#allocation69_spill] sm:$0xff] }
 0x2dd   :  { %3854 = vmatprep.subr.bf16.mxu0 %v6832_v41  ;;  %3918 = vmatprep.subr.bf16.mxu1 %v6833_v30  ;;  %v6843_v41 = vld [vmem:[#allocation70_spill] sm:$0xff] }
 0x2de   :  { %v6844_v30 = vld [vmem:[#allocation10_spill] sm:$0xff] }
 0x2e0   :  { %3856 = vmatpush1.bf16.msra.mxu0 %v6834_v1  ;;  %3920 = vmatpush1.bf16.msra.mxu1 %v6835_v42  ;;  %v6845_v1 = vld [vmem:[#allocation11_spill] sm:$0xff] }
 0x2e1   :  { %3858 = vmatprep.subr.bf16.mxu0 %v6836_v5  ;;  %3922 = vmatprep.subr.bf16.mxu1 %v6837_v49 }
 0x2e4   :  { %3860 = vmatpush1.bf16.msra.mxu0 %v6838_v59  ;;  %3924 = vmatpush1.bf16.msra.mxu1 %v6839_v0 }
 0x2e5   :  { %3862 = vmatprep.subr.bf16.mxu0 %v6840_v35  ;;  %3926 = vmatprep.subr.bf16.mxu1 %v6841_v8  ;;  %v6848_v8 = vld [vmem:[#allocation75_spill] sm:$0xff] }
 0x2e8   :  { %3864 = vmatpush1.bf16.msra.mxu0 %v6842_v12  ;;  %3928 = vmatpush1.bf16.msra.mxu1 %v6843_v41  ;;  %v6849_v41 = vld [vmem:[#allocation76_spill] sm:$0xff] }
 0x2e9   :  { %3930 = vmatprep.subr.bf16.mxu0 %v6844_v30  ;;  %3962 = vmatprep.subr.bf16.mxu1 %v6845_v1 }
 0x35e   :  { %v1196_v42 = vpop.f32.mrb[18].mxu0  ;;  %v1267_v5 = vpop.f32.mrb[18].mxu1 }
 0x35f   :  { %v1197_v49 = vadd.f32 %v1196_v42, %v6846_v45  ;;  %v1198_v37 = vpop.f32.mrb[19].mxu0  ;;  %v1269_v59 = vpop.f32.mrb[19].mxu1  ;;  %v1268_v24 = vadd.f32 %v1267_v5, %v6848_v8 }
 0x360   :  { %v1199_v0 = vadd.f32 %v1198_v37, %v6847_v7  ;;  %v1270_v12 = vadd.f32 %v1269_v59, %v6849_v41 }
 0x361   :  { %v1272_v34 = vmul.f32 0.5, %v1197_v49 }
 0x362   :  { %v1276_v35 = vmul.f32 0.5, %v1199_v0  ;;  %v1281_v30 = vmul.f32 0.5, %v1270_v12 }
 0x363   :  { %4989 = vtanh.f32 %v1272_v34 }
 0x364   :  { %4991 = vtanh.f32 %v1276_v35 }
 0x365   :  { %4993 = vtanh.f32 %v1268_v24 }
 0x366   :  { %4995 = vtanh.f32 %v1281_v30 }
 0x36d   :  { %v4990_v61 = vpop.eup %4989 }
 0x36e   :  { %v4992_v1 = vpop.eup %4991  ;;  %v1274_v27 = vadd.f32 1.0, %v4990_v61 }
 0x36f   :  { %v1278_v20 = vadd.f32 1.0, %v4992_v1  ;;  %v4994_v45 = vpop.eup %4993 }
 0x370   :  { %v1275_v42 = vmul.f32 0.5, %v1274_v27  ;;  %v4996_v34 = vpop.eup %4995 }
 0x371   :  { %v1279_v17 = vmul.f32 0.5, %v1278_v20  ;;  %v1283_v24 = vadd.f32 1.0, %v4996_v34 }
 0x372   :  { %v1286_v15 = vmul.f32 %v4994_v45, %v1275_v42 }
 0x373   :  { %v1285_v37 = vmul.f32 %v1279_v17, %v5781_v43  ;;  %v1284_v1 = vmul.f32 0.5, %v1283_v24 }
 0x375   :  { %v5899_v0 = vadd.f32 %v1286_v15, %v1285_v37 }
 0x377   :  { %4997 = vtanh.f32 %v5899_v0 }
 0x37e   :  { %v1361_v35 = vpop.f32.mrb[4].mxu0  ;;  %v1432_v5 = vpop.f32.mrb[4].mxu1 }
 0x37f   :  { %v4893_v12 = vadd.f32 %v1361_v35, %v6787_v51  ;;  %v1363_v49 = vpop.f32.mrb[5].mxu0  ;;  %v1434_v61 = vpop.f32.mrb[5].mxu1  ;;  %v4909_v15 = vadd.f32 %v1432_v5, %v5647_v38 }
 0x380   :  { %v4894_v27 = vadd.f32 %v1363_v49, %v6788_v11  ;;  %v4910_v17 = vadd.f32 %v1434_v61, %v5654_v31 }
 0x381   :  { %v4998_v30 = vpop.eup %4997  ;;  %v1441_v20 = vmul.f32 0.5, %v4893_v12 }
 0x382   :  { %v1445_v45 = vmul.f32 0.5, %v4894_v27  ;;  %v5904_v59 = vmul.f32 %v4998_v30, %v1284_v1  ;;  %v1450_v43 = vmul.f32 0.5, %v4910_v17  ;;  %v6851_v17 = vld [vmem:[#allocation14_spill] sm:$0xff] }
 0x383   :  { %4999 = vtanh.f32 %v1441_v20 }
 0x384   :  { %5001 = vtanh.f32 %v1445_v45  ;;  %1523 = vmatprep.mubr.f32.mxu0 %v5904_v59  ;;  %1594 = vmatprep.mubr.f32.mxu1 %v5904_v59 }
 0x385   :  { %5003 = vtanh.f32 %v4909_v15 }
 0x386   :  { %5005 = vtanh.f32 %v1450_v43  ;;  %v6852_v43 = vld [vmem:[#allocation15_spill] sm:$0xff] }
 0x38d   :  { %v5000_v42 = vpop.eup %4999 }
 0x38e   :  { %v5002_v37 = vpop.eup %5001  ;;  %v1443_v34 = vadd.f32 1.0, %v5000_v42  ;;  %v6853_v42 = vld [vmem:[#allocation16_spill] sm:$0xff] }
 0x38f   :  { %v1447_v24 = vadd.f32 1.0, %v5002_v37  ;;  %v5004_v12 = vpop.eup %5003  ;;  %v6854_v37 = vld [vmem:[#allocation17_spill] sm:$0xff] }
 0x390   :  { %v1444_v35 = vmul.f32 0.5, %v1443_v34  ;;  %v5006_v30 = vpop.eup %5005  ;;  %v6855_v34 = vld [vmem:[#allocation18_spill] sm:$0xff] }
 0x391   :  { %v1448_v49 = vmul.f32 0.5, %v1447_v24  ;;  %v1452_v20 = vadd.f32 1.0, %v5006_v30  ;;  %v6856_v24 = vld [vmem:[#allocation19_spill] sm:$0xff]  ;;  %v6862_v30 = vld [vmem:[#allocation25_spill] sm:$0xff] }
 0x392   :  { %v1455_v1 = vmul.f32 %v5004_v12, %v1444_v35  ;;  %v6857_v35 = vld [vmem:[#allocation20_spill] sm:$0xff]  ;;  %v6858_v12 = vld [vmem:[#allocation21_spill] sm:$0xff] }
 0x393   :  { %v1454_v5 = vmul.f32 %v1448_v49, %v5793_v25  ;;  %v1453_v45 = vmul.f32 0.5, %v1452_v20  ;;  %v6850_v25 = vld [vmem:[#allocation13_spill] sm:$0xff]  ;;  %v6859_v49 = vld [vmem:[#allocation22_spill] sm:$0xff] }
 0x394   :  { %v6863_v20 = vld [vmem:[#allocation26_spill] sm:$0xff] }
 0x395   :  { %v5911_v27 = vadd.f32 %v1455_v1, %v1454_v5  ;;  %v6860_v1 = vld [vmem:[#allocation23_spill] sm:$0xff]  ;;  %v6861_v5 = vld [vmem:[#allocation24_spill] sm:$0xff] }
 0x397   :  { %5007 = vtanh.f32 %v5911_v27 }
 0x3a1   :  { %v5008_v61 = vpop.eup %5007 }
 0x3a2   :  { %v1458_v15 = vmul.f32 %v5008_v61, %v1453_v45  ;;  %v6864_v45 = vld [vmem:[#allocation27_spill] sm:$0xff]  ;;  %v6865_v61 = vld [vmem:[#allocation28_spill] sm:$0xff] }
 0x3a4   :  { %1524 = vmatmul.mubr.f32.vlgmr.msra.gmra.mrb[20].mxu0 %v1458_v15  ;;  %1595 = vmatmul.mubr.f32.vlgmr.msra.gmra.mrb[20].mxu1 %v1458_v15 }
 0x3a5   :  { %3932 = vmatpush1.bf16.msra.mxu0 %v5301_v47  ;;  %3964 = vmatpush1.bf16.msra.mxu1 %v5304_v50 }
 0x3a6   :  { %3934 = vmatprep.subr.bf16.mxu0 %v5307_v53  ;;  %3966 = vmatprep.subr.bf16.mxu1 %v5309_v56 }
 0x3a7   :  { %1688 = vmatprep.mubr.f32.mxu0 %v6726_v21  ;;  %1759 = vmatprep.mubr.f32.mxu1 %v6726_v21 }
 0x3a9   :  { %3936 = vmatpush1.bf16.msra.mxu0 %v5315_v60  ;;  %3968 = vmatpush1.bf16.msra.mxu1 %v5319_v63 }
 0x3aa   :  { %3938 = vmatprep.subr.bf16.mxu0 %v5323_v3  ;;  %3970 = vmatprep.subr.bf16.mxu1 %v5326_v6 }
 0x3ad   :  { %3940 = vmatpush1.bf16.msra.mxu0 %v5332_v10  ;;  %3972 = vmatpush1.bf16.msra.mxu1 %v5336_v13 }
 0x3ae   :  { %3942 = vmatprep.subr.bf16.mxu0 %v5340_v16  ;;  %3974 = vmatprep.subr.bf16.mxu1 %v5343_v19 }
 0x3b1   :  { %3944 = vmatpush1.bf16.msra.mxu0 %v5349_v23  ;;  %3976 = vmatpush1.bf16.msra.mxu1 %v5353_v26 }
 0x3b2   :  { %3946 = vmatprep.subr.bf16.mxu0 %v5357_v29  ;;  %3978 = vmatprep.subr.bf16.mxu1 %v5360_v32 }
 0x3b5   :  { %3948 = vmatpush1.bf16.msra.mxu0 %v5366_v36  ;;  %3980 = vmatpush1.bf16.msra.mxu1 %v5370_v40 }
 0x3b6   :  { %3950 = vmatprep.subr.bf16.mxu0 %v5374_v44  ;;  %3982 = vmatprep.subr.bf16.mxu1 %v5377_v48 }
 0x3b9   :  { %3952 = vmatpush1.bf16.msra.mxu0 %v5383_v54  ;;  %3984 = vmatpush1.bf16.msra.mxu1 %v5387_v58 }
 0x3ba   :  { %3954 = vmatprep.subr.bf16.mxu0 %v5391_v62  ;;  %3986 = vmatprep.subr.bf16.mxu1 %v5394_v4 }
 0x3bd   :  { %3956 = vmatpush1.bf16.msra.mxu0 %v5400_v9  ;;  %3988 = vmatpush1.bf16.msra.mxu1 %v5404_v14 }
 0x3be   :  { %3958 = vmatprep.subr.bf16.mxu0 %v5408_v18  ;;  %3990 = vmatprep.subr.bf16.mxu1 %v5411_v22 }
 0x3c1   :  { %3960 = vmatpush1.bf16.msra.mxu0 %v5417_v28  ;;  %3992 = vmatpush1.bf16.msra.mxu1 %v5421_v33 }
 0x3c2   :  { %3994 = vmatprep.subr.bf16.mxu0 %v5425_v39  ;;  %4058 = vmatprep.subr.bf16.mxu1 %v5428_v46 }
 0x3c4   :  { %1689 = vmatmul.mubr.f32.vlgmr.msra.gmra.mrb[6].mxu0 %v1458_v15  ;;  %1760 = vmatmul.mubr.f32.vlgmr.msra.gmra.mrb[6].mxu1 %v1458_v15  ;;  %v6866_v15 = vld [vmem:[#allocation29_spill] sm:$0xff] }
 0x3c5   :  { %3996 = vmatpush1.bf16.msra.mxu0 %v5431_v52  ;;  %4060 = vmatpush1.bf16.msra.mxu1 %v5435_v55 }
 0x3c6   :  { %3998 = vmatprep.subr.bf16.mxu0 %v5437_v57  ;;  %4062 = vmatprep.subr.bf16.mxu1 %v5441_v2 }
 0x3c9   :  { %4000 = vmatpush1.bf16.msra.mxu0 %v6850_v25  ;;  %4064 = vmatpush1.bf16.msra.mxu1 %v6851_v17 }
 0x3ca   :  { %4002 = vmatprep.subr.bf16.mxu0 %v6852_v43  ;;  %4066 = vmatprep.subr.bf16.mxu1 %v6853_v42 }
 0x3cd   :  { %4004 = vmatpush1.bf16.msra.mxu0 %v6854_v37  ;;  %4068 = vmatpush1.bf16.msra.mxu1 %v6855_v34  ;;  %v6910_v34 = vld [vmem:[#allocation73_spill] sm:$0xff] }
 0x3ce   :  { %4006 = vmatprep.subr.bf16.mxu0 %v6856_v24  ;;  %4070 = vmatprep.subr.bf16.mxu1 %v6857_v35  ;;  %v6867_v24 = vld [vmem:[#allocation30_spill] sm:$0xff]  ;;  %v6868_v35 = vld [vmem:[#allocation31_spill] sm:$0xff] }
 0x3d1   :  { %4008 = vmatpush1.bf16.msra.mxu0 %v6858_v12  ;;  %4072 = vmatpush1.bf16.msra.mxu1 %v6859_v49  ;;  %v6869_v12 = vld [vmem:[#allocation32_spill] sm:$0xff]  ;;  %v6870_v49 = vld [vmem:[#allocation33_spill] sm:$0xff] }
 0x3d2   :  { %4010 = vmatprep.subr.bf16.mxu0 %v6860_v1  ;;  %4074 = vmatprep.subr.bf16.mxu1 %v6861_v5  ;;  %v6871_v1 = vld [vmem:[#allocation34_spill] sm:$0xff]  ;;  %v6872_v5 = vld [vmem:[#allocation35_spill] sm:$0xff] }
 0x3d5   :  { %4012 = vmatpush1.bf16.msra.mxu0 %v6862_v30  ;;  %4076 = vmatpush1.bf16.msra.mxu1 %v6863_v20  ;;  %v6873_v30 = vld [vmem:[#allocation36_spill] sm:$0xff]  ;;  %v6874_v20 = vld [vmem:[#allocation37_spill] sm:$0xff] }
 0x3d6   :  { %4014 = vmatprep.subr.bf16.mxu0 %v6864_v45  ;;  %4078 = vmatprep.subr.bf16.mxu1 %v6865_v61  ;;  %v6875_v45 = vld [vmem:[#allocation38_spill] sm:$0xff]  ;;  %v6876_v61 = vld [vmem:[#allocation39_spill] sm:$0xff] }
 0x3d9   :  { %4016 = vmatpush1.bf16.msra.mxu0 %v6866_v15  ;;  %4080 = vmatpush1.bf16.msra.mxu1 %v6867_v24  ;;  %v6877_v15 = vld [vmem:[#allocation40_spill] sm:$0xff]  ;;  %v6878_v24 = vld [vmem:[#allocation41_spill] sm:$0xff] }
 0x3da   :  { %4018 = vmatprep.subr.bf16.mxu0 %v6868_v35  ;;  %4082 = vmatprep.subr.bf16.mxu1 %v6869_v12  ;;  %v6879_v35 = vld [vmem:[#allocation42_spill] sm:$0xff]  ;;  %v6880_v12 = vld [vmem:[#allocation43_spill] sm:$0xff] }
 0x3dd   :  { %4020 = vmatpush1.bf16.msra.mxu0 %v6870_v49  ;;  %4084 = vmatpush1.bf16.msra.mxu1 %v6871_v1  ;;  %v6881_v49 = vld [vmem:[#allocation44_spill] sm:$0xff]  ;;  %v6882_v1 = vld [vmem:[#allocation45_spill] sm:$0xff] }
 0x3de   :  { %4022 = vmatprep.subr.bf16.mxu0 %v6872_v5  ;;  %4086 = vmatprep.subr.bf16.mxu1 %v6873_v30  ;;  %v6883_v5 = vld [vmem:[#allocation46_spill] sm:$0xff]  ;;  %v6884_v30 = vld [vmem:[#allocation47_spill] sm:$0xff] }
 0x3e1   :  { %4024 = vmatpush1.bf16.msra.mxu0 %v6874_v20  ;;  %4088 = vmatpush1.bf16.msra.mxu1 %v6875_v45  ;;  %v6885_v20 = vld [vmem:[#allocation48_spill] sm:$0xff]  ;;  %v6886_v45 = vld [vmem:[#allocation49_spill] sm:$0xff] }
 0x3e2   :  { %4026 = vmatprep.subr.bf16.mxu0 %v6876_v61  ;;  %4090 = vmatprep.subr.bf16.mxu1 %v6877_v15  ;;  %v6887_v61 = vld [vmem:[#allocation50_spill] sm:$0xff]  ;;  %v6888_v15 = vld [vmem:[#allocation51_spill] sm:$0xff] }
 0x3e5   :  { %4028 = vmatpush1.bf16.msra.mxu0 %v6878_v24  ;;  %4092 = vmatpush1.bf16.msra.mxu1 %v6879_v35  ;;  %v6889_v24 = vld [vmem:[#allocation52_spill] sm:$0xff]  ;;  %v6890_v35 = vld [vmem:[#allocation53_spill] sm:$0xff] }
 0x3e6   :  { %4030 = vmatprep.subr.bf16.mxu0 %v6880_v12  ;;  %4094 = vmatprep.subr.bf16.mxu1 %v6881_v49  ;;  %v6891_v12 = vld [vmem:[#allocation54_spill] sm:$0xff]  ;;  %v6892_v49 = vld [vmem:[#allocation55_spill] sm:$0xff] }
 0x3e9   :  { %4032 = vmatpush1.bf16.msra.mxu0 %v6882_v1  ;;  %4096 = vmatpush1.bf16.msra.mxu1 %v6883_v5  ;;  %v6893_v1 = vld [vmem:[#allocation56_spill] sm:$0xff]  ;;  %v6894_v5 = vld [vmem:[#allocation57_spill] sm:$0xff] }
 0x3ea   :  { %4034 = vmatprep.subr.bf16.mxu0 %v6884_v30  ;;  %4098 = vmatprep.subr.bf16.mxu1 %v6885_v20  ;;  %v6895_v30 = vld [vmem:[#allocation58_spill] sm:$0xff]  ;;  %v6896_v20 = vld [vmem:[#allocation59_spill] sm:$0xff] }
 0x3ed   :  { %4036 = vmatpush1.bf16.msra.mxu0 %v6886_v45  ;;  %4100 = vmatpush1.bf16.msra.mxu1 %v6887_v61  ;;  %v6897_v45 = vld [vmem:[#allocation60_spill] sm:$0xff]  ;;  %v6898_v61 = vld [vmem:[#allocation61_spill] sm:$0xff] }
 0x3ee   :  { %4038 = vmatprep.subr.bf16.mxu0 %v6888_v15  ;;  %4102 = vmatprep.subr.bf16.mxu1 %v6889_v24  ;;  %v6899_v15 = vld [vmem:[#allocation62_spill] sm:$0xff]  ;;  %v6900_v24 = vld [vmem:[#allocation63_spill] sm:$0xff] }
 0x3f1   :  { %4040 = vmatpush1.bf16.msra.mxu0 %v6890_v35  ;;  %4104 = vmatpush1.bf16.msra.mxu1 %v6891_v12  ;;  %v6901_v35 = vld [vmem:[#allocation64_spill] sm:$0xff]  ;;  %v6902_v12 = vld [vmem:[#allocation65_spill] sm:$0xff] }
 0x3f2   :  { %4042 = vmatprep.subr.bf16.mxu0 %v6892_v49  ;;  %4106 = vmatprep.subr.bf16.mxu1 %v6893_v1  ;;  %v6903_v49 = vld [vmem:[#allocation66_spill] sm:$0xff]  ;;  %v6904_v1 = vld [vmem:[#allocation67_spill] sm:$0xff] }
 0x3f5   :  { %4044 = vmatpush1.bf16.msra.mxu0 %v6894_v5  ;;  %4108 = vmatpush1.bf16.msra.mxu1 %v6895_v30  ;;  %v6905_v5 = vld [vmem:[#allocation68_spill] sm:$0xff]  ;;  %v6906_v30 = vld [vmem:[#allocation69_spill] sm:$0xff] }
 0x3f6   :  { %4046 = vmatprep.subr.bf16.mxu0 %v6896_v20  ;;  %4110 = vmatprep.subr.bf16.mxu1 %v6897_v45  ;;  %v6907_v20 = vld [vmem:[#allocation70_spill] sm:$0xff] }
 0x3f7   :  { %v6908_v45 = vld [vmem:[#allocation10_spill] sm:$0xff] }
 0x3f9   :  { %4048 = vmatpush1.bf16.msra.mxu0 %v6898_v61  ;;  %4112 = vmatpush1.bf16.msra.mxu1 %v6899_v15  ;;  %v6909_v61 = vld [vmem:[#allocation11_spill] sm:$0xff] }
 0x3fa   :  { %4050 = vmatprep.subr.bf16.mxu0 %v6900_v24  ;;  %4114 = vmatprep.subr.bf16.mxu1 %v6901_v35 }
 0x3fd   :  { %4052 = vmatpush1.bf16.msra.mxu0 %v6902_v12  ;;  %4116 = vmatpush1.bf16.msra.mxu1 %v6903_v49 }
 0x3fe   :  { %4054 = vmatprep.subr.bf16.mxu0 %v6904_v1  ;;  %4118 = vmatprep.subr.bf16.mxu1 %v6905_v5 }
 0x401   :  { %4056 = vmatpush1.bf16.msra.mxu0 %v6906_v30  ;;  %4120 = vmatpush1.bf16.msra.mxu1 %v6907_v20 }
 0x402   :  { %4122 = vmatprep.subr.bf16.mxu0 %v6908_v45  ;;  %4154 = vmatprep.subr.bf16.mxu1 %v6909_v61 }
 0x477   :  { %v1525_v15 = vpop.f32.mrb[20].mxu0  ;;  %v1596_v24 = vpop.f32.mrb[20].mxu1 }
 0x478   :  { %v1526_v35 = vadd.f32 %v1525_v15, %v6910_v34  ;;  %v1527_v37 = vpop.f32.mrb[21].mxu0  ;;  %v1598_v12 = vpop.f32.mrb[21].mxu1  ;;  %v1597_v5 = vadd.f32 %v1596_v24, %v6848_v8 }
 0x479   :  { %v1528_v49 = vadd.f32 %v1527_v37, %v6847_v7  ;;  %v1599_v20 = vadd.f32 %v1598_v12, %v6849_v41 }
 0x47a   :  { %v1601_v42 = vmul.f32 0.5, %v1526_v35 }
 0x47b   :  { %v1605_v1 = vmul.f32 0.5, %v1528_v49  ;;  %v1610_v45 = vmul.f32 0.5, %v1599_v20 }
 0x47c   :  { %5009 = vtanh.f32 %v1601_v42 }
 0x47d   :  { %5011 = vtanh.f32 %v1605_v1 }
 0x47e   :  { %5013 = vtanh.f32 %v1597_v5 }
 0x47f   :  { %5015 = vtanh.f32 %v1610_v45 }
 0x486   :  { %v5010_v30 = vpop.eup %5009 }
 0x487   :  { %v5012_v61 = vpop.eup %5011  ;;  %v1603_v43 = vadd.f32 1.0, %v5010_v30 }
 0x488   :  { %v1607_v17 = vadd.f32 1.0, %v5012_v61  ;;  %v5014_v34 = vpop.eup %5013 }
 0x489   :  { %v1604_v15 = vmul.f32 0.5, %v1603_v43  ;;  %v5016_v42 = vpop.eup %5015 }
 0x48a   :  { %v1608_v25 = vmul.f32 0.5, %v1607_v17  ;;  %v1612_v24 = vadd.f32 1.0, %v5016_v42 }
 0x48b   :  { %v1615_v2 = vmul.f32 %v5014_v34, %v1604_v15  ;;  %v6911_v34 = vld [vmem:[#allocation71_spill] sm:$0xff] }
 0x48c   :  { %v1614_v37 = vmul.f32 %v1608_v25, %v5899_v0  ;;  %v1613_v20 = vmul.f32 0.5, %v1612_v24  ;;  %v1290_v0 = vadd.f32 %v5904_v59, %v6911_v34 }
 0x48e   :  { %v6017_v35 = vadd.f32 %v1615_v2, %v1614_v37 }
 0x490   :  { %5017 = vtanh.f32 %v6017_v35 }
 0x497   :  { %v1690_v49 = vpop.f32.mrb[6].mxu0  ;;  %v1761_v12 = vpop.f32.mrb[6].mxu1 }
 0x498   :  { %v4895_v1 = vadd.f32 %v1690_v49, %v6787_v51  ;;  %v1692_v5 = vpop.f32.mrb[7].mxu0  ;;  %v1763_v30 = vpop.f32.mrb[7].mxu1  ;;  %v4911_v61 = vadd.f32 %v1761_v12, %v5647_v38 }
 0x499   :  { %v4896_v43 = vadd.f32 %v1692_v5, %v6788_v11  ;;  %v4912_v37 = vadd.f32 %v1763_v30, %v5654_v31 }
 0x49a   :  { %v5018_v45 = vpop.eup %5017  ;;  %v1770_v17 = vmul.f32 0.5, %v4895_v1 }
 0x49b   :  { %v1774_v2 = vmul.f32 0.5, %v4896_v43  ;;  %v1618_v25 = vmul.f32 %v5018_v45, %v1613_v20  ;;  %v1779_v42 = vmul.f32 0.5, %v4912_v37  ;;  %v6914_v37 = vld [vmem:[#allocation14_spill] sm:$0xff] }
 0x49c   :  { %5019 = vtanh.f32 %v1770_v17 }
 0x49d   :  { %5021 = vtanh.f32 %v1774_v2  ;;  %v6025_v15 = vadd.f32 %v1618_v25, %v1290_v0  ;;  %1852 = vmatprep.mubr.f32.mxu0 %v1618_v25  ;;  %1923 = vmatprep.mubr.f32.mxu1 %v1618_v25 }
 0x49e   :  { %5023 = vtanh.f32 %v4911_v61  ;;  %v6913_v61 = vld [vmem:[#allocation13_spill] sm:$0xff] }
 0x49f   :  { %5025 = vtanh.f32 %v1779_v42  ;;  %v6915_v42 = vld [vmem:[#allocation15_spill] sm:$0xff] }
 0x4a6   :  { %v5020_v24 = vpop.eup %5019 }
 0x4a7   :  { %v5022_v49 = vpop.eup %5021  ;;  %v1772_v1 = vadd.f32 1.0, %v5020_v24  ;;  %v6916_v24 = vld [vmem:[#allocation16_spill] sm:$0xff] }
 0x4a8   :  { %v1776_v5 = vadd.f32 1.0, %v5022_v49  ;;  %v5024_v43 = vpop.eup %5023  ;;  %v6917_v49 = vld [vmem:[#allocation17_spill] sm:$0xff] }
 0x4a9   :  { %v1773_v59 = vmul.f32 0.5, %v1772_v1  ;;  %v5026_v34 = vpop.eup %5025  ;;  %v6918_v1 = vld [vmem:[#allocation18_spill] sm:$0xff] }
 0x4aa   :  { %v1777_v20 = vmul.f32 0.5, %v1776_v5  ;;  %v1781_v0 = vadd.f32 1.0, %v5026_v34  ;;  %v6919_v5 = vld [vmem:[#allocation19_spill] sm:$0xff]  ;;  %v6925_v34 = vld [vmem:[#allocation25_spill] sm:$0xff] }
 0x4ab   :  { %v1784_v45 = vmul.f32 %v5024_v43, %v1773_v59  ;;  %v6920_v59 = vld [vmem:[#allocation20_spill] sm:$0xff]  ;;  %v6921_v43 = vld [vmem:[#allocation21_spill] sm:$0xff] }
 0x4ac   :  { %v1783_v12 = vmul.f32 %v1777_v20, %v5911_v27  ;;  %v1782_v2 = vmul.f32 0.5, %v1781_v0  ;;  %v6912_v27 = vld [vmem:[#allocation12_spill] sm:$0xff]  ;;  %v6922_v20 = vld [vmem:[#allocation22_spill] sm:$0xff] }
 0x4ad   :  { %v6926_v0 = vld [vmem:[#allocation26_spill] sm:$0xff] }
 0x4ae   :  { %v6029_v17 = vadd.f32 %v1784_v45, %v1783_v12  ;;  %v6923_v45 = vld [vmem:[#allocation23_spill] sm:$0xff]  ;;  %v6924_v12 = vld [vmem:[#allocation24_spill] sm:$0xff] }
 0x4b0   :  { %5027 = vtanh.f32 %v6029_v17 }
 0x4ba   :  { %v5028_v30 = vpop.eup %5027 }
 0x4bb   :  { %v1787_v25 = vmul.f32 %v5028_v30, %v1782_v2  ;;  %v6927_v2 = vld [vmem:[#allocation27_spill] sm:$0xff]  ;;  %v6928_v30 = vld [vmem:[#allocation28_spill] sm:$0xff] }
 0x4bd   :  { %1853 = vmatmul.mubr.f32.vlgmr.msra.gmra.mrb[22].mxu0 %v1787_v25  ;;  %1924 = vmatmul.mubr.f32.vlgmr.msra.gmra.mrb[22].mxu1 %v1787_v25 }
 0x4be   :  { %4124 = vmatpush1.bf16.msra.mxu0 %v5301_v47  ;;  %4156 = vmatpush1.bf16.msra.mxu1 %v5304_v50 }
 0x4bf   :  { %4126 = vmatprep.subr.bf16.mxu0 %v5307_v53  ;;  %4158 = vmatprep.subr.bf16.mxu1 %v5309_v56 }
 0x4c0   :  { %2017 = vmatprep.mubr.f32.mxu0 %v6726_v21  ;;  %2088 = vmatprep.mubr.f32.mxu1 %v6726_v21 }
 0x4c2   :  { %4128 = vmatpush1.bf16.msra.mxu0 %v5315_v60  ;;  %4160 = vmatpush1.bf16.msra.mxu1 %v5319_v63 }
 0x4c3   :  { %4130 = vmatprep.subr.bf16.mxu0 %v5323_v3  ;;  %4162 = vmatprep.subr.bf16.mxu1 %v5326_v6 }
 0x4c6   :  { %4132 = vmatpush1.bf16.msra.mxu0 %v5332_v10  ;;  %4164 = vmatpush1.bf16.msra.mxu1 %v5336_v13 }
 0x4c7   :  { %4134 = vmatprep.subr.bf16.mxu0 %v5340_v16  ;;  %4166 = vmatprep.subr.bf16.mxu1 %v5343_v19 }
 0x4ca   :  { %4136 = vmatpush1.bf16.msra.mxu0 %v5349_v23  ;;  %4168 = vmatpush1.bf16.msra.mxu1 %v5353_v26 }
 0x4cb   :  { %4138 = vmatprep.subr.bf16.mxu0 %v5357_v29  ;;  %4170 = vmatprep.subr.bf16.mxu1 %v5360_v32 }
 0x4ce   :  { %4140 = vmatpush1.bf16.msra.mxu0 %v5366_v36  ;;  %4172 = vmatpush1.bf16.msra.mxu1 %v5370_v40 }
 0x4cf   :  { %4142 = vmatprep.subr.bf16.mxu0 %v5374_v44  ;;  %4174 = vmatprep.subr.bf16.mxu1 %v5377_v48 }
 0x4d2   :  { %4144 = vmatpush1.bf16.msra.mxu0 %v5383_v54  ;;  %4176 = vmatpush1.bf16.msra.mxu1 %v5387_v58 }
 0x4d3   :  { %4146 = vmatprep.subr.bf16.mxu0 %v5391_v62  ;;  %4178 = vmatprep.subr.bf16.mxu1 %v5394_v4 }
 0x4d6   :  { %4148 = vmatpush1.bf16.msra.mxu0 %v5400_v9  ;;  %4180 = vmatpush1.bf16.msra.mxu1 %v5404_v14 }
 0x4d7   :  { %4150 = vmatprep.subr.bf16.mxu0 %v5408_v18  ;;  %4182 = vmatprep.subr.bf16.mxu1 %v5411_v22 }
 0x4da   :  { %4152 = vmatpush1.bf16.msra.mxu0 %v5417_v28  ;;  %4184 = vmatpush1.bf16.msra.mxu1 %v5421_v33 }
 0x4db   :  { %4186 = vmatprep.subr.bf16.mxu0 %v5425_v39  ;;  %4250 = vmatprep.subr.bf16.mxu1 %v5428_v46 }
 0x4dd   :  { %2018 = vmatmul.mubr.f32.vlgmr.msra.gmra.mrb[8].mxu0 %v1787_v25  ;;  %2089 = vmatmul.mubr.f32.vlgmr.msra.gmra.mrb[8].mxu1 %v1787_v25  ;;  %v6929_v25 = vld [vmem:[#allocation29_spill] sm:$0xff] }
 0x4de   :  { %4188 = vmatpush1.bf16.msra.mxu0 %v5431_v52  ;;  %4252 = vmatpush1.bf16.msra.mxu1 %v5435_v55 }
 0x4df   :  { %4190 = vmatprep.subr.bf16.mxu0 %v5437_v57  ;;  %4254 = vmatprep.subr.bf16.mxu1 %v6912_v27 }
 0x4e2   :  { %4192 = vmatpush1.bf16.msra.mxu0 %v6913_v61  ;;  %4256 = vmatpush1.bf16.msra.mxu1 %v6914_v37 }
 0x4e3   :  { %4194 = vmatprep.subr.bf16.mxu0 %v6915_v42  ;;  %4258 = vmatprep.subr.bf16.mxu1 %v6916_v24 }
 0x4e6   :  { %4196 = vmatpush1.bf16.msra.mxu0 %v6917_v49  ;;  %4260 = vmatpush1.bf16.msra.mxu1 %v6918_v1  ;;  %v6973_v1 = vld [vmem:[#allocation73_spill] sm:$0xff] }
 0x4e7   :  { %4198 = vmatprep.subr.bf16.mxu0 %v6919_v5  ;;  %4262 = vmatprep.subr.bf16.mxu1 %v6920_v59  ;;  %v6930_v5 = vld [vmem:[#allocation30_spill] sm:$0xff]  ;;  %v6931_v59 = vld [vmem:[#allocation31_spill] sm:$0xff] }
 0x4ea   :  { %4200 = vmatpush1.bf16.msra.mxu0 %v6921_v43  ;;  %4264 = vmatpush1.bf16.msra.mxu1 %v6922_v20  ;;  %v6932_v43 = vld [vmem:[#allocation32_spill] sm:$0xff]  ;;  %v6933_v20 = vld [vmem:[#allocation33_spill] sm:$0xff] }
 0x4eb   :  { %4202 = vmatprep.subr.bf16.mxu0 %v6923_v45  ;;  %4266 = vmatprep.subr.bf16.mxu1 %v6924_v12  ;;  %v6934_v45 = vld [vmem:[#allocation34_spill] sm:$0xff]  ;;  %v6935_v12 = vld [vmem:[#allocation35_spill] sm:$0xff] }
 0x4ee   :  { %4204 = vmatpush1.bf16.msra.mxu0 %v6925_v34  ;;  %4268 = vmatpush1.bf16.msra.mxu1 %v6926_v0  ;;  %v6936_v34 = vld [vmem:[#allocation36_spill] sm:$0xff]  ;;  %v6937_v0 = vld [vmem:[#allocation37_spill] sm:$0xff] }
 0x4ef   :  { %4206 = vmatprep.subr.bf16.mxu0 %v6927_v2  ;;  %4270 = vmatprep.subr.bf16.mxu1 %v6928_v30  ;;  %v6938_v2 = vld [vmem:[#allocation38_spill] sm:$0xff]  ;;  %v6939_v30 = vld [vmem:[#allocation39_spill] sm:$0xff] }
 0x4f2   :  { %4208 = vmatpush1.bf16.msra.mxu0 %v6929_v25  ;;  %4272 = vmatpush1.bf16.msra.mxu1 %v6930_v5  ;;  %v6940_v25 = vld [vmem:[#allocation40_spill] sm:$0xff]  ;;  %v6941_v5 = vld [vmem:[#allocation41_spill] sm:$0xff] }
 0x4f3   :  { %4210 = vmatprep.subr.bf16.mxu0 %v6931_v59  ;;  %4274 = vmatprep.subr.bf16.mxu1 %v6932_v43  ;;  %v6942_v59 = vld [vmem:[#allocation42_spill] sm:$0xff]  ;;  %v6943_v43 = vld [vmem:[#allocation43_spill] sm:$0xff] }
 0x4f6   :  { %4212 = vmatpush1.bf16.msra.mxu0 %v6933_v20  ;;  %4276 = vmatpush1.bf16.msra.mxu1 %v6934_v45  ;;  %v6944_v20 = vld [vmem:[#allocation44_spill] sm:$0xff]  ;;  %v6945_v45 = vld [vmem:[#allocation45_spill] sm:$0xff] }
 0x4f7   :  { %4214 = vmatprep.subr.bf16.mxu0 %v6935_v12  ;;  %4278 = vmatprep.subr.bf16.mxu1 %v6936_v34  ;;  %v6946_v12 = vld [vmem:[#allocation46_spill] sm:$0xff]  ;;  %v6947_v34 = vld [vmem:[#allocation47_spill] sm:$0xff] }
 0x4fa   :  { %4216 = vmatpush1.bf16.msra.mxu0 %v6937_v0  ;;  %4280 = vmatpush1.bf16.msra.mxu1 %v6938_v2  ;;  %v6948_v0 = vld [vmem:[#allocation48_spill] sm:$0xff]  ;;  %v6949_v2 = vld [vmem:[#allocation49_spill] sm:$0xff] }
 0x4fb   :  { %4218 = vmatprep.subr.bf16.mxu0 %v6939_v30  ;;  %4282 = vmatprep.subr.bf16.mxu1 %v6940_v25  ;;  %v6950_v30 = vld [vmem:[#allocation50_spill] sm:$0xff]  ;;  %v6951_v25 = vld [vmem:[#allocation51_spill] sm:$0xff] }
 0x4fe   :  { %4220 = vmatpush1.bf16.msra.mxu0 %v6941_v5  ;;  %4284 = vmatpush1.bf16.msra.mxu1 %v6942_v59  ;;  %v6952_v5 = vld [vmem:[#allocation52_spill] sm:$0xff]  ;;  %v6953_v59 = vld [vmem:[#allocation53_spill] sm:$0xff] }
 0x4ff   :  { %4222 = vmatprep.subr.bf16.mxu0 %v6943_v43  ;;  %4286 = vmatprep.subr.bf16.mxu1 %v6944_v20  ;;  %v6954_v43 = vld [vmem:[#allocation54_spill] sm:$0xff]  ;;  %v6955_v20 = vld [vmem:[#allocation55_spill] sm:$0xff] }
 0x502   :  { %4224 = vmatpush1.bf16.msra.mxu0 %v6945_v45  ;;  %4288 = vmatpush1.bf16.msra.mxu1 %v6946_v12  ;;  %v6956_v45 = vld [vmem:[#allocation56_spill] sm:$0xff]  ;;  %v6957_v12 = vld [vmem:[#allocation57_spill] sm:$0xff] }
 0x503   :  { %4226 = vmatprep.subr.bf16.mxu0 %v6947_v34  ;;  %4290 = vmatprep.subr.bf16.mxu1 %v6948_v0  ;;  %v6958_v34 = vld [vmem:[#allocation58_spill] sm:$0xff]  ;;  %v6959_v0 = vld [vmem:[#allocation59_spill] sm:$0xff] }
 0x506   :  { %4228 = vmatpush1.bf16.msra.mxu0 %v6949_v2  ;;  %4292 = vmatpush1.bf16.msra.mxu1 %v6950_v30  ;;  %v6960_v2 = vld [vmem:[#allocation60_spill] sm:$0xff]  ;;  %v6961_v30 = vld [vmem:[#allocation61_spill] sm:$0xff] }
 0x507   :  { %4230 = vmatprep.subr.bf16.mxu0 %v6951_v25  ;;  %4294 = vmatprep.subr.bf16.mxu1 %v6952_v5  ;;  %v6962_v25 = vld [vmem:[#allocation62_spill] sm:$0xff]  ;;  %v6963_v5 = vld [vmem:[#allocation63_spill] sm:$0xff] }
 0x50a   :  { %4232 = vmatpush1.bf16.msra.mxu0 %v6953_v59  ;;  %4296 = vmatpush1.bf16.msra.mxu1 %v6954_v43  ;;  %v6964_v59 = vld [vmem:[#allocation64_spill] sm:$0xff]  ;;  %v6965_v43 = vld [vmem:[#allocation65_spill] sm:$0xff] }
 0x50b   :  { %4234 = vmatprep.subr.bf16.mxu0 %v6955_v20  ;;  %4298 = vmatprep.subr.bf16.mxu1 %v6956_v45  ;;  %v6966_v20 = vld [vmem:[#allocation66_spill] sm:$0xff]  ;;  %v6967_v45 = vld [vmem:[#allocation67_spill] sm:$0xff] }
 0x50e   :  { %4236 = vmatpush1.bf16.msra.mxu0 %v6957_v12  ;;  %4300 = vmatpush1.bf16.msra.mxu1 %v6958_v34  ;;  %v6968_v12 = vld [vmem:[#allocation68_spill] sm:$0xff]  ;;  %v6969_v34 = vld [vmem:[#allocation69_spill] sm:$0xff] }
 0x50f   :  { %4238 = vmatprep.subr.bf16.mxu0 %v6959_v0  ;;  %4302 = vmatprep.subr.bf16.mxu1 %v6960_v2  ;;  %v6970_v0 = vld [vmem:[#allocation70_spill] sm:$0xff] }
 0x510   :  { %v6971_v2 = vld [vmem:[#allocation10_spill] sm:$0xff] }
 0x512   :  { %4240 = vmatpush1.bf16.msra.mxu0 %v6961_v30  ;;  %4304 = vmatpush1.bf16.msra.mxu1 %v6962_v25  ;;  %v6972_v30 = vld [vmem:[#allocation11_spill] sm:$0xff] }
 0x513   :  { %4242 = vmatprep.subr.bf16.mxu0 %v6963_v5  ;;  %4306 = vmatprep.subr.bf16.mxu1 %v6964_v59 }
 0x516   :  { %4244 = vmatpush1.bf16.msra.mxu0 %v6965_v43  ;;  %4308 = vmatpush1.bf16.msra.mxu1 %v6966_v20 }
 0x517   :  { %4246 = vmatprep.subr.bf16.mxu0 %v6967_v45  ;;  %4310 = vmatprep.subr.bf16.mxu1 %v6968_v12 }
 0x51a   :  { %4248 = vmatpush1.bf16.msra.mxu0 %v6969_v34  ;;  %4312 = vmatpush1.bf16.msra.mxu1 %v6970_v0 }
 0x51b   :  { %4314 = vmatprep.subr.bf16.mxu0 %v6971_v2  ;;  %4346 = vmatprep.subr.bf16.mxu1 %v6972_v30 }
 0x590   :  { %v1854_v25 = vpop.f32.mrb[22].mxu0  ;;  %v1925_v5 = vpop.f32.mrb[22].mxu1 }
 0x591   :  { %v1855_v59 = vadd.f32 %v1854_v25, %v6973_v1  ;;  %v1856_v49 = vpop.f32.mrb[23].mxu0  ;;  %v1927_v43 = vpop.f32.mrb[23].mxu1  ;;  %v1926_v12 = vadd.f32 %v1925_v5, %v6848_v8 }
 0x592   :  { %v1857_v20 = vadd.f32 %v1856_v49, %v6847_v7  ;;  %v1928_v0 = vadd.f32 %v1927_v43, %v6849_v41 }
 0x593   :  { %v1930_v24 = vmul.f32 0.5, %v1855_v59 }
 0x594   :  { %v1934_v45 = vmul.f32 0.5, %v1857_v20  ;;  %v1939_v2 = vmul.f32 0.5, %v1928_v0 }
 0x595   :  { %5029 = vtanh.f32 %v1930_v24 }
 0x596   :  { %5031 = vtanh.f32 %v1934_v45 }
 0x597   :  { %5033 = vtanh.f32 %v1926_v12 }
 0x598   :  { %5035 = vtanh.f32 %v1939_v2 }
 0x59f   :  { %v5030_v34 = vpop.eup %5029 }
 0x5a0   :  { %v5032_v30 = vpop.eup %5031  ;;  %v1932_v42 = vadd.f32 1.0, %v5030_v34 }
 0x5a1   :  { %v1936_v37 = vadd.f32 1.0, %v5032_v30  ;;  %v5034_v1 = vpop.eup %5033 }
 0x5a2   :  { %v1933_v25 = vmul.f32 0.5, %v1932_v42  ;;  %v5036_v24 = vpop.eup %5035 }
 0x5a3   :  { %v1937_v61 = vmul.f32 0.5, %v1936_v37  ;;  %v1941_v5 = vadd.f32 1.0, %v5036_v24 }
 0x5a4   :  { %v1944_v27 = vmul.f32 %v5034_v1, %v1933_v25 }
 0x5a5   :  { %v1943_v49 = vmul.f32 %v1937_v61, %v6017_v35  ;;  %v1942_v0 = vmul.f32 0.5, %v1941_v5 }
 0x5a7   :  { %v6135_v59 = vadd.f32 %v1944_v27, %v1943_v49 }
 0x5a9   :  { %5037 = vtanh.f32 %v6135_v59 }
 0x5b0   :  { %v2019_v20 = vpop.f32.mrb[8].mxu0  ;;  %v2090_v43 = vpop.f32.mrb[8].mxu1 }
 0x5b1   :  { %v4897_v45 = vadd.f32 %v2019_v20, %v6787_v51  ;;  %v2021_v12 = vpop.f32.mrb[9].mxu0  ;;  %v2092_v34 = vpop.f32.mrb[9].mxu1  ;;  %v4913_v35 = vadd.f32 %v2090_v43, %v5647_v38 }
 0x5b2   :  { %v4898_v42 = vadd.f32 %v2021_v12, %v6788_v11  ;;  %v4914_v61 = vadd.f32 %v2092_v34, %v5654_v31 }
 0x5b3   :  { %v5038_v2 = vpop.eup %5037  ;;  %v2099_v37 = vmul.f32 0.5, %v4897_v45 }
 0x5b4   :  { %v2103_v1 = vmul.f32 0.5, %v4898_v42  ;;  %v1947_v30 = vmul.f32 %v5038_v2, %v1942_v0  ;;  %v2108_v25 = vmul.f32 0.5, %v4914_v61  ;;  %v6976_v61 = vld [vmem:[#allocation14_spill] sm:$0xff] }
 0x5b5   :  { %5039 = vtanh.f32 %v2099_v37 }
 0x5b6   :  { %5041 = vtanh.f32 %v2103_v1  ;;  %v6142_v27 = vadd.f32 %v1947_v30, %v6025_v15  ;;  %2181 = vmatprep.mubr.f32.mxu0 %v1947_v30  ;;  %2252 = vmatprep.mubr.f32.mxu1 %v1947_v30 }
 0x5b7   :  { %5043 = vtanh.f32 %v4913_v35  ;;  %v6975_v35 = vld [vmem:[#allocation13_spill] sm:$0xff] }
 0x5b8   :  { %5045 = vtanh.f32 %v2108_v25  ;;  %v6977_v25 = vld [vmem:[#allocation15_spill] sm:$0xff] }
 0x5bf   :  { %v5040_v49 = vpop.eup %5039 }
 0x5c0   :  { %v5042_v24 = vpop.eup %5041  ;;  %v2101_v5 = vadd.f32 1.0, %v5040_v49  ;;  %v6978_v49 = vld [vmem:[#allocation16_spill] sm:$0xff] }
 0x5c1   :  { %v2105_v20 = vadd.f32 1.0, %v5042_v24  ;;  %v5044_v12 = vpop.eup %5043  ;;  %v6979_v24 = vld [vmem:[#allocation17_spill] sm:$0xff] }
 0x5c2   :  { %v2102_v45 = vmul.f32 0.5, %v2101_v5  ;;  %v5046_v15 = vpop.eup %5045  ;;  %v6980_v5 = vld [vmem:[#allocation18_spill] sm:$0xff] }
 0x5c3   :  { %v2106_v0 = vmul.f32 0.5, %v2105_v20  ;;  %v2110_v37 = vadd.f32 1.0, %v5046_v15  ;;  %v6981_v20 = vld [vmem:[#allocation19_spill] sm:$0xff]  ;;  %v6987_v15 = vld [vmem:[#allocation25_spill] sm:$0xff] }
 0x5c4   :  { %v2113_v42 = vmul.f32 %v5044_v12, %v2102_v45  ;;  %v6982_v45 = vld [vmem:[#allocation20_spill] sm:$0xff]  ;;  %v6983_v12 = vld [vmem:[#allocation21_spill] sm:$0xff] }
 0x5c5   :  { %v2112_v43 = vmul.f32 %v2106_v0, %v6029_v17  ;;  %v2111_v1 = vmul.f32 0.5, %v2110_v37  ;;  %v6974_v17 = vld [vmem:[#allocation12_spill] sm:$0xff]  ;;  %v6984_v0 = vld [vmem:[#allocation22_spill] sm:$0xff] }
 0x5c6   :  { %v6988_v37 = vld [vmem:[#allocation26_spill] sm:$0xff] }
 0x5c7   :  { %v6146_v2 = vadd.f32 %v2113_v42, %v2112_v43  ;;  %v6985_v42 = vld [vmem:[#allocation23_spill] sm:$0xff]  ;;  %v6986_v43 = vld [vmem:[#allocation24_spill] sm:$0xff] }
 0x5c9   :  { %5047 = vtanh.f32 %v6146_v2 }
 0x5d3   :  { %v5048_v34 = vpop.eup %5047 }
 0x5d4   :  { %v2116_v30 = vmul.f32 %v5048_v34, %v2111_v1  ;;  %v6989_v1 = vld [vmem:[#allocation27_spill] sm:$0xff]  ;;  %v6990_v34 = vld [vmem:[#allocation28_spill] sm:$0xff] }
 0x5d6   :  { %2182 = vmatmul.mubr.f32.vlgmr.msra.gmra.mrb[24].mxu0 %v2116_v30  ;;  %2253 = vmatmul.mubr.f32.vlgmr.msra.gmra.mrb[24].mxu1 %v2116_v30 }
 0x5d7   :  { %4316 = vmatpush1.bf16.msra.mxu0 %v5301_v47  ;;  %4348 = vmatpush1.bf16.msra.mxu1 %v5304_v50 }
 0x5d8   :  { %4318 = vmatprep.subr.bf16.mxu0 %v5307_v53  ;;  %4350 = vmatprep.subr.bf16.mxu1 %v5309_v56 }
 0x5d9   :  { %2346 = vmatprep.mubr.f32.mxu0 %v6726_v21  ;;  %2417 = vmatprep.mubr.f32.mxu1 %v6726_v21 }
 0x5db   :  { %4320 = vmatpush1.bf16.msra.mxu0 %v5315_v60  ;;  %4352 = vmatpush1.bf16.msra.mxu1 %v5319_v63 }
 0x5dc   :  { %4322 = vmatprep.subr.bf16.mxu0 %v5323_v3  ;;  %4354 = vmatprep.subr.bf16.mxu1 %v5326_v6 }
 0x5df   :  { %4324 = vmatpush1.bf16.msra.mxu0 %v5332_v10  ;;  %4356 = vmatpush1.bf16.msra.mxu1 %v5336_v13 }
 0x5e0   :  { %4326 = vmatprep.subr.bf16.mxu0 %v5340_v16  ;;  %4358 = vmatprep.subr.bf16.mxu1 %v5343_v19 }
 0x5e3   :  { %4328 = vmatpush1.bf16.msra.mxu0 %v5349_v23  ;;  %4360 = vmatpush1.bf16.msra.mxu1 %v5353_v26 }
 0x5e4   :  { %4330 = vmatprep.subr.bf16.mxu0 %v5357_v29  ;;  %4362 = vmatprep.subr.bf16.mxu1 %v5360_v32 }
 0x5e7   :  { %4332 = vmatpush1.bf16.msra.mxu0 %v5366_v36  ;;  %4364 = vmatpush1.bf16.msra.mxu1 %v5370_v40 }
 0x5e8   :  { %4334 = vmatprep.subr.bf16.mxu0 %v5374_v44  ;;  %4366 = vmatprep.subr.bf16.mxu1 %v5377_v48 }
 0x5eb   :  { %4336 = vmatpush1.bf16.msra.mxu0 %v5383_v54  ;;  %4368 = vmatpush1.bf16.msra.mxu1 %v5387_v58 }
 0x5ec   :  { %4338 = vmatprep.subr.bf16.mxu0 %v5391_v62  ;;  %4370 = vmatprep.subr.bf16.mxu1 %v5394_v4 }
 0x5ef   :  { %4340 = vmatpush1.bf16.msra.mxu0 %v5400_v9  ;;  %4372 = vmatpush1.bf16.msra.mxu1 %v5404_v14 }
 0x5f0   :  { %4342 = vmatprep.subr.bf16.mxu0 %v5408_v18  ;;  %4374 = vmatprep.subr.bf16.mxu1 %v5411_v22 }
 0x5f3   :  { %4344 = vmatpush1.bf16.msra.mxu0 %v5417_v28  ;;  %4376 = vmatpush1.bf16.msra.mxu1 %v5421_v33 }
 0x5f4   :  { %4378 = vmatprep.subr.bf16.mxu0 %v5425_v39  ;;  %4442 = vmatprep.subr.bf16.mxu1 %v5428_v46 }
 0x5f6   :  { %2347 = vmatmul.mubr.f32.vlgmr.msra.gmra.mrb[10].mxu0 %v2116_v30  ;;  %2418 = vmatmul.mubr.f32.vlgmr.msra.gmra.mrb[10].mxu1 %v2116_v30  ;;  %v6991_v30 = vld [vmem:[#allocation29_spill] sm:$0xff] }
 0x5f7   :  { %4380 = vmatpush1.bf16.msra.mxu0 %v5431_v52  ;;  %4444 = vmatpush1.bf16.msra.mxu1 %v5435_v55 }
 0x5f8   :  { %4382 = vmatprep.subr.bf16.mxu0 %v5437_v57  ;;  %4446 = vmatprep.subr.bf16.mxu1 %v6974_v17 }
 0x5fb   :  { %4384 = vmatpush1.bf16.msra.mxu0 %v6975_v35  ;;  %4448 = vmatpush1.bf16.msra.mxu1 %v6976_v61 }
 0x5fc   :  { %4386 = vmatprep.subr.bf16.mxu0 %v6977_v25  ;;  %4450 = vmatprep.subr.bf16.mxu1 %v6978_v49 }
 0x5ff   :  { %4388 = vmatpush1.bf16.msra.mxu0 %v6979_v24  ;;  %4452 = vmatpush1.bf16.msra.mxu1 %v6980_v5  ;;  %v7035_v5 = vld [vmem:[#allocation73_spill] sm:$0xff] }
 0x600   :  { %4390 = vmatprep.subr.bf16.mxu0 %v6981_v20  ;;  %4454 = vmatprep.subr.bf16.mxu1 %v6982_v45  ;;  %v6992_v20 = vld [vmem:[#allocation30_spill] sm:$0xff]  ;;  %v6993_v45 = vld [vmem:[#allocation31_spill] sm:$0xff] }
 0x603   :  { %4392 = vmatpush1.bf16.msra.mxu0 %v6983_v12  ;;  %4456 = vmatpush1.bf16.msra.mxu1 %v6984_v0  ;;  %v6994_v12 = vld [vmem:[#allocation32_spill] sm:$0xff]  ;;  %v6995_v0 = vld [vmem:[#allocation33_spill] sm:$0xff] }
 0x604   :  { %4394 = vmatprep.subr.bf16.mxu0 %v6985_v42  ;;  %4458 = vmatprep.subr.bf16.mxu1 %v6986_v43  ;;  %v6996_v42 = vld [vmem:[#allocation34_spill] sm:$0xff]  ;;  %v6997_v43 = vld [vmem:[#allocation35_spill] sm:$0xff] }
 0x607   :  { %4396 = vmatpush1.bf16.msra.mxu0 %v6987_v15  ;;  %4460 = vmatpush1.bf16.msra.mxu1 %v6988_v37  ;;  %v6998_v15 = vld [vmem:[#allocation36_spill] sm:$0xff]  ;;  %v6999_v37 = vld [vmem:[#allocation37_spill] sm:$0xff] }
 0x608   :  { %4398 = vmatprep.subr.bf16.mxu0 %v6989_v1  ;;  %4462 = vmatprep.subr.bf16.mxu1 %v6990_v34  ;;  %v7000_v1 = vld [vmem:[#allocation38_spill] sm:$0xff]  ;;  %v7001_v34 = vld [vmem:[#allocation39_spill] sm:$0xff] }
 0x60b   :  { %4400 = vmatpush1.bf16.msra.mxu0 %v6991_v30  ;;  %4464 = vmatpush1.bf16.msra.mxu1 %v6992_v20  ;;  %v7002_v30 = vld [vmem:[#allocation40_spill] sm:$0xff]  ;;  %v7003_v20 = vld [vmem:[#allocation41_spill] sm:$0xff] }
 0x60c   :  { %4402 = vmatprep.subr.bf16.mxu0 %v6993_v45  ;;  %4466 = vmatprep.subr.bf16.mxu1 %v6994_v12  ;;  %v7004_v45 = vld [vmem:[#allocation42_spill] sm:$0xff]  ;;  %v7005_v12 = vld [vmem:[#allocation43_spill] sm:$0xff] }
 0x60f   :  { %4404 = vmatpush1.bf16.msra.mxu0 %v6995_v0  ;;  %4468 = vmatpush1.bf16.msra.mxu1 %v6996_v42  ;;  %v7006_v0 = vld [vmem:[#allocation44_spill] sm:$0xff]  ;;  %v7007_v42 = vld [vmem:[#allocation45_spill] sm:$0xff] }
 0x610   :  { %4406 = vmatprep.subr.bf16.mxu0 %v6997_v43  ;;  %4470 = vmatprep.subr.bf16.mxu1 %v6998_v15  ;;  %v7008_v43 = vld [vmem:[#allocation46_spill] sm:$0xff]  ;;  %v7009_v15 = vld [vmem:[#allocation47_spill] sm:$0xff] }
 0x613   :  { %4408 = vmatpush1.bf16.msra.mxu0 %v6999_v37  ;;  %4472 = vmatpush1.bf16.msra.mxu1 %v7000_v1  ;;  %v7010_v37 = vld [vmem:[#allocation48_spill] sm:$0xff]  ;;  %v7011_v1 = vld [vmem:[#allocation49_spill] sm:$0xff] }
 0x614   :  { %4410 = vmatprep.subr.bf16.mxu0 %v7001_v34  ;;  %4474 = vmatprep.subr.bf16.mxu1 %v7002_v30  ;;  %v7012_v34 = vld [vmem:[#allocation50_spill] sm:$0xff]  ;;  %v7013_v30 = vld [vmem:[#allocation51_spill] sm:$0xff] }
 0x617   :  { %4412 = vmatpush1.bf16.msra.mxu0 %v7003_v20  ;;  %4476 = vmatpush1.bf16.msra.mxu1 %v7004_v45  ;;  %v7014_v20 = vld [vmem:[#allocation52_spill] sm:$0xff]  ;;  %v7015_v45 = vld [vmem:[#allocation53_spill] sm:$0xff] }
 0x618   :  { %4414 = vmatprep.subr.bf16.mxu0 %v7005_v12  ;;  %4478 = vmatprep.subr.bf16.mxu1 %v7006_v0  ;;  %v7016_v12 = vld [vmem:[#allocation54_spill] sm:$0xff]  ;;  %v7017_v0 = vld [vmem:[#allocation55_spill] sm:$0xff] }
 0x61b   :  { %4416 = vmatpush1.bf16.msra.mxu0 %v7007_v42  ;;  %4480 = vmatpush1.bf16.msra.mxu1 %v7008_v43  ;;  %v7018_v42 = vld [vmem:[#allocation56_spill] sm:$0xff]  ;;  %v7019_v43 = vld [vmem:[#allocation57_spill] sm:$0xff] }
 0x61c   :  { %4418 = vmatprep.subr.bf16.mxu0 %v7009_v15  ;;  %4482 = vmatprep.subr.bf16.mxu1 %v7010_v37  ;;  %v7020_v15 = vld [vmem:[#allocation58_spill] sm:$0xff]  ;;  %v7021_v37 = vld [vmem:[#allocation59_spill] sm:$0xff] }
 0x61f   :  { %4420 = vmatpush1.bf16.msra.mxu0 %v7011_v1  ;;  %4484 = vmatpush1.bf16.msra.mxu1 %v7012_v34  ;;  %v7022_v1 = vld [vmem:[#allocation60_spill] sm:$0xff]  ;;  %v7023_v34 = vld [vmem:[#allocation61_spill] sm:$0xff] }
 0x620   :  { %4422 = vmatprep.subr.bf16.mxu0 %v7013_v30  ;;  %4486 = vmatprep.subr.bf16.mxu1 %v7014_v20  ;;  %v7024_v30 = vld [vmem:[#allocation62_spill] sm:$0xff]  ;;  %v7025_v20 = vld [vmem:[#allocation63_spill] sm:$0xff] }
 0x623   :  { %4424 = vmatpush1.bf16.msra.mxu0 %v7015_v45  ;;  %4488 = vmatpush1.bf16.msra.mxu1 %v7016_v12  ;;  %v7026_v45 = vld [vmem:[#allocation64_spill] sm:$0xff]  ;;  %v7027_v12 = vld [vmem:[#allocation65_spill] sm:$0xff] }
 0x624   :  { %4426 = vmatprep.subr.bf16.mxu0 %v7017_v0  ;;  %4490 = vmatprep.subr.bf16.mxu1 %v7018_v42  ;;  %v7028_v0 = vld [vmem:[#allocation66_spill] sm:$0xff]  ;;  %v7029_v42 = vld [vmem:[#allocation67_spill] sm:$0xff] }
 0x627   :  { %4428 = vmatpush1.bf16.msra.mxu0 %v7019_v43  ;;  %4492 = vmatpush1.bf16.msra.mxu1 %v7020_v15  ;;  %v7030_v43 = vld [vmem:[#allocation68_spill] sm:$0xff]  ;;  %v7031_v15 = vld [vmem:[#allocation69_spill] sm:$0xff] }
 0x628   :  { %4430 = vmatprep.subr.bf16.mxu0 %v7021_v37  ;;  %4494 = vmatprep.subr.bf16.mxu1 %v7022_v1  ;;  %v7032_v37 = vld [vmem:[#allocation70_spill] sm:$0xff] }
 0x629   :  { %v7033_v1 = vld [vmem:[#allocation10_spill] sm:$0xff] }
 0x62b   :  { %4432 = vmatpush1.bf16.msra.mxu0 %v7023_v34  ;;  %4496 = vmatpush1.bf16.msra.mxu1 %v7024_v30  ;;  %v7034_v34 = vld [vmem:[#allocation11_spill] sm:$0xff] }
 0x62c   :  { %4434 = vmatprep.subr.bf16.mxu0 %v7025_v20  ;;  %4498 = vmatprep.subr.bf16.mxu1 %v7026_v45 }
 0x62f   :  { %4436 = vmatpush1.bf16.msra.mxu0 %v7027_v12  ;;  %4500 = vmatpush1.bf16.msra.mxu1 %v7028_v0 }
 0x630   :  { %4438 = vmatprep.subr.bf16.mxu0 %v7029_v42  ;;  %4502 = vmatprep.subr.bf16.mxu1 %v7030_v43 }
 0x633   :  { %4440 = vmatpush1.bf16.msra.mxu0 %v7031_v15  ;;  %4504 = vmatpush1.bf16.msra.mxu1 %v7032_v37 }
 0x634   :  { %4506 = vmatprep.subr.bf16.mxu0 %v7033_v1  ;;  %4538 = vmatprep.subr.bf16.mxu1 %v7034_v34 }
 0x6a9   :  { %v2183_v30 = vpop.f32.mrb[24].mxu0  ;;  %v2254_v20 = vpop.f32.mrb[24].mxu1 }
 0x6aa   :  { %v2184_v45 = vadd.f32 %v2183_v30, %v7035_v5  ;;  %v2185_v24 = vpop.f32.mrb[25].mxu0  ;;  %v2256_v12 = vpop.f32.mrb[25].mxu1  ;;  %v2255_v43 = vadd.f32 %v2254_v20, %v6848_v8 }
 0x6ab   :  { %v2186_v0 = vadd.f32 %v2185_v24, %v6847_v7  ;;  %v2257_v37 = vadd.f32 %v2256_v12, %v6849_v41 }
 0x6ac   :  { %v2259_v49 = vmul.f32 0.5, %v2184_v45 }
 0x6ad   :  { %v2263_v42 = vmul.f32 0.5, %v2186_v0  ;;  %v2268_v1 = vmul.f32 0.5, %v2257_v37 }
 0x6ae   :  { %5049 = vtanh.f32 %v2259_v49 }
 0x6af   :  { %5051 = vtanh.f32 %v2263_v42 }
 0x6b0   :  { %5053 = vtanh.f32 %v2255_v43 }
 0x6b1   :  { %5055 = vtanh.f32 %v2268_v1 }
 0x6b8   :  { %v5050_v15 = vpop.eup %5049 }
 0x6b9   :  { %v5052_v34 = vpop.eup %5051  ;;  %v2261_v25 = vadd.f32 1.0, %v5050_v15 }
 0x6ba   :  { %v2265_v61 = vadd.f32 1.0, %v5052_v34  ;;  %v5054_v5 = vpop.eup %5053 }
 0x6bb   :  { %v2262_v30 = vmul.f32 0.5, %v2261_v25  ;;  %v5056_v49 = vpop.eup %5055 }
 0x6bc   :  { %v2266_v35 = vmul.f32 0.5, %v2265_v61  ;;  %v2270_v20 = vadd.f32 1.0, %v5056_v49 }
 0x6bd   :  { %v2273_v17 = vmul.f32 %v5054_v5, %v2262_v30 }
 0x6be   :  { %v2272_v24 = vmul.f32 %v2266_v35, %v6135_v59  ;;  %v2271_v37 = vmul.f32 0.5, %v2270_v20 }
 0x6c0   :  { %v6252_v45 = vadd.f32 %v2273_v17, %v2272_v24 }
 0x6c2   :  { %5057 = vtanh.f32 %v6252_v45 }
 0x6c9   :  { %v2348_v0 = vpop.f32.mrb[10].mxu0  ;;  %v2419_v12 = vpop.f32.mrb[10].mxu1 }
 0x6ca   :  { %v4899_v42 = vadd.f32 %v2348_v0, %v6787_v51  ;;  %v2350_v43 = vpop.f32.mrb[11].mxu0  ;;  %v2421_v15 = vpop.f32.mrb[11].mxu1  ;;  %v4915_v59 = vadd.f32 %v2419_v12, %v5647_v38 }
 0x6cb   :  { %v4900_v25 = vadd.f32 %v2350_v43, %v6788_v11  ;;  %v4916_v35 = vadd.f32 %v2421_v15, %v5654_v31 }
 0x6cc   :  { %v5058_v1 = vpop.eup %5057  ;;  %v2428_v61 = vmul.f32 0.5, %v4899_v42 }
 0x6cd   :  { %v2432_v5 = vmul.f32 0.5, %v4900_v25  ;;  %v2276_v34 = vmul.f32 %v5058_v1, %v2271_v37  ;;  %v2437_v30 = vmul.f32 0.5, %v4916_v35  ;;  %v7038_v35 = vld [vmem:[#allocation14_spill] sm:$0xff] }
 0x6ce   :  { %5059 = vtanh.f32 %v2428_v61 }
 0x6cf   :  { %5061 = vtanh.f32 %v2432_v5  ;;  %v6259_v17 = vadd.f32 %v2276_v34, %v6142_v27  ;;  %2510 = vmatprep.mubr.f32.mxu0 %v2276_v34  ;;  %2581 = vmatprep.mubr.f32.mxu1 %v2276_v34 }
 0x6d0   :  { %5063 = vtanh.f32 %v4915_v59  ;;  %v7037_v59 = vld [vmem:[#allocation13_spill] sm:$0xff] }
 0x6d1   :  { %5065 = vtanh.f32 %v2437_v30  ;;  %v7039_v30 = vld [vmem:[#allocation15_spill] sm:$0xff] }
 0x6d8   :  { %v5060_v24 = vpop.eup %5059 }
 0x6d9   :  { %v5062_v49 = vpop.eup %5061  ;;  %v2430_v20 = vadd.f32 1.0, %v5060_v24  ;;  %v7040_v24 = vld [vmem:[#allocation16_spill] sm:$0xff] }
 0x6da   :  { %v2434_v0 = vadd.f32 1.0, %v5062_v49  ;;  %v5064_v43 = vpop.eup %5063  ;;  %v7041_v49 = vld [vmem:[#allocation17_spill] sm:$0xff] }
 0x6db   :  { %v2431_v42 = vmul.f32 0.5, %v2430_v20  ;;  %v5066_v27 = vpop.eup %5065  ;;  %v7042_v20 = vld [vmem:[#allocation18_spill] sm:$0xff] }
 0x6dc   :  { %v2435_v37 = vmul.f32 0.5, %v2434_v0  ;;  %v2439_v61 = vadd.f32 1.0, %v5066_v27  ;;  %v7043_v0 = vld [vmem:[#allocation19_spill] sm:$0xff]  ;;  %v7049_v27 = vld [vmem:[#allocation25_spill] sm:$0xff] }
 0x6dd   :  { %v2442_v25 = vmul.f32 %v5064_v43, %v2431_v42  ;;  %v7044_v42 = vld [vmem:[#allocation20_spill] sm:$0xff]  ;;  %v7045_v43 = vld [vmem:[#allocation21_spill] sm:$0xff] }
 0x6de   :  { %v2441_v12 = vmul.f32 %v2435_v37, %v6146_v2  ;;  %v2440_v5 = vmul.f32 0.5, %v2439_v61  ;;  %v7036_v2 = vld [vmem:[#allocation12_spill] sm:$0xff]  ;;  %v7046_v37 = vld [vmem:[#allocation22_spill] sm:$0xff] }
 0x6df   :  { %v7050_v61 = vld [vmem:[#allocation26_spill] sm:$0xff] }
 0x6e0   :  { %v6263_v1 = vadd.f32 %v2442_v25, %v2441_v12  ;;  %v7047_v25 = vld [vmem:[#allocation23_spill] sm:$0xff]  ;;  %v7048_v12 = vld [vmem:[#allocation24_spill] sm:$0xff] }
 0x6e2   :  { %5067 = vtanh.f32 %v6263_v1 }
 0x6ec   :  { %v5068_v15 = vpop.eup %5067 }
 0x6ed   :  { %v2445_v34 = vmul.f32 %v5068_v15, %v2440_v5  ;;  %v7051_v5 = vld [vmem:[#allocation27_spill] sm:$0xff]  ;;  %v7052_v15 = vld [vmem:[#allocation28_spill] sm:$0xff] }
 0x6ef   :  { %2511 = vmatmul.mubr.f32.vlgmr.msra.gmra.mrb[26].mxu0 %v2445_v34  ;;  %2582 = vmatmul.mubr.f32.vlgmr.msra.gmra.mrb[26].mxu1 %v2445_v34 }
 0x6f0   :  { %4508 = vmatpush1.bf16.msra.mxu0 %v5301_v47  ;;  %4540 = vmatpush1.bf16.msra.mxu1 %v5304_v50 }
 0x6f1   :  { %4510 = vmatprep.subr.bf16.mxu0 %v5307_v53  ;;  %4542 = vmatprep.subr.bf16.mxu1 %v5309_v56 }
 0x6f2   :  { %2675 = vmatprep.mubr.f32.mxu0 %v6726_v21  ;;  %2746 = vmatprep.mubr.f32.mxu1 %v6726_v21 }
 0x6f4   :  { %4512 = vmatpush1.bf16.msra.mxu0 %v5315_v60  ;;  %4544 = vmatpush1.bf16.msra.mxu1 %v5319_v63 }
 0x6f5   :  { %4514 = vmatprep.subr.bf16.mxu0 %v5323_v3  ;;  %4546 = vmatprep.subr.bf16.mxu1 %v5326_v6 }
 0x6f8   :  { %4516 = vmatpush1.bf16.msra.mxu0 %v5332_v10  ;;  %4548 = vmatpush1.bf16.msra.mxu1 %v5336_v13 }
 0x6f9   :  { %4518 = vmatprep.subr.bf16.mxu0 %v5340_v16  ;;  %4550 = vmatprep.subr.bf16.mxu1 %v5343_v19 }
 0x6fc   :  { %4520 = vmatpush1.bf16.msra.mxu0 %v5349_v23  ;;  %4552 = vmatpush1.bf16.msra.mxu1 %v5353_v26 }
 0x6fd   :  { %4522 = vmatprep.subr.bf16.mxu0 %v5357_v29  ;;  %4554 = vmatprep.subr.bf16.mxu1 %v5360_v32 }
 0x700   :  { %4524 = vmatpush1.bf16.msra.mxu0 %v5366_v36  ;;  %4556 = vmatpush1.bf16.msra.mxu1 %v5370_v40 }
 0x701   :  { %4526 = vmatprep.subr.bf16.mxu0 %v5374_v44  ;;  %4558 = vmatprep.subr.bf16.mxu1 %v5377_v48 }
 0x704   :  { %4528 = vmatpush1.bf16.msra.mxu0 %v5383_v54  ;;  %4560 = vmatpush1.bf16.msra.mxu1 %v5387_v58 }
 0x705   :  { %4530 = vmatprep.subr.bf16.mxu0 %v5391_v62  ;;  %4562 = vmatprep.subr.bf16.mxu1 %v5394_v4 }
 0x708   :  { %4532 = vmatpush1.bf16.msra.mxu0 %v5400_v9  ;;  %4564 = vmatpush1.bf16.msra.mxu1 %v5404_v14 }
 0x709   :  { %4534 = vmatprep.subr.bf16.mxu0 %v5408_v18  ;;  %4566 = vmatprep.subr.bf16.mxu1 %v5411_v22 }
 0x70c   :  { %4536 = vmatpush1.bf16.msra.mxu0 %v5417_v28  ;;  %4568 = vmatpush1.bf16.msra.mxu1 %v5421_v33 }
 0x70d   :  { %4570 = vmatprep.subr.bf16.mxu0 %v5425_v39  ;;  %4634 = vmatprep.subr.bf16.mxu1 %v5428_v46 }
 0x70f   :  { %2676 = vmatmul.mubr.f32.vlgmr.msra.gmra.mrb[12].mxu0 %v2445_v34  ;;  %2747 = vmatmul.mubr.f32.vlgmr.msra.gmra.mrb[12].mxu1 %v2445_v34  ;;  %v7053_v34 = vld [vmem:[#allocation29_spill] sm:$0xff] }
 0x710   :  { %4572 = vmatpush1.bf16.msra.mxu0 %v5431_v52  ;;  %4636 = vmatpush1.bf16.msra.mxu1 %v5435_v55 }
 0x711   :  { %4574 = vmatprep.subr.bf16.mxu0 %v5437_v57  ;;  %4638 = vmatprep.subr.bf16.mxu1 %v7036_v2 }
 0x714   :  { %4576 = vmatpush1.bf16.msra.mxu0 %v7037_v59  ;;  %4640 = vmatpush1.bf16.msra.mxu1 %v7038_v35 }
 0x715   :  { %4578 = vmatprep.subr.bf16.mxu0 %v7039_v30  ;;  %4642 = vmatprep.subr.bf16.mxu1 %v7040_v24 }
 0x718   :  { %4580 = vmatpush1.bf16.msra.mxu0 %v7041_v49  ;;  %4644 = vmatpush1.bf16.msra.mxu1 %v7042_v20  ;;  %v7097_v20 = vld [vmem:[#allocation73_spill] sm:$0xff] }
 0x719   :  { %4582 = vmatprep.subr.bf16.mxu0 %v7043_v0  ;;  %4646 = vmatprep.subr.bf16.mxu1 %v7044_v42  ;;  %v7054_v0 = vld [vmem:[#allocation30_spill] sm:$0xff]  ;;  %v7055_v42 = vld [vmem:[#allocation31_spill] sm:$0xff] }
 0x71c   :  { %4584 = vmatpush1.bf16.msra.mxu0 %v7045_v43  ;;  %4648 = vmatpush1.bf16.msra.mxu1 %v7046_v37  ;;  %v7056_v43 = vld [vmem:[#allocation32_spill] sm:$0xff]  ;;  %v7057_v37 = vld [vmem:[#allocation33_spill] sm:$0xff] }
 0x71d   :  { %4586 = vmatprep.subr.bf16.mxu0 %v7047_v25  ;;  %4650 = vmatprep.subr.bf16.mxu1 %v7048_v12  ;;  %v7058_v25 = vld [vmem:[#allocation34_spill] sm:$0xff]  ;;  %v7059_v12 = vld [vmem:[#allocation35_spill] sm:$0xff] }
 0x720   :  { %4588 = vmatpush1.bf16.msra.mxu0 %v7049_v27  ;;  %4652 = vmatpush1.bf16.msra.mxu1 %v7050_v61  ;;  %v7060_v27 = vld [vmem:[#allocation36_spill] sm:$0xff]  ;;  %v7061_v61 = vld [vmem:[#allocation37_spill] sm:$0xff] }
 0x721   :  { %4590 = vmatprep.subr.bf16.mxu0 %v7051_v5  ;;  %4654 = vmatprep.subr.bf16.mxu1 %v7052_v15  ;;  %v7062_v5 = vld [vmem:[#allocation38_spill] sm:$0xff]  ;;  %v7063_v15 = vld [vmem:[#allocation39_spill] sm:$0xff] }
 0x724   :  { %4592 = vmatpush1.bf16.msra.mxu0 %v7053_v34  ;;  %4656 = vmatpush1.bf16.msra.mxu1 %v7054_v0  ;;  %v7064_v34 = vld [vmem:[#allocation40_spill] sm:$0xff]  ;;  %v7065_v0 = vld [vmem:[#allocation41_spill] sm:$0xff] }
 0x725   :  { %4594 = vmatprep.subr.bf16.mxu0 %v7055_v42  ;;  %4658 = vmatprep.subr.bf16.mxu1 %v7056_v43  ;;  %v7066_v42 = vld [vmem:[#allocation42_spill] sm:$0xff]  ;;  %v7067_v43 = vld [vmem:[#allocation43_spill] sm:$0xff] }
 0x728   :  { %4596 = vmatpush1.bf16.msra.mxu0 %v7057_v37  ;;  %4660 = vmatpush1.bf16.msra.mxu1 %v7058_v25  ;;  %v7068_v37 = vld [vmem:[#allocation44_spill] sm:$0xff]  ;;  %v7069_v25 = vld [vmem:[#allocation45_spill] sm:$0xff] }
 0x729   :  { %4598 = vmatprep.subr.bf16.mxu0 %v7059_v12  ;;  %4662 = vmatprep.subr.bf16.mxu1 %v7060_v27  ;;  %v7070_v12 = vld [vmem:[#allocation46_spill] sm:$0xff]  ;;  %v7071_v27 = vld [vmem:[#allocation47_spill] sm:$0xff] }
 0x72c   :  { %4600 = vmatpush1.bf16.msra.mxu0 %v7061_v61  ;;  %4664 = vmatpush1.bf16.msra.mxu1 %v7062_v5  ;;  %v7072_v61 = vld [vmem:[#allocation48_spill] sm:$0xff]  ;;  %v7073_v5 = vld [vmem:[#allocation49_spill] sm:$0xff] }
 0x72d   :  { %4602 = vmatprep.subr.bf16.mxu0 %v7063_v15  ;;  %4666 = vmatprep.subr.bf16.mxu1 %v7064_v34  ;;  %v7074_v15 = vld [vmem:[#allocation50_spill] sm:$0xff]  ;;  %v7075_v34 = vld [vmem:[#allocation51_spill] sm:$0xff] }
 0x730   :  { %4604 = vmatpush1.bf16.msra.mxu0 %v7065_v0  ;;  %4668 = vmatpush1.bf16.msra.mxu1 %v7066_v42  ;;  %v7076_v0 = vld [vmem:[#allocation52_spill] sm:$0xff]  ;;  %v7077_v42 = vld [vmem:[#allocation53_spill] sm:$0xff] }
 0x731   :  { %4606 = vmatprep.subr.bf16.mxu0 %v7067_v43  ;;  %4670 = vmatprep.subr.bf16.mxu1 %v7068_v37  ;;  %v7078_v43 = vld [vmem:[#allocation54_spill] sm:$0xff]  ;;  %v7079_v37 = vld [vmem:[#allocation55_spill] sm:$0xff] }
 0x734   :  { %4608 = vmatpush1.bf16.msra.mxu0 %v7069_v25  ;;  %4672 = vmatpush1.bf16.msra.mxu1 %v7070_v12  ;;  %v7080_v25 = vld [vmem:[#allocation56_spill] sm:$0xff]  ;;  %v7081_v12 = vld [vmem:[#allocation57_spill] sm:$0xff] }
 0x735   :  { %4610 = vmatprep.subr.bf16.mxu0 %v7071_v27  ;;  %4674 = vmatprep.subr.bf16.mxu1 %v7072_v61  ;;  %v7082_v27 = vld [vmem:[#allocation58_spill] sm:$0xff]  ;;  %v7083_v61 = vld [vmem:[#allocation59_spill] sm:$0xff] }
 0x738   :  { %4612 = vmatpush1.bf16.msra.mxu0 %v7073_v5  ;;  %4676 = vmatpush1.bf16.msra.mxu1 %v7074_v15  ;;  %v7084_v5 = vld [vmem:[#allocation60_spill] sm:$0xff]  ;;  %v7085_v15 = vld [vmem:[#allocation61_spill] sm:$0xff] }
 0x739   :  { %4614 = vmatprep.subr.bf16.mxu0 %v7075_v34  ;;  %4678 = vmatprep.subr.bf16.mxu1 %v7076_v0  ;;  %v7086_v34 = vld [vmem:[#allocation62_spill] sm:$0xff]  ;;  %v7087_v0 = vld [vmem:[#allocation63_spill] sm:$0xff] }
 0x73c   :  { %4616 = vmatpush1.bf16.msra.mxu0 %v7077_v42  ;;  %4680 = vmatpush1.bf16.msra.mxu1 %v7078_v43  ;;  %v7088_v42 = vld [vmem:[#allocation64_spill] sm:$0xff]  ;;  %v7089_v43 = vld [vmem:[#allocation65_spill] sm:$0xff] }
 0x73d   :  { %4618 = vmatprep.subr.bf16.mxu0 %v7079_v37  ;;  %4682 = vmatprep.subr.bf16.mxu1 %v7080_v25  ;;  %v7090_v37 = vld [vmem:[#allocation66_spill] sm:$0xff]  ;;  %v7091_v25 = vld [vmem:[#allocation67_spill] sm:$0xff] }
 0x740   :  { %4620 = vmatpush1.bf16.msra.mxu0 %v7081_v12  ;;  %4684 = vmatpush1.bf16.msra.mxu1 %v7082_v27  ;;  %v7092_v12 = vld [vmem:[#allocation68_spill] sm:$0xff]  ;;  %v7093_v27 = vld [vmem:[#allocation69_spill] sm:$0xff] }
 0x741   :  { %4622 = vmatprep.subr.bf16.mxu0 %v7083_v61  ;;  %4686 = vmatprep.subr.bf16.mxu1 %v7084_v5  ;;  %v7094_v61 = vld [vmem:[#allocation70_spill] sm:$0xff] }
 0x742   :  { %v7095_v5 = vld [vmem:[#allocation10_spill] sm:$0xff] }
 0x744   :  { %4624 = vmatpush1.bf16.msra.mxu0 %v7085_v15  ;;  %4688 = vmatpush1.bf16.msra.mxu1 %v7086_v34  ;;  %v7096_v15 = vld [vmem:[#allocation11_spill] sm:$0xff] }
 0x745   :  { %4626 = vmatprep.subr.bf16.mxu0 %v7087_v0  ;;  %4690 = vmatprep.subr.bf16.mxu1 %v7088_v42 }
 0x748   :  { %4628 = vmatpush1.bf16.msra.mxu0 %v7089_v43  ;;  %4692 = vmatpush1.bf16.msra.mxu1 %v7090_v37 }
 0x749   :  { %4630 = vmatprep.subr.bf16.mxu0 %v7091_v25  ;;  %4694 = vmatprep.subr.bf16.mxu1 %v7092_v12 }
 0x74c   :  { %4632 = vmatpush1.bf16.msra.mxu0 %v7093_v27  ;;  %4696 = vmatpush1.bf16.msra.mxu1 %v7094_v61 }
 0x74d   :  { %4698 = vmatprep.subr.bf16.mxu0 %v7095_v5  ;;  %4730 = vmatprep.subr.bf16.mxu1 %v7096_v15 }
 0x7c2   :  { %v2512_v34 = vpop.f32.mrb[26].mxu0  ;;  %v2583_v0 = vpop.f32.mrb[26].mxu1 }
 0x7c3   :  { %v2513_v42 = vadd.f32 %v2512_v34, %v7097_v20  ;;  %v2514_v49 = vpop.f32.mrb[27].mxu0  ;;  %v2585_v43 = vpop.f32.mrb[27].mxu1  ;;  %v2584_v12 = vadd.f32 %v2583_v0, %v6848_v8 }
 0x7c4   :  { %v2515_v37 = vadd.f32 %v2514_v49, %v6847_v7  ;;  %v2586_v61 = vadd.f32 %v2585_v43, %v6849_v41 }
 0x7c5   :  { %v2588_v24 = vmul.f32 0.5, %v2513_v42 }
 0x7c6   :  { %v2592_v25 = vmul.f32 0.5, %v2515_v37  ;;  %v2597_v5 = vmul.f32 0.5, %v2586_v61 }
 0x7c7   :  { %5069 = vtanh.f32 %v2588_v24 }
 0x7c8   :  { %5071 = vtanh.f32 %v2592_v25 }
 0x7c9   :  { %5073 = vtanh.f32 %v2584_v12 }
 0x7ca   :  { %5075 = vtanh.f32 %v2597_v5 }
 0x7d1   :  { %v5070_v27 = vpop.eup %5069 }
 0x7d2   :  { %v5072_v15 = vpop.eup %5071  ;;  %v2590_v30 = vadd.f32 1.0, %v5070_v27 }
 0x7d3   :  { %v2594_v35 = vadd.f32 1.0, %v5072_v15  ;;  %v5074_v20 = vpop.eup %5073 }
 0x7d4   :  { %v2591_v34 = vmul.f32 0.5, %v2590_v30  ;;  %v5076_v24 = vpop.eup %5075 }
 0x7d5   :  { %v2595_v59 = vmul.f32 0.5, %v2594_v35  ;;  %v2599_v0 = vadd.f32 1.0, %v5076_v24 }
 0x7d6   :  { %v2602_v2 = vmul.f32 %v5074_v20, %v2591_v34 }
 0x7d7   :  { %v2601_v49 = vmul.f32 %v2595_v59, %v6252_v45  ;;  %v2600_v61 = vmul.f32 0.5, %v2599_v0 }
 0x7d9   :  { %v6369_v42 = vadd.f32 %v2602_v2, %v2601_v49 }
 0x7db   :  { %5077 = vtanh.f32 %v6369_v42 }
 0x7e2   :  { %v2677_v37 = vpop.f32.mrb[12].mxu0  ;;  %v2748_v43 = vpop.f32.mrb[12].mxu1 }
 0x7e3   :  { %v4901_v25 = vadd.f32 %v2677_v37, %v6787_v51  ;;  %v2679_v12 = vpop.f32.mrb[13].mxu0  ;;  %v2750_v27 = vpop.f32.mrb[13].mxu1  ;;  %v4917_v45 = vadd.f32 %v2748_v43, %v5647_v38 }
 0x7e4   :  { %v4902_v30 = vadd.f32 %v2679_v12, %v6788_v11  ;;  %v4918_v59 = vadd.f32 %v2750_v27, %v5654_v31 }
 0x7e5   :  { %v5078_v5 = vpop.eup %5077  ;;  %v2757_v35 = vmul.f32 0.5, %v4901_v25 }
 0x7e6   :  { %v2761_v20 = vmul.f32 0.5, %v4902_v30  ;;  %v2605_v15 = vmul.f32 %v5078_v5, %v2600_v61  ;;  %v2766_v34 = vmul.f32 0.5, %v4918_v59  ;;  %v7136_v59 = vld [vmem:[#allocation50_spill] sm:$0xff] }
 0x7e7   :  { %5079 = vtanh.f32 %v2757_v35 }
 0x7e8   :  { %5081 = vtanh.f32 %v2761_v20  ;;  %v6376_v2 = vadd.f32 %v2605_v15, %v6259_v17  ;;  %2839 = vmatprep.mubr.f32.mxu0 %v2605_v15  ;;  %2910 = vmatprep.mubr.f32.mxu1 %v2605_v15 }
 0x7e9   :  { %5083 = vtanh.f32 %v4917_v45  ;;  %v7135_v45 = vld [vmem:[#allocation49_spill] sm:$0xff] }
 0x7ea   :  { %5085 = vtanh.f32 %v2766_v34  ;;  %v7137_v34 = vld [vmem:[#allocation51_spill] sm:$0xff] }
 0x7f1   :  { %v5080_v49 = vpop.eup %5079 }
 0x7f2   :  { %v5082_v24 = vpop.eup %5081  ;;  %v2759_v0 = vadd.f32 1.0, %v5080_v49  ;;  %v7138_v49 = vld [vmem:[#allocation52_spill] sm:$0xff] }
 0x7f3   :  { %v2763_v37 = vadd.f32 1.0, %v5082_v24  ;;  %v5084_v12 = vpop.eup %5083  ;;  %v7139_v24 = vld [vmem:[#allocation53_spill] sm:$0xff] }
 0x7f4   :  { %v2760_v25 = vmul.f32 0.5, %v2759_v0  ;;  %v5086_v17 = vpop.eup %5085  ;;  %v7140_v0 = vld [vmem:[#allocation54_spill] sm:$0xff] }
 0x7f5   :  { %v2764_v61 = vmul.f32 0.5, %v2763_v37  ;;  %v2768_v35 = vadd.f32 1.0, %v5086_v17  ;;  %v7141_v37 = vld [vmem:[#allocation55_spill] sm:$0xff]  ;;  %v7147_v17 = vld [vmem:[#allocation61_spill] sm:$0xff] }
 0x7f6   :  { %v2771_v30 = vmul.f32 %v5084_v12, %v2760_v25  ;;  %v7142_v25 = vld [vmem:[#allocation56_spill] sm:$0xff]  ;;  %v7143_v12 = vld [vmem:[#allocation57_spill] sm:$0xff] }
 0x7f7   :  { %v2770_v43 = vmul.f32 %v2764_v61, %v6263_v1  ;;  %v2769_v20 = vmul.f32 0.5, %v2768_v35  ;;  %v7134_v1 = vld [vmem:[#allocation48_spill] sm:$0xff]  ;;  %v7144_v61 = vld [vmem:[#allocation58_spill] sm:$0xff] }
 0x7f8   :  { %v7148_v35 = vld [vmem:[#allocation62_spill] sm:$0xff] }
 0x7f9   :  { %v6380_v5 = vadd.f32 %v2771_v30, %v2770_v43  ;;  %v7145_v30 = vld [vmem:[#allocation59_spill] sm:$0xff]  ;;  %v7146_v43 = vld [vmem:[#allocation60_spill] sm:$0xff] }
 0x7fb   :  { %5087 = vtanh.f32 %v6380_v5 }
 0x805   :  { %v5088_v27 = vpop.eup %5087 }
 0x806   :  { %v2774_v15 = vmul.f32 %v5088_v27, %v2769_v20  ;;  %v7149_v20 = vld [vmem:[#allocation63_spill] sm:$0xff]  ;;  %v7150_v27 = vld [vmem:[#allocation64_spill] sm:$0xff] }
 0x808   :  { %2840 = vmatmul.mubr.f32.vlgmr.msra.gmra.mrb[28].mxu0 %v2774_v15  ;;  %2911 = vmatmul.mubr.f32.vlgmr.msra.gmra.mrb[28].mxu1 %v2774_v15 }
 0x809   :  { %4700 = vmatpush1.bf16.msra.mxu0 %v5301_v47  ;;  %4732 = vmatpush1.bf16.msra.mxu1 %v5304_v50  ;;  %v7098_v47 = vld [vmem:[#allocation12_spill] sm:$0xff]  ;;  %v7099_v50 = vld [vmem:[#allocation13_spill] sm:$0xff] }
 0x80a   :  { %4702 = vmatprep.subr.bf16.mxu0 %v5307_v53  ;;  %4734 = vmatprep.subr.bf16.mxu1 %v5309_v56  ;;  %v7100_v53 = vld [vmem:[#allocation14_spill] sm:$0xff]  ;;  %v7101_v56 = vld [vmem:[#allocation15_spill] sm:$0xff] }
 0x80b   :  { %3004 = vmatprep.mubr.f32.mxu0 %v6726_v21  ;;  %3075 = vmatprep.mubr.f32.mxu1 %v6726_v21  ;;  %v7133_v21 = vld [vmem:[#allocation47_spill] sm:$0xff] }
 0x80d   :  { %4704 = vmatpush1.bf16.msra.mxu0 %v5315_v60  ;;  %4736 = vmatpush1.bf16.msra.mxu1 %v5319_v63  ;;  %v7102_v60 = vld [vmem:[#allocation16_spill] sm:$0xff]  ;;  %v7103_v63 = vld [vmem:[#allocation17_spill] sm:$0xff] }
 0x80e   :  { %4706 = vmatprep.subr.bf16.mxu0 %v5323_v3  ;;  %4738 = vmatprep.subr.bf16.mxu1 %v5326_v6  ;;  %v7104_v3 = vld [vmem:[#allocation18_spill] sm:$0xff]  ;;  %v7105_v6 = vld [vmem:[#allocation19_spill] sm:$0xff] }
 0x811   :  { %4708 = vmatpush1.bf16.msra.mxu0 %v5332_v10  ;;  %4740 = vmatpush1.bf16.msra.mxu1 %v5336_v13  ;;  %v7106_v10 = vld [vmem:[#allocation20_spill] sm:$0xff]  ;;  %v7107_v13 = vld [vmem:[#allocation21_spill] sm:$0xff] }
 0x812   :  { %4710 = vmatprep.subr.bf16.mxu0 %v5340_v16  ;;  %4742 = vmatprep.subr.bf16.mxu1 %v5343_v19  ;;  %v7108_v16 = vld [vmem:[#allocation22_spill] sm:$0xff]  ;;  %v7109_v19 = vld [vmem:[#allocation23_spill] sm:$0xff] }
 0x815   :  { %4712 = vmatpush1.bf16.msra.mxu0 %v5349_v23  ;;  %4744 = vmatpush1.bf16.msra.mxu1 %v5353_v26  ;;  %v7110_v23 = vld [vmem:[#allocation24_spill] sm:$0xff]  ;;  %v7111_v26 = vld [vmem:[#allocation25_spill] sm:$0xff] }
 0x816   :  { %4714 = vmatprep.subr.bf16.mxu0 %v5357_v29  ;;  %4746 = vmatprep.subr.bf16.mxu1 %v5360_v32  ;;  %v7112_v29 = vld [vmem:[#allocation26_spill] sm:$0xff]  ;;  %v7113_v32 = vld [vmem:[#allocation27_spill] sm:$0xff] }
 0x819   :  { %4716 = vmatpush1.bf16.msra.mxu0 %v5366_v36  ;;  %4748 = vmatpush1.bf16.msra.mxu1 %v5370_v40  ;;  %v7114_v36 = vld [vmem:[#allocation28_spill] sm:$0xff]  ;;  %v7115_v40 = vld [vmem:[#allocation29_spill] sm:$0xff] }
 0x81a   :  { %4718 = vmatprep.subr.bf16.mxu0 %v5374_v44  ;;  %4750 = vmatprep.subr.bf16.mxu1 %v5377_v48  ;;  %v7116_v44 = vld [vmem:[#allocation30_spill] sm:$0xff]  ;;  %v7117_v48 = vld [vmem:[#allocation31_spill] sm:$0xff] }
 0x81d   :  { %4720 = vmatpush1.bf16.msra.mxu0 %v5383_v54  ;;  %4752 = vmatpush1.bf16.msra.mxu1 %v5387_v58  ;;  %v7118_v54 = vld [vmem:[#allocation32_spill] sm:$0xff]  ;;  %v7119_v58 = vld [vmem:[#allocation33_spill] sm:$0xff] }
 0x81e   :  { %4722 = vmatprep.subr.bf16.mxu0 %v5391_v62  ;;  %4754 = vmatprep.subr.bf16.mxu1 %v5394_v4  ;;  %v7120_v62 = vld [vmem:[#allocation34_spill] sm:$0xff]  ;;  %v7121_v4 = vld [vmem:[#allocation35_spill] sm:$0xff] }
 0x821   :  { %4724 = vmatpush1.bf16.msra.mxu0 %v5400_v9  ;;  %4756 = vmatpush1.bf16.msra.mxu1 %v5404_v14  ;;  %v7122_v9 = vld [vmem:[#allocation36_spill] sm:$0xff]  ;;  %v7123_v14 = vld [vmem:[#allocation37_spill] sm:$0xff] }
 0x822   :  { %4726 = vmatprep.subr.bf16.mxu0 %v5408_v18  ;;  %4758 = vmatprep.subr.bf16.mxu1 %v5411_v22  ;;  %v7124_v18 = vld [vmem:[#allocation38_spill] sm:$0xff]  ;;  %v7125_v22 = vld [vmem:[#allocation39_spill] sm:$0xff] }
 0x825   :  { %4728 = vmatpush1.bf16.msra.mxu0 %v5417_v28  ;;  %4760 = vmatpush1.bf16.msra.mxu1 %v5421_v33  ;;  %v7126_v28 = vld [vmem:[#allocation40_spill] sm:$0xff]  ;;  %v7127_v33 = vld [vmem:[#allocation41_spill] sm:$0xff] }
 0x826   :  { %4762 = vmatprep.subr.bf16.mxu0 %v5425_v39  ;;  %4826 = vmatprep.subr.bf16.mxu1 %v5428_v46  ;;  %v7128_v39 = vld [vmem:[#allocation42_spill] sm:$0xff]  ;;  %v7129_v46 = vld [vmem:[#allocation43_spill] sm:$0xff] }
 0x828   :  { %3005 = vmatmul.mubr.f32.vlgmr.msra.gmra.mrb[14].mxu0 %v2774_v15  ;;  %3076 = vmatmul.mubr.f32.vlgmr.msra.gmra.mrb[14].mxu1 %v2774_v15  ;;  %v7151_v15 = vld [vmem:[#allocation65_spill] sm:$0xff] }
 0x829   :  { %4764 = vmatpush1.bf16.msra.mxu0 %v5431_v52  ;;  %4828 = vmatpush1.bf16.msra.mxu1 %v5435_v55  ;;  %v7130_v52 = vld [vmem:[#allocation44_spill] sm:$0xff]  ;;  %v7131_v55 = vld [vmem:[#allocation45_spill] sm:$0xff] }
 0x82a   :  { %4766 = vmatprep.subr.bf16.mxu0 %v5437_v57  ;;  %4830 = vmatprep.subr.bf16.mxu1 %v7098_v47  ;;  %v7132_v57 = vld [vmem:[#allocation46_spill] sm:$0xff] }
 0x82b   :  { %v7152_v47 = vld [vmem:[#allocation66_spill] sm:$0xff] }
 0x82d   :  { %4768 = vmatpush1.bf16.msra.mxu0 %v7099_v50  ;;  %4832 = vmatpush1.bf16.msra.mxu1 %v7100_v53  ;;  %v7153_v50 = vld [vmem:[#allocation67_spill] sm:$0xff]  ;;  %v7154_v53 = vld [vmem:[#allocation68_spill] sm:$0xff] }
 0x82e   :  { %4770 = vmatprep.subr.bf16.mxu0 %v7101_v56  ;;  %4834 = vmatprep.subr.bf16.mxu1 %v7102_v60  ;;  %v7155_v56 = vld [vmem:[#allocation69_spill] sm:$0xff]  ;;  %v7156_v60 = vld [vmem:[#allocation70_spill] sm:$0xff] }
 0x831   :  { %4772 = vmatpush1.bf16.msra.mxu0 %v7103_v63  ;;  %4836 = vmatpush1.bf16.msra.mxu1 %v7104_v3 }
 0x832   :  { %4774 = vmatprep.subr.bf16.mxu0 %v7105_v6  ;;  %4838 = vmatprep.subr.bf16.mxu1 %v7106_v10  ;;  %v7157_v6 = vld [vmem:[#allocation73_spill] sm:$0xff] }
 0x835   :  { %4776 = vmatpush1.bf16.msra.mxu0 %v7107_v13  ;;  %4840 = vmatpush1.bf16.msra.mxu1 %v7108_v16 }
 0x836   :  { %4778 = vmatprep.subr.bf16.mxu0 %v7109_v19  ;;  %4842 = vmatprep.subr.bf16.mxu1 %v7110_v23 }
 0x839   :  { %4780 = vmatpush1.bf16.msra.mxu0 %v7111_v26  ;;  %4844 = vmatpush1.bf16.msra.mxu1 %v7112_v29 }
 0x83a   :  { %4782 = vmatprep.subr.bf16.mxu0 %v7113_v32  ;;  %4846 = vmatprep.subr.bf16.mxu1 %v7114_v36 }
 0x83d   :  { %4784 = vmatpush1.bf16.msra.mxu0 %v7115_v40  ;;  %4848 = vmatpush1.bf16.msra.mxu1 %v7116_v44 }
 0x83e   :  { %4786 = vmatprep.subr.bf16.mxu0 %v7117_v48  ;;  %4850 = vmatprep.subr.bf16.mxu1 %v7118_v54 }
 0x841   :  { %4788 = vmatpush1.bf16.msra.mxu0 %v7119_v58  ;;  %4852 = vmatpush1.bf16.msra.mxu1 %v7120_v62 }
 0x842   :  { %4790 = vmatprep.subr.bf16.mxu0 %v7121_v4  ;;  %4854 = vmatprep.subr.bf16.mxu1 %v7122_v9 }
 0x845   :  { %4792 = vmatpush1.bf16.msra.mxu0 %v7123_v14  ;;  %4856 = vmatpush1.bf16.msra.mxu1 %v7124_v18 }
 0x846   :  { %4794 = vmatprep.subr.bf16.mxu0 %v7125_v22  ;;  %4858 = vmatprep.subr.bf16.mxu1 %v7126_v28 }
 0x849   :  { %4796 = vmatpush1.bf16.msra.mxu0 %v7127_v33  ;;  %4860 = vmatpush1.bf16.msra.mxu1 %v7128_v39 }
 0x84a   :  { %4798 = vmatprep.subr.bf16.mxu0 %v7129_v46  ;;  %4862 = vmatprep.subr.bf16.mxu1 %v7130_v52 }
 0x84d   :  { %4800 = vmatpush1.bf16.msra.mxu0 %v7131_v55  ;;  %4864 = vmatpush1.bf16.msra.mxu1 %v7132_v57 }
 0x84e   :  { %4802 = vmatprep.subr.bf16.mxu0 %v7133_v21  ;;  %4866 = vmatprep.subr.bf16.mxu1 %v7134_v1 }
 0x851   :  { %4804 = vmatpush1.bf16.msra.mxu0 %v7135_v45  ;;  %4868 = vmatpush1.bf16.msra.mxu1 %v7136_v59 }
 0x852   :  { %4806 = vmatprep.subr.bf16.mxu0 %v7137_v34  ;;  %4870 = vmatprep.subr.bf16.mxu1 %v7138_v49 }
 0x855   :  { %4808 = vmatpush1.bf16.msra.mxu0 %v7139_v24  ;;  %4872 = vmatpush1.bf16.msra.mxu1 %v7140_v0 }
 0x856   :  { %4810 = vmatprep.subr.bf16.mxu0 %v7141_v37  ;;  %4874 = vmatprep.subr.bf16.mxu1 %v7142_v25 }
 0x859   :  { %4812 = vmatpush1.bf16.msra.mxu0 %v7143_v12  ;;  %4876 = vmatpush1.bf16.msra.mxu1 %v7144_v61 }
 0x85a   :  { %4814 = vmatprep.subr.bf16.mxu0 %v7145_v30  ;;  %4878 = vmatprep.subr.bf16.mxu1 %v7146_v43 }
 0x85d   :  { %4816 = vmatpush1.bf16.msra.mxu0 %v7147_v17  ;;  %4880 = vmatpush1.bf16.msra.mxu1 %v7148_v35 }
 0x85e   :  { %4818 = vmatprep.subr.bf16.mxu0 %v7149_v20  ;;  %4882 = vmatprep.subr.bf16.mxu1 %v7150_v27 }
 0x861   :  { %4820 = vmatpush1.bf16.msra.mxu0 %v7151_v15  ;;  %4884 = vmatpush1.bf16.msra.mxu1 %v7152_v47 }
 0x862   :  { %4822 = vmatprep.subr.bf16.mxu0 %v7153_v50  ;;  %4886 = vmatprep.subr.bf16.mxu1 %v7154_v53 }
 0x865   :  { %4824 = vmatpush1.bf16.msra.mxu0 %v7155_v56  ;;  %4888 = vmatpush1.bf16.msra.mxu1 %v7156_v60 }
 0x8db   :  { %v2841_v63 = vpop.f32.mrb[28].mxu0  ;;  %v2912_v3 = vpop.f32.mrb[28].mxu1 }
 0x8dc   :  { %v2842_v10 = vadd.f32 %v2841_v63, %v7157_v6  ;;  %v2843_v13 = vpop.f32.mrb[29].mxu0  ;;  %v2914_v16 = vpop.f32.mrb[29].mxu1  ;;  %v2913_v29 = vadd.f32 %v2912_v3, %v6848_v8 }
 0x8dd   :  { %v2844_v19 = vadd.f32 %v2843_v13, %v6847_v7  ;;  %v2915_v32 = vadd.f32 %v2914_v16, %v6849_v41 }
 0x8de   :  { %v2917_v23 = vmul.f32 0.5, %v2842_v10 }
 0x8df   :  { %v2921_v26 = vmul.f32 0.5, %v2844_v19  ;;  %v2926_v36 = vmul.f32 0.5, %v2915_v32 }
 0x8e0   :  { %5089 = vtanh.f32 %v2917_v23 }
 0x8e1   :  { %5091 = vtanh.f32 %v2921_v26 }
 0x8e2   :  { %5093 = vtanh.f32 %v2913_v29 }
 0x8e3   :  { %5095 = vtanh.f32 %v2926_v36 }
 0x8ea   :  { %v5090_v40 = vpop.eup %5089 }
 0x8eb   :  { %v5092_v44 = vpop.eup %5091  ;;  %v2919_v48 = vadd.f32 1.0, %v5090_v40 }
 0x8ec   :  { %v2923_v54 = vadd.f32 1.0, %v5092_v44  ;;  %v5094_v62 = vpop.eup %5093 }
 0x8ed   :  { %v2920_v58 = vmul.f32 0.5, %v2919_v48  ;;  %v5096_v22 = vpop.eup %5095 }
 0x8ee   :  { %v2924_v4 = vmul.f32 0.5, %v2923_v54  ;;  %v2928_v28 = vadd.f32 1.0, %v5096_v22 }
 0x8ef   :  { %v2931_v9 = vmul.f32 %v5094_v62, %v2920_v58 }
 0x8f0   :  { %v2930_v14 = vmul.f32 %v2924_v4, %v6369_v42  ;;  %v2929_v57 = vmul.f32 0.5, %v2928_v28 }
 0x8f2   :  { %v6484_v18 = vadd.f32 %v2931_v9, %v2930_v14 }
 0x8f4   :  { %5097 = vtanh.f32 %v6484_v18 }
 0x8fb   :  { %v3006_v33 = vpop.f32.mrb[14].mxu0  ;;  %v3077_v39 = vpop.f32.mrb[14].mxu1 }
 0x8fc   :  { %v4903_v46 = vadd.f32 %v3006_v33, %v6787_v51  ;;  %v3008_v52 = vpop.f32.mrb[15].mxu0  ;;  %v3079_v55 = vpop.f32.mrb[15].mxu1  ;;  %v4919_v42 = vadd.f32 %v3077_v39, %v5647_v38 }
 0x8fd   :  { %v4904_v21 = vadd.f32 %v3008_v52, %v6788_v11  ;;  %v4920_v51 = vadd.f32 %v3079_v55, %v5654_v31 }
 0x8fe   :  { %v5098_v1 = vpop.eup %5097  ;;  %v3086_v45 = vmul.f32 0.5, %v4903_v46 }
 0x8ff   :  { %v3090_v59 = vmul.f32 0.5, %v4904_v21  ;;  %v2934_v34 = vmul.f32 %v5098_v1, %v2929_v57  ;;  %v3095_v24 = vmul.f32 0.5, %v4920_v51 }
 0x900   :  { %5099 = vtanh.f32 %v3086_v45 }
 0x901   :  { %5101 = vtanh.f32 %v3090_v59  ;;  %v2935_v49 = vadd.f32 %v2934_v34, %v6376_v2  ;;  %3168 = vmatprep.mubr.f32.mxu0 %v2934_v34  ;;  %3239 = vmatprep.mubr.f32.mxu1 %v2934_v34 }
 0x902   :  { %5103 = vtanh.f32 %v4919_v42 }
 0x903   :  { %5105 = vtanh.f32 %v3095_v24 }
 0x90a   :  { %v5100_v0 = vpop.eup %5099 }
 0x90b   :  { %v5102_v37 = vpop.eup %5101  ;;  %v3088_v25 = vadd.f32 1.0, %v5100_v0 }
 0x90c   :  { %v3092_v11 = vadd.f32 1.0, %v5102_v37  ;;  %v5104_v61 = vpop.eup %5103 }
 0x90d   :  { %v3089_v12 = vmul.f32 0.5, %v3088_v25  ;;  %v5106_v2 = vpop.eup %5105 }
 0x90e   :  { %v3093_v30 = vmul.f32 0.5, %v3092_v11  ;;  %v3097_v31 = vadd.f32 1.0, %v5106_v2 }
 0x90f   :  { %v3100_v43 = vmul.f32 %v5104_v61, %v3089_v12 }
 0x910   :  { %v3099_v38 = vmul.f32 %v3093_v30, %v6380_v5  ;;  %v3098_v35 = vmul.f32 0.5, %v3097_v31 }
 0x912   :  { %v3101_v17 = vadd.f32 %v3100_v43, %v3099_v38 }
 0x914   :  { %5107 = vtanh.f32 %v3101_v17  ;;  %3270 = vst [vmem:[%s6521_s8] sm:$0xff] %v3101_v17 }
 0x91e   :  { %v5108_v20 = vpop.eup %5107 }
 0x91f   :  { %v3103_v27 = vmul.f32 %v5108_v20, %v3098_v35 }
 0x921   :  { %3267 = vst [vmem:[%s6520_s7] sm:$0xff] %v3103_v27  ;;  %3169 = vmatmul.mubr.f32.vlgmr.msra.gmra.mrb[30].mxu0 %v3103_v27  ;;  %3240 = vmatmul.mubr.f32.vlgmr.msra.gmra.mrb[30].mxu1 %v3103_v27 }
 0x9f4   :  { %v3170_v15 = vpop.f32.mrb[30].mxu0  ;;  %v3241_v47 = vpop.f32.mrb[30].mxu1 }
 0x9f5   :  { %v3171_v5 = vadd.f32 %v3170_v15, %v7157_v6  ;;  %v3172_v50 = vpop.f32.mrb[31].mxu0  ;;  %v3243_v53 = vpop.f32.mrb[31].mxu1  ;;  %v3242_v3 = vadd.f32 %v3241_v47, %v6848_v8 }
 0x9f6   :  { %v3173_v56 = vadd.f32 %v3172_v50, %v6847_v7  ;;  %v3244_v10 = vadd.f32 %v3243_v53, %v6849_v41 }
 0x9f7   :  { %v3246_v60 = vmul.f32 0.5, %v3171_v5 }
 0x9f8   :  { %v3250_v63 = vmul.f32 0.5, %v3173_v56  ;;  %v3255_v13 = vmul.f32 0.5, %v3244_v10 }
 0x9f9   :  { %5109 = vtanh.f32 %v3246_v60 }
 0x9fa   :  { %5111 = vtanh.f32 %v3250_v63 }
 0x9fb   :  { %5113 = vtanh.f32 %v3242_v3 }
 0x9fc   :  { %5115 = vtanh.f32 %v3255_v13 }
 0xa03   :  { %v5110_v16 = vpop.eup %5109 }
 0xa04   :  { %v5112_v19 = vpop.eup %5111  ;;  %v3248_v23 = vadd.f32 1.0, %v5110_v16 }
 0xa05   :  { %v3252_v26 = vadd.f32 1.0, %v5112_v19  ;;  %v5114_v29 = vpop.eup %5113 }
 0xa06   :  { %v3249_v6 = vmul.f32 0.5, %v3248_v23  ;;  %v5116_v8 = vpop.eup %5115 }
 0xa07   :  { %v3253_v32 = vmul.f32 0.5, %v3252_v26  ;;  %v3257_v41 = vadd.f32 1.0, %v5116_v8 }
 0xa08   :  { %v3260_v36 = vmul.f32 %v5114_v29, %v3249_v6 }
 0xa09   :  { %v3259_v7 = vmul.f32 %v3253_v32, %v6484_v18  ;;  %v3258_v44 = vmul.f32 0.5, %v3257_v41 }
 0xa0b   :  { %v3261_v40 = vadd.f32 %v3260_v36, %v3259_v7 }
 0xa0d   :  { %5117 = vtanh.f32 %v3261_v40  ;;  %3288 = vst [vmem:[%s6521_s8 + $0x8] sm:$0xff] %v3261_v40 }
 0xa17   :  { %v5118_v48 = vpop.eup %5117 }
 0xa18   :  { %v3263_v54 = vmul.f32 %v5118_v48, %v3258_v44 }
 0xa1a   :  { %v3264_v58 = vadd.f32 %v3263_v54, %v2935_v49  ;;  %3287 = vst [vmem:[%s6520_s7 + $0x8] sm:$0xff] %v3263_v54 }
 0xa1c   :  { %v3265_v62 = vmul.f32 0.125, %v3264_v58 }
 0xa1e   :  { %3266 = vst [vmem:[%s6519_s6] sm:$0xff] %v3265_v62 }
 0xa1f   :  { %3285 = vsyncpa [#allocation4], 1 }
 0xa20   :  { %3286 = vsyncpa [#allocation6], 1 }

</bundles_post_ra>
